<compile_context>
chip_gen: v7x
topology: tpu7x:2x2x1
jax: 0.10.0
libtpu: 0.0.40
codegen_flags: <defaults>
</compile_context>

<pallas_src>
import math
import numpy as np

import jax
import jax.numpy as jnp
from jax.experimental import pallas as pl
from jax.experimental.pallas import tpu as pltpu


# ---------------------------------------------------------------------------
# Parameter setup (mirrors PositionEmbeddingHarmonicGuided.__init__)
# ---------------------------------------------------------------------------
def build_expanded_sins(sins, num_pos_feats=128, p_shift=True):
    """sins: (S, 3) array of [alpha, beta, phase] rows -> (num_pos_feats, 3)."""
    sins = np.asarray(sins, dtype=np.float64)
    S = sins.shape[0]
    assert num_pos_feats % S == 0, (
        "num_pos_feats should be divisible by the number of guide functions")
    expand_times = num_pos_feats // S
    expand_p_shift = np.array(
        [2 * math.pi / expand_times * i for i in range(expand_times)] * S)
    out = np.repeat(sins, expand_times, axis=0)          # row k repeated E times
    if p_shift:
        out[:, 2] = out[:, 2] + expand_p_shift
    return out  # (num_pos_feats, 3)


# ---------------------------------------------------------------------------
# Pallas kernel: lane-dense (TN, TL) tile of the flattened (N, Y*X) embedding.
# ---------------------------------------------------------------------------
def _harmonic_pos_kernel(params_ref, lx_ref, ly_ref, o_ref):
    # params_ref: (3, TN, 1)  [alpha; beta; phase] for this N-tile
    # lx_ref/ly_ref: (1, TL)  flattened i/(x_dim-1) and j/(y_dim-1) coordinates
    # o_ref: (TN, TL)
    a = params_ref[0]          # (TN, 1) -> broadcasts over lanes
    b = params_ref[1]
    p = params_ref[2]
    o_ref[...] = jnp.sin(a * lx_ref[...] + (b * ly_ref[...] + p))


def _pick_tile(total, candidates):
    for c in candidates:
        if c <= total and total % c == 0:
            return c
    return total


def position_embedding_harmonic_guided(x, expanded_sins):
    """x: (bs, c, H, W) array (only shape is used). expanded_sins: (N, 3) numpy.

    Returns (bs, N, W, H) float32 positional embedding matching the PyTorch module.
    """
    bs, _, x_dim, y_dim = x.shape
    n = int(expanded_sins.shape[0])
    X, Y = int(x_dim), int(y_dim)        # X = x_dim = H, Y = y_dim = W
    YX = Y * X

    # (3, N, 1): [alpha; beta; phase], N on the sublane axis of each param tile.
    params = jnp.asarray(np.asarray(expanded_sins).T, jnp.float32).reshape(3, n, 1)

    # Flattened coordinates: index k = j*X + i  ->  lx[k] = i/(X-1), ly[k] = j/(Y-1).
    lx = jnp.linspace(0.0, 1.0, X, dtype=jnp.float32)    # torch.linspace(0,1,X)
    ly = jnp.linspace(0.0, 1.0, Y, dtype=jnp.float32)
    lx_flat = jnp.tile(lx, Y).reshape(1, YX)
    ly_flat = jnp.repeat(ly, X).reshape(1, YX)

    # Tile sizes: sublane tile over N, lane-dense tile over Y*X.
    tn = _pick_tile(n, (128, 64, 32, 16, 8))
    tl = _pick_tile(YX, (4096, 2048, 1024, 512, 256, 128))
    grid = (n // tn, YX // tl)

    pos_flat = pl.pallas_call(
        _harmonic_pos_kernel,
        out_shape=jax.ShapeDtypeStruct((n, YX), jnp.float32),
        grid=grid,
        in_specs=[
            pl.BlockSpec((3, tn, 1), lambda i, j: (0, i, 0)),   # params per N-tile
            pl.BlockSpec((1, tl), lambda i, j: (0, j)),         # lx per YX-tile
            pl.BlockSpec((1, tl), lambda i, j: (0, j)),         # ly per YX-tile
        ],
        out_specs=pl.BlockSpec((tn, tl), lambda i, j: (i, j)),
        compiler_params=pltpu.CompilerParams(
            dimension_semantics=("parallel", "parallel")),
    )(params, lx_flat, ly_flat)

    # Free metadata reshape + batch broadcast (the result is batch-invariant).
    pos = pos_flat.reshape(n, Y, X)
    return jnp.broadcast_to(pos[None], (bs, n, Y, X))


# ---------------------------------------------------------------------------
# Pure-JAX reference (for correctness check)
# ---------------------------------------------------------------------------
def _reference(x, expanded_sins):
    bs, _, x_dim, y_dim = x.shape
    alpha = jnp.asarray(expanded_sins[:, 0], jnp.float32)[:, None, None]
    beta = jnp.asarray(expanded_sins[:, 1], jnp.float32)[:, None, None]
    phase = jnp.asarray(expanded_sins[:, 2], jnp.float32)[:, None, None]
    lx = jnp.linspace(0.0, 1.0, x_dim, dtype=jnp.float32)[None, None, :]   # over x_dim
    ly = jnp.linspace(0.0, 1.0, y_dim, dtype=jnp.float32)[None, :, None]   # over y_dim
    pos = jnp.sin(lx * alpha + ly * beta + phase)                          # (N, y, x)
    return jnp.broadcast_to(pos[None], (bs,) + pos.shape)


if __name__ == "__main__":
    key = jax.random.PRNGKey(0)
    k_x, k_sins = jax.random.split(key)

    # small, module-consistent shapes
    bs, c, H, W = 2, 4, 16, 16
    num_pos_feats = 128
    num_guides = 4

    x = jax.random.normal(k_x, (bs, c, H, W), dtype=jnp.float32)
    base_sins = np.asarray(
        jax.random.uniform(k_sins, (num_guides, 3), minval=-3.0, maxval=3.0))

    expanded_sins = build_expanded_sins(base_sins, num_pos_feats, p_shift=True)

    out = position_embedding_harmonic_guided(x, expanded_sins)
    out = jax.block_until_ready(out)

    ref = jax.block_until_ready(_reference(x, expanded_sins))
    assert out.shape == (bs, num_pos_feats, W, H), out.shape
    assert out.dtype == jnp.float32
    assert np.allclose(np.asarray(out), np.asarray(ref), atol=1e-3, rtol=1e-3)

    print("KERNEL_OK")
</pallas_src>

<mosaic_0001>
module attributes {stable_mosaic.version = 11 : i64} {
  func.func @_harmonic_pos_kernel(%arg0: i32, %arg1: i32, %arg2: memref<3x128x1xf32, #tpu.memory_space<vmem>>, %arg3: memref<1x256xf32, #tpu.memory_space<vmem>>, %arg4: memref<1x256xf32, #tpu.memory_space<vmem>>, %arg5: memref<128x256xf32, #tpu.memory_space<vmem>>) attributes {dimension_semantics = [#tpu.dimension_semantics<parallel>, #tpu.dimension_semantics<parallel>], iteration_bounds = array<i64: 1, 1>, scalar_prefetch = 0 : i64, scratch_operands = 0 : i64, tpu.core_type = #tpu.core_type<tc>, window_params = [{transform_indices = @transform_0, window_bounds = array<i64: 3, 128, 1>}, {transform_indices = @transform_1, window_bounds = array<i64: 1, 256>}, {transform_indices = @transform_2, window_bounds = array<i64: 1, 256>}, {transform_indices = @transform_3, window_bounds = array<i64: 128, 256>}]} {
    %c0 = arith.constant 0 : index
    %c0_0 = arith.constant 0 : index
    %c0_1 = arith.constant 0 : index
    %0 = vector.load %arg2[%c0, %c0_0, %c0_1] : memref<3x128x1xf32, #tpu.memory_space<vmem>>, vector<1x128x1xf32>
    %1 = vector.shape_cast %0 : vector<1x128x1xf32> to vector<128x1xf32>
    %c1 = arith.constant 1 : index
    %c0_2 = arith.constant 0 : index
    %c0_3 = arith.constant 0 : index
    %2 = vector.load %arg2[%c1, %c0_2, %c0_3] : memref<3x128x1xf32, #tpu.memory_space<vmem>>, vector<1x128x1xf32>
    %3 = vector.shape_cast %2 : vector<1x128x1xf32> to vector<128x1xf32>
    %c2 = arith.constant 2 : index
    %c0_4 = arith.constant 0 : index
    %c0_5 = arith.constant 0 : index
    %4 = vector.load %arg2[%c2, %c0_4, %c0_5] : memref<3x128x1xf32, #tpu.memory_space<vmem>>, vector<1x128x1xf32>
    %5 = vector.shape_cast %4 : vector<1x128x1xf32> to vector<128x1xf32>
    %c0_6 = arith.constant 0 : index
    %c0_7 = arith.constant 0 : index
    %6 = vector.load %arg3[%c0_6, %c0_7] : memref<1x256xf32, #tpu.memory_space<vmem>>, vector<1x256xf32>
    %7 = vector.broadcast %1 : vector<128x1xf32> to vector<128x256xf32>
    %8 = vector.broadcast %6 : vector<1x256xf32> to vector<128x256xf32>
    %9 = arith.mulf %7, %8 : vector<128x256xf32>
    %c0_8 = arith.constant 0 : index
    %c0_9 = arith.constant 0 : index
    %10 = vector.load %arg4[%c0_8, %c0_9] : memref<1x256xf32, #tpu.memory_space<vmem>>, vector<1x256xf32>
    %11 = vector.broadcast %3 : vector<128x1xf32> to vector<128x256xf32>
    %12 = vector.broadcast %10 : vector<1x256xf32> to vector<128x256xf32>
    %13 = arith.mulf %11, %12 : vector<128x256xf32>
    %14 = vector.broadcast %5 : vector<128x1xf32> to vector<128x256xf32>
    %15 = arith.addf %13, %14 : vector<128x256xf32>
    %16 = arith.addf %9, %15 : vector<128x256xf32>
    %17 = math.sin %16 : vector<128x256xf32>
    %c0_10 = arith.constant 0 : index
    %c0_11 = arith.constant 0 : index
    %18 = vector.load %arg5[%c0_10, %c0_11] : memref<128x256xf32, #tpu.memory_space<vmem>>, vector<128x256xf32>
    tpu.vector_store %arg5[%c0_10, %c0_11], %17 {strides = array<i32>} : memref<128x256xf32, #tpu.memory_space<vmem>>, vector<128x256xf32>,
    return
  }
  func.func @transform_0(%arg0: i32, %arg1: i32) -> (i32, i32, i32) {
    %c0_i32 = arith.constant 0 : i32
    %c0_i32_0 = arith.constant 0 : i32
    %c0_i32_1 = arith.constant 0 : i32
    return %c0_i32, %arg0, %c0_i32_0 : i32, i32, i32
  }
  func.func @transform_1(%arg0: i32, %arg1: i32) -> (i32, i32) {
    %c0_i32 = arith.constant 0 : i32
    %c0_i32_0 = arith.constant 0 : i32
    return %c0_i32, %arg1 : i32, i32
  }
  func.func @transform_2(%arg0: i32, %arg1: i32) -> (i32, i32) {
    %c0_i32 = arith.constant 0 : i32
    %c0_i32_0 = arith.constant 0 : i32
    return %c0_i32, %arg1 : i32, i32
  }
  func.func @transform_3(%arg0: i32, %arg1: i32) -> (i32, i32) {
    %c0_i32 = arith.constant 0 : i32
    return %arg0, %arg1 : i32, i32
  }
}

</mosaic_0001>

<bundles_post_ra>
// kernel: tpu_custom_call.1
= control target key start
LH: loop header
LB: loop body
LE: loop exit
PB: predicated region body
PF: predicated region fallthrough
CT: control target
= control target key end

     0   :  { %v4285_v2 = vmov 0   ;;  %s7179_s0 = inlined_call_operand.vmem [shape: f32[3,128,1], index: 0, kind: input, shape index: {}]   ;;  %s7180_s1 = inlined_call_operand.vmem [shape: f32[1,256], index: 1, kind: input, shape index: {}]   ;;  %s7181_s2 = inlined_call_operand.vmem [shape: f32[1,256], index: 2, kind: input, shape index: {}]   ;;  %s7182_s3 = inlined_call_operand.hbm [shape: f32[128,256], index: 3, kind: output, shape index: {}]  }
   0x1   :  { %v17_v0 = vld [vmem:[%s7179_s0 + $0x10] sm:$0xff]  ;;  %v15_v1 = vld [vmem:[%s7179_s0] sm:$0xff]  ;;  %4132 = vset.pattern.permute.xlu1 %v4285_v2  ;;  %4131 = vset.pattern.permute.xlu0 %v4285_v2  ;;  %v18_v3 = vld [vmem:[%s7179_s0 + $0x18] sm:$0xff] }
   0x2   :  { %78 = vperm.xlu1 %4132, %v17_v0   ;;  %68 = vperm.xlu0 %4131, %v15_v1   ;;  %v16_v4 = vld [vmem:[%s7179_s0 + $0x8] sm:$0xff]  ;;  %v19_v6 = vld [vmem:[%s7179_s0 + $0x20] sm:$0xff]  ;;  %v22_v7 = vld [vmem:[%s7179_s0 + $0x38] sm:$0xff] }
   0x3   :  { %v20_v5 = vld [vmem:[%s7179_s0 + $0x28] sm:$0xff]  ;;  %v21_v8 = vld [vmem:[%s7179_s0 + $0x30] sm:$0xff]  ;;  %v23_v10 = vld [vmem:[%s7179_s0 + $0x40] sm:$0xff] }
   0x4   :  { %v24_v9 = vld [vmem:[%s7179_s0 + $0x48] sm:$0xff] }
   0x6   :  { %83 = vperm.xlu1 %4132, %v18_v3   ;;  %73 = vperm.xlu0 %4131, %v16_v4  }
   0xa   :  { %93 = vperm.xlu1 %4132, %v20_v5   ;;  %88 = vperm.xlu0 %4131, %v19_v6  }
   0xe   :  { %103 = vperm.xlu1 %4132, %v22_v7   ;;  %98 = vperm.xlu0 %4131, %v21_v8  }
   0xf   :  { %8 = vsyncpa [#allocation3], 0  ;;  %v3834_v11 = vld [vmem:[%s7179_s0 + $0x88] sm:$0xff]  ;;  %v3833_v12 = vld [vmem:[%s7179_s0 + $0x80] sm:$0xff]  ;;  %v147_v49 = vlaneseq }
  0x10   :  { %v3836_v13 = vld [vmem:[%s7179_s0 + $0x98] sm:$0xff]  ;;  %v3835_v14 = vld [vmem:[%s7179_s0 + $0x90] sm:$0xff]  ;;  %v3838_v15 = vld [vmem:[%s7179_s0 + $0xa8] sm:$0xff] }
  0x11   :  { %v3837_v16 = vld [vmem:[%s7179_s0 + $0xa0] sm:$0xff]  ;;  %v3840_v17 = vld [vmem:[%s7179_s0 + $0xb8] sm:$0xff]  ;;  %v3839_v18 = vld [vmem:[%s7179_s0 + $0xb0] sm:$0xff]  ;;  %v148_v50 = vshrl.u32 %v147_v49, 7 }
  0x12   :  { %113 = vperm.xlu1 %4132, %v24_v9   ;;  %108 = vperm.xlu0 %4131, %v23_v10   ;;  %v3842_v19 = vld [vmem:[%s7179_s0 + $0xc8] sm:$0xff]  ;;  %v3841_v20 = vld [vmem:[%s7179_s0 + $0xc0] sm:$0xff]  ;;  %v3844_v21 = vld [vmem:[%s7179_s0 + $0xd8] sm:$0xff] }
  0x13   :  { %v3843_v22 = vld [vmem:[%s7179_s0 + $0xd0] sm:$0xff]  ;;  %v3846_v23 = vld [vmem:[%s7179_s0 + $0xe8] sm:$0xff]  ;;  %v3845_v24 = vld [vmem:[%s7179_s0 + $0xe0] sm:$0xff]  ;;  %v149_v51 = vsub.s32 0, %v148_v50  ;;  %v153_v52 = vsub.s32 1, %v148_v50 }
  0x14   :  { %v3848_v25 = vld [vmem:[%s7179_s0 + $0xf8] sm:$0xff]  ;;  %v3847_v26 = vld [vmem:[%s7179_s0 + $0xf0] sm:$0xff]  ;;  %v28_v29 = vld [vmem:[%s7179_s0 + $0x68] sm:$0xff] }
  0x15   :  { %v26_v27 = vld [vmem:[%s7179_s0 + $0x58] sm:$0xff]  ;;  %v25_v28 = vld [vmem:[%s7179_s0 + $0x50] sm:$0xff]  ;;  %v27_v30 = vld [vmem:[%s7179_s0 + $0x60] sm:$0xff] }
  0x16   :  { %197 = vperm.xlu1 %4132, %v3834_v11   ;;  %192 = vperm.xlu0 %4131, %v3833_v12   ;;  %v30_v31 = vld [vmem:[%s7179_s0 + $0x78] sm:$0xff]  ;;  %v29_v32 = vld [vmem:[%s7179_s0 + $0x70] sm:$0xff]  ;;  %v3850_v33 = vld [vmem:[%s7179_s0 + $0x108] sm:$0xff] }
  0x17   :  { %v3849_v34 = vld [vmem:[%s7179_s0 + $0x100] sm:$0xff]  ;;  %v3852_v35 = vld [vmem:[%s7179_s0 + $0x118] sm:$0xff]  ;;  %v3851_v36 = vld [vmem:[%s7179_s0 + $0x110] sm:$0xff] }
  0x18   :  { %v3854_v37 = vld [vmem:[%s7179_s0 + $0x128] sm:$0xff]  ;;  %v3853_v38 = vld [vmem:[%s7179_s0 + $0x120] sm:$0xff]  ;;  %v3856_v39 = vld [vmem:[%s7179_s0 + $0x138] sm:$0xff] }
  0x19   :  { %v3855_v40 = vld [vmem:[%s7179_s0 + $0x130] sm:$0xff]  ;;  %v3858_v41 = vld [vmem:[%s7179_s0 + $0x148] sm:$0xff]  ;;  %v3857_v42 = vld [vmem:[%s7179_s0 + $0x140] sm:$0xff] }
  0x1a   :  { %207 = vperm.xlu1 %4132, %v3836_v13   ;;  %202 = vperm.xlu0 %4131, %v3835_v14   ;;  %v3860_v43 = vld [vmem:[%s7179_s0 + $0x158] sm:$0xff]  ;;  %v3859_v44 = vld [vmem:[%s7179_s0 + $0x150] sm:$0xff]  ;;  %v3862_v45 = vld [vmem:[%s7179_s0 + $0x168] sm:$0xff] }
  0x1b   :  { %v3861_v46 = vld [vmem:[%s7179_s0 + $0x160] sm:$0xff]  ;;  %v3864_v47 = vld [vmem:[%s7179_s0 + $0x178] sm:$0xff]  ;;  %v3863_v48 = vld [vmem:[%s7179_s0 + $0x170] sm:$0xff] }
  0x1c   :  { %v65_v53 = vld [vmem:[%s7180_s1] sm:$0x3] }
  0x1d   :  { %v4462_v54 = vrot.slane %v65_v53, %v149_v51  ;;  %v4464_v55 = vrot.slane %v65_v53, %v153_v52 }
  0x1e   :  { %217 = vperm.xlu1 %4132, %v3838_v15   ;;  %212 = vperm.xlu0 %4131, %v3837_v16  }
  0x22   :  { %227 = vperm.xlu1 %4132, %v3840_v17   ;;  %222 = vperm.xlu0 %4131, %v3839_v18   ;;  %v189_v18 = vld [vmem:[%s7181_s2] sm:$0x3]  ;;  %s4292_s2 = smov [#allocation2]  }
  0x23   :  { %s3822_s29 = sshll.u32 %s4292_s2, 4  ;;  %s3823_s29 = int_to_ptr.vmem [resolvable:$true] %s3822_s29 }
  0x24   :  { %s4261_s30 = scalar_lea.vmem %s3823_s29, 4096  ;;  %p4266_p1 = scmp.lt.s32.totalorder %s3823_s29, %s3823_s29 }
  0x25   :  { %p4262_p0 = scmp.ne.s32.totalorder %s3823_s29, %s4261_s30  ;;  %p4267_p2 = scmp.lt.s32.totalorder %s4261_s30, %s4261_s30 }
  0x26   :  { %237 = vperm.xlu1 %4132, %v3842_v19   ;;  %232 = vperm.xlu0 %4131, %v3841_v20  }
  0x27   :  { %p4268_p3 = por %p4267_p2, %p4266_p1 }
  0x29   :  { %p4269_p4 = pnand %p4268_p3, %p4262_p0 }
  0x2a   :  { %247 = vperm.xlu1 %4132, %v3844_v21   ;;  %242 = vperm.xlu0 %4131, %v3843_v22   ;;  %v4525_v21 = vrot.slane %v189_v18, %v149_v51  ;;  %v4527_v22 = vrot.slane %v189_v18, %v153_v52 }
  0x2e   :  { %257 = vperm.xlu1 %4132, %v3846_v23   ;;  %252 = vperm.xlu0 %4131, %v3845_v24  }
  0x32   :  { %267 = vperm.xlu1 %4132, %v3848_v25   ;;  %262 = vperm.xlu0 %4131, %v3847_v26  }
  0x36   :  { %123 = vperm.xlu1 %4132, %v26_v27   ;;  %118 = vperm.xlu0 %4131, %v25_v28  }
  0x3a   :  { %133 = vperm.xlu1 %4132, %v28_v29   ;;  %128 = vperm.xlu0 %4131, %v27_v30  }
  0x3e   :  { %143 = vperm.xlu1 %4132, %v30_v31   ;;  %138 = vperm.xlu0 %4131, %v29_v32  }
  0x42   :  { %320 = vperm.xlu1 %4132, %v3850_v33   ;;  %315 = vperm.xlu0 %4131, %v3849_v34  }
  0x46   :  { %330 = vperm.xlu1 %4132, %v3852_v35   ;;  %325 = vperm.xlu0 %4131, %v3851_v36  }
  0x4a   :  { %340 = vperm.xlu1 %4132, %v3854_v37   ;;  %335 = vperm.xlu0 %4131, %v3853_v38  }
  0x4e   :  { %350 = vperm.xlu1 %4132, %v3856_v39   ;;  %345 = vperm.xlu0 %4131, %v3855_v40  }
  0x52   :  { %360 = vperm.xlu1 %4132, %v3858_v41   ;;  %355 = vperm.xlu0 %4131, %v3857_v42  }
  0x56   :  { %370 = vperm.xlu1 %4132, %v3860_v43   ;;  %365 = vperm.xlu0 %4131, %v3859_v44  }
  0x5a   :  { %380 = vperm.xlu1 %4132, %v3862_v45   ;;  %375 = vperm.xlu0 %4131, %v3861_v46  }
  0x5e   :  { %390 = vperm.xlu1 %4132, %v3864_v47   ;;  %385 = vperm.xlu0 %4131, %v3863_v48  }
  0x81   :  { %v79_v56 = vpop.permute.xlu1 %78  ;;  %v4466_v57 = vpop.permute.xlu0 %68 }
  0x82   :  { %v4469_v58 = vmul.f32 %v4462_v54, %v79_v56  ;;  %v4472_v59 = vmul.f32 %v4464_v55, %v79_v56 }
  0x85   :  { %v84_v60 = vpop.permute.xlu1 %83  ;;  %v4474_v61 = vpop.permute.xlu0 %73 }
  0x86   :  { %v4477_v62 = vmul.f32 %v4462_v54, %v84_v60  ;;  %v4480_v63 = vmul.f32 %v4464_v55, %v84_v60 }
  0x89   :  { %v94_v0 = vpop.permute.xlu1 %93  ;;  %v89_v1 = vpop.permute.xlu0 %88 }
  0x8a   :  { %v4483_v2 = vmul.f32 %v4462_v54, %v94_v0  ;;  %v4486_v3 = vmul.f32 %v4464_v55, %v94_v0  ;;  %v4489_v4 = vmul.f32 %v4462_v54, %v89_v1  ;;  %v4492_v5 = vmul.f32 %v4464_v55, %v89_v1 }
  0x8d   :  { %v104_v6 = vpop.permute.xlu1 %103  ;;  %v99_v7 = vpop.permute.xlu0 %98 }
  0x8e   :  { %v4495_v8 = vmul.f32 %v4462_v54, %v104_v6  ;;  %v4498_v9 = vmul.f32 %v4464_v55, %v104_v6  ;;  %v4501_v10 = vmul.f32 %v4462_v54, %v99_v7  ;;  %v4504_v11 = vmul.f32 %v4464_v55, %v99_v7 }
  0x90   :  { %7199 = vst [vmem:[#allocation5_spill] sm:$0xff] %v4495_v8  ;;  %7200 = vst [vmem:[#allocation6_spill] sm:$0xff] %v4498_v9 }
  0x91   :  { %7201 = vst [vmem:[#allocation7_spill] sm:$0xff] %v4501_v10  ;;  %7202 = vst [vmem:[#allocation8_spill] sm:$0xff] %v4504_v11  ;;  %v114_v12 = vpop.permute.xlu1 %113  ;;  %v109_v13 = vpop.permute.xlu0 %108 }
  0x92   :  { %v4507_v14 = vmul.f32 %v4462_v54, %v114_v12  ;;  %v4510_v15 = vmul.f32 %v4464_v55, %v114_v12  ;;  %v4513_v16 = vmul.f32 %v4462_v54, %v109_v13  ;;  %v4516_v17 = vmul.f32 %v4464_v55, %v109_v13 }
  0x94   :  { %7203 = vst [vmem:[#allocation9_spill] sm:$0xff] %v4507_v14  ;;  %7204 = vst [vmem:[#allocation10_spill] sm:$0xff] %v4510_v15 }
  0x95   :  { %7205 = vst [vmem:[#allocation11_spill] sm:$0xff] %v4513_v16  ;;  %7206 = vst [vmem:[#allocation12_spill] sm:$0xff] %v4516_v17  ;;  %v4521_v19 = vpop.permute.xlu1 %197  ;;  %v4523_v20 = vpop.permute.xlu0 %192 }
  0x99   :  { %v208_v23 = vpop.permute.xlu1 %207  ;;  %v203_v24 = vpop.permute.xlu0 %202 }
  0x9a   :  { %v4530_v25 = vmul.f32 %v4525_v21, %v208_v23  ;;  %v4533_v26 = vmul.f32 %v4527_v22, %v208_v23  ;;  %v4536_v27 = vmul.f32 %v4525_v21, %v203_v24  ;;  %v4539_v28 = vmul.f32 %v4527_v22, %v203_v24 }
  0x9d   :  { %v218_v29 = vpop.permute.xlu1 %217  ;;  %v213_v30 = vpop.permute.xlu0 %212 }
  0x9e   :  { %v4542_v31 = vmul.f32 %v4525_v21, %v218_v29  ;;  %v4545_v32 = vmul.f32 %v4527_v22, %v218_v29  ;;  %v4548_v33 = vmul.f32 %v4525_v21, %v213_v30  ;;  %v4551_v34 = vmul.f32 %v4527_v22, %v213_v30 }
  0xa1   :  { %v228_v35 = vpop.permute.xlu1 %227  ;;  %v223_v36 = vpop.permute.xlu0 %222 }
  0xa2   :  { %v4554_v37 = vmul.f32 %v4525_v21, %v228_v35  ;;  %v4557_v38 = vmul.f32 %v4527_v22, %v228_v35  ;;  %v4560_v39 = vmul.f32 %v4525_v21, %v223_v36  ;;  %v4563_v40 = vmul.f32 %v4527_v22, %v223_v36 }
  0xa4   :  { %7207 = vst [vmem:[#allocation13_spill] sm:$0xff] %v4560_v39  ;;  %7208 = vst [vmem:[#allocation14_spill] sm:$0xff] %v4563_v40 }
  0xa5   :  { %v238_v41 = vpop.permute.xlu1 %237  ;;  %v233_v42 = vpop.permute.xlu0 %232 }
  0xa6   :  { %v4566_v43 = vmul.f32 %v4525_v21, %v238_v41  ;;  %v4569_v44 = vmul.f32 %v4527_v22, %v238_v41  ;;  %v4572_v45 = vmul.f32 %v4525_v21, %v233_v42  ;;  %v4575_v46 = vmul.f32 %v4527_v22, %v233_v42 }
  0xa8   :  { %7209 = vst [vmem:[#allocation15_spill] sm:$0xff] %v4566_v43  ;;  %7210 = vst [vmem:[#allocation16_spill] sm:$0xff] %v4569_v44 }
  0xa9   :  { %7211 = vst [vmem:[#allocation17_spill] sm:$0xff] %v4572_v45  ;;  %7212 = vst [vmem:[#allocation18_spill] sm:$0xff] %v4575_v46  ;;  %v248_v47 = vpop.permute.xlu1 %247  ;;  %v243_v48 = vpop.permute.xlu0 %242 }
  0xaa   :  { %v4578_v49 = vmul.f32 %v4525_v21, %v248_v47  ;;  %v4581_v50 = vmul.f32 %v4527_v22, %v248_v47  ;;  %v4584_v51 = vmul.f32 %v4525_v21, %v243_v48  ;;  %v4587_v52 = vmul.f32 %v4527_v22, %v243_v48 }
  0xac   :  { %7213 = vst [vmem:[#allocation19_spill] sm:$0xff] %v4578_v49  ;;  %7214 = vst [vmem:[#allocation20_spill] sm:$0xff] %v4581_v50 }
  0xad   :  { %7215 = vst [vmem:[#allocation21_spill] sm:$0xff] %v4584_v51  ;;  %7216 = vst [vmem:[#allocation22_spill] sm:$0xff] %v4587_v52  ;;  %v258_v53 = vpop.permute.xlu1 %257  ;;  %v253_v56 = vpop.permute.xlu0 %252 }
  0xae   :  { %v4590_v60 = vmul.f32 %v4525_v21, %v258_v53  ;;  %v4593_v0 = vmul.f32 %v4527_v22, %v258_v53  ;;  %v4596_v1 = vmul.f32 %v4525_v21, %v253_v56  ;;  %v4599_v6 = vmul.f32 %v4527_v22, %v253_v56 }
  0xb0   :  { %7217 = vst [vmem:[#allocation23_spill] sm:$0xff] %v4590_v60  ;;  %7218 = vst [vmem:[#allocation24_spill] sm:$0xff] %v4593_v0 }
  0xb1   :  { %7219 = vst [vmem:[#allocation25_spill] sm:$0xff] %v4596_v1  ;;  %7220 = vst [vmem:[#allocation26_spill] sm:$0xff] %v4599_v6  ;;  %v268_v7 = vpop.permute.xlu1 %267  ;;  %v263_v12 = vpop.permute.xlu0 %262 }
  0xb2   :  { %v4602_v13 = vmul.f32 %v4525_v21, %v268_v7  ;;  %v4605_v18 = vmul.f32 %v4527_v22, %v268_v7  ;;  %v4608_v23 = vmul.f32 %v4525_v21, %v263_v12  ;;  %v4611_v24 = vmul.f32 %v4527_v22, %v263_v12 }
  0xb4   :  { %7221 = vst [vmem:[#allocation27_spill] sm:$0xff] %v4602_v13  ;;  %7222 = vst [vmem:[#allocation28_spill] sm:$0xff] %v4605_v18  ;;  %v283_v13 = vmul.f32 %v4525_v21, %v4521_v19 }
  0xb5   :  { %7223 = vst [vmem:[#allocation29_spill] sm:$0xff] %v4608_v23  ;;  %7224 = vst [vmem:[#allocation30_spill] sm:$0xff] %v4611_v24  ;;  %v124_v29 = vpop.permute.xlu1 %123  ;;  %v119_v30 = vpop.permute.xlu0 %118 }
  0xb6   :  { %v4614_v35 = vmul.f32 %v4462_v54, %v124_v29  ;;  %v4617_v36 = vmul.f32 %v4464_v55, %v124_v29  ;;  %v4620_v41 = vmul.f32 %v4462_v54, %v119_v30  ;;  %v4623_v42 = vmul.f32 %v4464_v55, %v119_v30 }
  0xb8   :  { %7225 = vst [vmem:[#allocation31_spill] sm:$0xff] %v4614_v35  ;;  %7226 = vst [vmem:[#allocation32_spill] sm:$0xff] %v4617_v36  ;;  %v7196_v36 = vmov 1326507024  }
  0xb9   :  { %7227 = vst [vmem:[#allocation33_spill] sm:$0xff] %v4620_v41  ;;  %7228 = vst [vmem:[#allocation34_spill] sm:$0xff] %v4623_v42  ;;  %v134_v47 = vpop.permute.xlu1 %133  ;;  %v129_v48 = vpop.permute.xlu0 %128 }
  0xba   :  { %v4626_v53 = vmul.f32 %v4462_v54, %v134_v47  ;;  %v4629_v56 = vmul.f32 %v4464_v55, %v134_v47  ;;  %v4632_v7 = vmul.f32 %v4462_v54, %v129_v48  ;;  %v4635_v12 = vmul.f32 %v4464_v55, %v129_v48 }
  0xbb   :  { %v284_v48 = vmul.f32 %v4527_v22, %v4521_v19 }
  0xbc   :  { %7229 = vst [vmem:[#allocation35_spill] sm:$0xff] %v4626_v53  ;;  %7230 = vst [vmem:[#allocation36_spill] sm:$0xff] %v4629_v56 }
  0xbd   :  { %7231 = vst [vmem:[#allocation37_spill] sm:$0xff] %v4632_v7  ;;  %7232 = vst [vmem:[#allocation38_spill] sm:$0xff] %v4635_v12  ;;  %v144_v29 = vpop.permute.xlu1 %143  ;;  %v139_v24 = vpop.permute.xlu0 %138  ;;  %v281_v12 = vmul.f32 %v4525_v21, %v4523_v20  ;;  %v157_v21 = vmul.f32 %v4462_v54, %v4466_v57 }
  0xbe   :  { %v4638_v23 = vmul.f32 %v4462_v54, %v144_v29  ;;  %v4641_v30 = vmul.f32 %v4464_v55, %v144_v29  ;;  %v4644_v18 = vmul.f32 %v4462_v54, %v139_v24  ;;  %v4647_v47 = vmul.f32 %v4464_v55, %v139_v24 }
  0xbf   :  { %v158_v29 = vmul.f32 %v4464_v55, %v4466_v57  ;;  %v160_v24 = vmul.f32 %v4464_v55, %v4474_v61 }
  0xc0   :  { %7233 = vst [vmem:[#allocation39_spill] sm:$0xff] %v4638_v23  ;;  %7234 = vst [vmem:[#allocation40_spill] sm:$0xff] %v4641_v30  ;;  %v282_v23 = vmul.f32 %v4527_v22, %v4523_v20 }
  0xc1   :  { %7235 = vst [vmem:[#allocation41_spill] sm:$0xff] %v4644_v18  ;;  %7236 = vst [vmem:[#allocation42_spill] sm:$0xff] %v4647_v47  ;;  %v159_v18 = vmul.f32 %v4462_v54, %v4474_v61  ;;  %v321_v47 = vpop.permute.xlu1 %320  ;;  %v316_v30 = vpop.permute.xlu0 %315 }
  0xc2   :  { %v395_v6 = vadd.f32 %v321_v47, %v283_v13  ;;  %v396_v7 = vadd.f32 %v321_v47, %v284_v48  ;;  %v393_v19 = vadd.f32 %v316_v30, %v281_v12  ;;  %v394_v1 = vadd.f32 %v316_v30, %v282_v23 }
  0xc4   :  { %v4665_v56 = vadd.f32 %v395_v6, %v159_v18  ;;  %v4667_v20 = vadd.f32 %v396_v7, %v160_v24  ;;  %v4669_v22 = vadd.f32 %v394_v1, %v158_v29  ;;  %v4671_v53 = vadd.f32 %v393_v19, %v157_v21 }
  0xc6   :  { %v7183_v0 = vand.u32 2147483647, %v4665_v56  ;;  %v668_v55 = vand.u32 2139095040, %v4665_v56  ;;  %v7184_v61 = vand.u32 2147483647, %v4667_v20  ;;  %v772_v13 = vand.u32 2139095040, %v4667_v20 }
  0xc7   :  { %v460_v1 = vand.u32 2139095040, %v4671_v53  ;;  %v7185_v24 = vand.u32 2147483647, %v4671_v53  ;;  %vm667_vm13 = vcmp.lt.s32.totalorder %v4665_v56, 0 }
  0xc8   :  { %v669_v23 = vshrl.u32 %v668_v55, 23  ;;  %v672_v54 = vand.u32 8388607, %v7183_v0  ;;  %v773_v57 = vshrl.u32 %v772_v13, 23  ;;  %v776_v6 = vand.u32 8388607, %v7184_v61 }
  0xc9   :  { %v461_v12 = vshrl.u32 %v460_v1, 23 }
  0xca   :  { %v3873_v18 = vadd.s32 4294967169, %v669_v23  ;;  %v3877_v7 = vadd.s32 4294967169, %v773_v57  ;;  %v673_v30 = vor.u32 8388608, %v672_v54  ;;  %v777_v48 = vor.u32 8388608, %v776_v6 }
  0xcb   :  { %v3865_v19 = vadd.s32 4294967169, %v461_v12  ;;  %v4689_v23 = vand.u32 8388607, %v7185_v24  ;;  %v7186_v6 = vmov 683565275  }
  0xcc   :  { %v675_v47 = vadd.s32 1, %v3873_v18  ;;  %v779_v29 = vadd.s32 1, %v3877_v7  ;;  %v4683_v60 = vshll.u32 %v673_v30, 8  ;;  %v4685_v61 = vshll.u32 %v777_v48, 8 }
  0xcd   :  { %v4691_v54 = vadd.s32 1, %v3865_v19  ;;  %v7192_v12 = vmov 2475754826   ;;  %v7188_v30 = vmov 2131351028  }
  0xce   :  { %vm676_vm0 = vcmp.gt.s32.totalorder %v675_v47, 0  ;;  %vm780_vm1 = vcmp.gt.s32.totalorder %v779_v29, 0  ;;  %v7194_v24 = vmov 920167782  }
  0xcf   :  { %v677_v21 = vsel %vm676_vm0, %v675_v47, 0  ;;  %v781_v0 = vsel %vm780_vm1, %v779_v29, 0  ;;  %v7190_v29 = vmov 2102212464   ;;  %vm468_vm6 = vcmp.gt.s32.totalorder %v4691_v54, 0 }
  0xd0   :  { %v678_v55 = vshrl.u32 %v677_v21, 5  ;;  %v679_v13 = vand.u32 31, %v677_v21  ;;  %v4694_v18 = vshrl.u32 %v781_v0, 5  ;;  %v783_v7 = vand.u32 31, %v781_v0 }
  0xd1   :  { %v7237_v0 = vmov 683565275  }
  0xd2   :  { %v680_v57 = vsub.s32 32, %v679_v13  ;;  %v682_v1 = vshll.u32 %v7186_v6, %v679_v13  ;;  %v685_v47 = vshll.u32 %v7192_v12, %v679_v13  ;;  %v688_v48 = vshll.u32 %v7188_v30, %v679_v13 }
  0xd3   :  { %v691_v21 = vshll.u32 %v7190_v29, %v679_v13  ;;  %v694_v19 = vshll.u32 %v7194_v24, %v679_v13  ;;  %vm697_vm2 = vcmp.lt.s32.totalorder %v678_v55, 1  ;;  %vm698_vm3 = vcmp.lt.s32.totalorder %v678_v55, 2 }
  0xd4   :  { %v683_v42 = vshrl.u32 %v7192_v12, %v680_v57  ;;  %v686_v52 = vshrl.u32 %v7188_v30, %v680_v57  ;;  %v689_v6 = vshrl.u32 %v7190_v29, %v680_v57  ;;  %v681_v41 = vshrl.u32 %v7237_v0, %v680_v57 }
  0xd5   :  { %v692_v51 = vshrl.u32 %v7194_v24, %v680_v57  ;;  %v695_v35 = vshrl.u32 %v7196_v36, %v680_v57  ;;  %v784_v46 = vsub.s32 32, %v783_v7  ;;  %vm699_vm4 = vcmp.lt.s32.totalorder %v678_v55, 3 }
  0xd6   :  { %v684_v50 = vor.u32 %v683_v42, %v682_v1  ;;  %v687_v49 = vor.u32 %v686_v52, %v685_v47  ;;  %v690_v17 = vor.u32 %v689_v6, %v688_v48  ;;  %vm700_vm5 = vcmp.lt.s32.totalorder %v678_v55, 4 }
  0xd7   :  { %v693_v13 = vor.u32 %v692_v51, %v691_v21  ;;  %v696_v16 = vor.u32 %v695_v35, %v694_v19  ;;  %v786_v57 = vshll.u32 %v7237_v0, %v783_v7  ;;  %v7238_v51 = vmov 2475754826  }
  0xd8   :  { %v701_v30 = vsel %vm697_vm2, %v681_v41, %v684_v50  ;;  %v702_v29 = vsel %vm700_vm5, %v690_v17, 2102212464  ;;  %v705_v12 = vsel %vm697_vm2, %v684_v50, %v687_v49  ;;  %v709_v45 = vsel %vm697_vm2, %v687_v49, %v690_v17 }
  0xd9   :  { %v703_v24 = vsel %vm699_vm4, %v687_v49, %v702_v29  ;;  %v706_v15 = vsel %vm700_vm5, %v693_v13, 920167782  ;;  %v710_v14 = vsel %vm700_vm5, %v696_v16, 1326507024  ;;  %v787_v35 = vshrl.u32 %v7238_v51, %v784_v46 }
  0xda   :  { %v707_v52 = vsel %vm699_vm4, %v690_v17, %v706_v15  ;;  %v711_v42 = vsel %vm699_vm4, %v693_v13, %v710_v14  ;;  %v789_v6 = vshll.u32 %v7238_v51, %v783_v7  ;;  %v704_v41 = vsel %vm698_vm3, %v701_v30, %v703_v24 }
  0xdb   :  { %v708_v1 = vsel %vm698_vm3, %v705_v12, %v707_v52  ;;  %v712_v50 = vsel %vm698_vm3, %v709_v45, %v711_v42  ;;  %v7239_v47 = vmov 2131351028   ;;  %v788_v14 = vor.u32 %v787_v35, %v786_v57 }
  0xdc   :  { %v790_v49 = vshrl.u32 %v7239_v47, %v784_v46  ;;  %v4718_v16 = vmul.u32.u64.low %v4683_v60, %v712_v50  ;;  %v4719_v48 = vmul.u32.u64.high %v4683_v60, %v712_v50, %v4718_v16  ;;  %v792_v21 = vshll.u32 %v7239_v47, %v783_v7 }
  0xdd   :  { %v4722_v29 = vmul.u32.u64.low %v4683_v60, %v708_v1  ;;  %v4723_v15 = vmul.u32.u64.high %v4683_v60, %v708_v1, %v4722_v29  ;;  %v7240_v19 = vmov 2102212464   ;;  %v785_v12 = vshrl.u32 %v7237_v0, %v784_v46 }
  0xde   :  { %v791_v17 = vor.u32 %v790_v49, %v789_v6  ;;  %v793_v24 = vshrl.u32 %v7240_v19, %v784_v46  ;;  %v795_v45 = vshll.u32 %v7240_v19, %v783_v7  ;;  %v7241_v55 = vmov 920167782  }
  0xdf   :  { %v796_v30 = vshrl.u32 %v7241_v55, %v784_v46  ;;  %v799_v13 = vshrl.u32 %v7196_v36, %v784_v46  ;;  %v720_v52 = vmul.u32 %v4683_v60, %v704_v41  ;;  %v798_v1 = vshll.u32 %v7241_v55, %v783_v7 }
  0xe0   :  { %v794_v42 = vor.u32 %v793_v24, %v792_v21  ;;  %vm801_vm7 = vcmp.lt.s32.totalorder %v4694_v18, 1  ;;  %vm722_vm8 = vc.u32 %v4719_v48, %v4722_v29  ;;  %v723_v57 = vadd.s32 1, %v4723_v15 }
  0xe1   :  { %v797_v35 = vor.u32 %v796_v30, %v795_v45  ;;  %vm802_vm9 = vcmp.lt.s32.totalorder %v4694_v18, 2  ;;  %v800_v6 = vor.u32 %v799_v13, %v798_v1  ;;  %vm803_vm10 = vcmp.lt.s32.totalorder %v4694_v18, 3 }
  0xe2   :  { %vm804_vm11 = vcmp.lt.s32.totalorder %v4694_v18, 4  ;;  %v809_v46 = vsel %vm801_vm7, %v788_v14, %v791_v17  ;;  %v724_v60 = vsel %vm722_vm8, %v723_v57, %v4723_v15  ;;  %v813_v7 = vsel %vm801_vm7, %v791_v17, %v794_v42 }
  0xe3   :  { %v806_v41 = vsel %vm804_vm11, %v794_v42, 2102212464  ;;  %v810_v50 = vsel %vm804_vm11, %v797_v35, 920167782  ;;  %v725_v49 = vadd.s32 %v724_v60, %v720_v52  ;;  %v805_v16 = vsel %vm801_vm7, %v785_v12, %v788_v14 }
  0xe4   :  { %v811_v21 = vsel %vm803_vm10, %v794_v42, %v810_v50  ;;  %v814_v24 = vsel %vm804_vm11, %v800_v6, 1326507024  ;;  %v807_v36 = vsel %vm803_vm10, %v791_v17, %v806_v41  ;;  %v469_v13 = vsel %vm468_vm6, %v4691_v54, 0 }
  0xe5   :  { %v812_v45 = vsel %vm802_vm9, %v809_v46, %v811_v21  ;;  %v815_v30 = vsel %vm803_vm10, %v797_v35, %v814_v24  ;;  %v726_v1 = vadd.s32 536870912, %v725_v49  ;;  %v564_v12 = vand.u32 2139095040, %v4669_v22 }
  0xe6   :  { %v816_v15 = vsel %vm802_vm9, %v813_v7, %v815_v30  ;;  %v4748_v57 = vmul.u32.u64.low %v4685_v61, %v812_v45  ;;  %v4749_v44 = vmul.u32.u64.high %v4685_v61, %v812_v45, %v4748_v57  ;;  %v808_v42 = vsel %vm802_vm9, %v805_v16, %v807_v36 }
  0xe7   :  { %v4753_v14 = vmul.u32.u64.low %v4685_v61, %v816_v15  ;;  %v4754_v17 = vmul.u32.u64.high %v4685_v61, %v816_v15, %v4753_v14  ;;  %v727_v52 = vshrl.u32 %v726_v1, 30  ;;  %v471_v54 = vand.u32 31, %v469_v13 }
  0xe8   :  { %v7198_v35 = vand.u32 2147483647, %v4669_v22  ;;  %v465_v6 = vor.u32 8388608, %v4689_v23  ;;  %v827_v60 = vadd.s32 1, %v4749_v44  ;;  %v824_v50 = vmul.u32 %v4685_v61, %v808_v42 }
  0xe9   :  { %v728_v46 = vshll.u32 %v727_v52, 30  ;;  %v472_v41 = vsub.s32 32, %v471_v54  ;;  %vm826_vm12 = vc.u32 %v4754_v17, %v4748_v57  ;;  %v565_v7 = vshrl.u32 %v564_v12, 23 }
  0xea   :  { %v828_v36 = vsel %vm826_vm12, %v827_v60, %v4749_v44  ;;  %v4771_v18 = vand.u32 8388607, %v7198_v35  ;;  %v721_v23 = vadd.s32 %v4722_v29, %v4719_v48  ;;  %v4775_v61 = vshll.u32 %v465_v6, 8 }
  0xeb   :  { %v4766_v21 = vsub.s32 %v725_v49, %v728_v46  ;;  %v829_v16 = vadd.s32 %v828_v36, %v824_v50  ;;  %v475_v24 = vshrl.u32 %v7238_v51, %v472_v41  ;;  %v7242_v45 = vand.u32 2147483647, %v4665_v56 }
  0xec   :  { %v4784_v44 = vshrl.u32 %v469_v13, 5  ;;  %v478_v1 = vshrl.u32 %v7239_v47, %v472_v41  ;;  %v481_v15 = vshrl.u32 %v7240_v19, %v472_v41  ;;  %v751_v48 = vsub.s32 4, %v727_v52 }
  0xed   :  { %vm4779_vm14 = vcmp.le.f32.partialorder %v7242_v45, 0.7853982  ;;  %v731_v49 = vsub.s32 0, %v4766_v21  ;;  %v830_v29 = vadd.s32 536870912, %v829_v16  ;;  %v474_v14 = vshll.u32 %v7237_v0, %v471_v54 }
  0xee   :  { %v3869_v12 = vadd.s32 4294967169, %v565_v7  ;;  %v477_v6 = vshll.u32 %v7238_v51, %v471_v54  ;;  %v480_v46 = vshll.u32 %v7239_v47, %v471_v54  ;;  %v484_v60 = vshrl.u32 %v7241_v55, %v472_v41 }
  0xef   :  { %v3874_v42 = vmin.u32 %v731_v49, %v4766_v21  ;;  %v831_v50 = vshrl.u32 %v830_v29, 30  ;;  %v476_v13 = vor.u32 %v475_v24, %v474_v14  ;;  %v483_v36 = vshll.u32 %v7240_v19, %v471_v54 }
  0xf0   :  { %v7245_v45 = vmov 1326507024   ;;  %v479_v11 = vor.u32 %v478_v1, %v477_v6  ;;  %v482_v40 = vor.u32 %v481_v15, %v480_v46  ;;  %v486_v10 = vshll.u32 %v7241_v55, %v471_v54 }
  0xf1   :  { %v487_v35 = vshrl.u32 %v7245_v45, %v472_v41  ;;  %v733_v43 = vclz %v3874_v42  ;;  %v832_v7 = vshll.u32 %v831_v50, 30  ;;  %v485_v39 = vor.u32 %v484_v60, %v483_v36 }
  0xf2   :  { %vm489_vm15 = vcmp.lt.s32.totalorder %v4784_v44, 1  ;;  %v752_v29 = vsel %vm667_vm13, %v751_v48, %v727_v52  ;;  %vm492_vm0 = vcmp.lt.s32.totalorder %v4784_v44, 4  ;;  %vm490_vm1 = vcmp.lt.s32.totalorder %v4784_v44, 2 }
  0xf3   :  { %v3875_v9 = vadd.s32 4294967294, %v733_v43  ;;  %v488_v24 = vor.u32 %v487_v35, %v486_v10  ;;  %v4801_v14 = vsub.s32 %v829_v16, %v832_v7  ;;  %vm491_vm2 = vcmp.lt.s32.totalorder %v4784_v44, 3 }
  0xf4   :  { %v498_v54 = vsel %vm492_vm0, %v485_v39, 920167782  ;;  %vm771_vm4 = vcmp.lt.s32.totalorder %v4667_v20, 0  ;;  %v473_v43 = vshrl.u32 %v7237_v0, %v472_v41  ;;  %v497_v52 = vsel %vm489_vm15, %v476_v13, %v479_v11 }
  0xf5   :  { %vm3876_vm3 = vcmp.lt.s32.totalorder %v3875_v9, 0  ;;  %v499_v10 = vsel %vm491_vm2, %v482_v40, %v498_v54  ;;  %v754_v16 = vsel %vm4779_vm14, 0, %v752_v29  ;;  %v835_v1 = vsub.s32 0, %v4801_v14 }
  0xf6   :  { %v736_v35 = vsel %vm3876_vm3, 0, %v3875_v9  ;;  %v501_v15 = vsel %vm489_vm15, %v479_v11, %v482_v40  ;;  %v494_v41 = vsel %vm492_vm0, %v482_v40, 2102212464  ;;  %v502_v6 = vsel %vm492_vm0, %v488_v24, 1326507024 }
  0xf7   :  { %v737_v48 = vsub.s32 32, %v736_v35  ;;  %v741_v42 = vsub.s32 4294967266, %v736_v35  ;;  %v738_v46 = vshll.u32 %v4766_v21, %v736_v35  ;;  %v3878_v9 = vmin.u32 %v835_v1, %v4801_v14 }
  0xf8   :  { %v500_v60 = vsel %vm490_vm1, %v497_v52, %v499_v10  ;;  %v503_v36 = vsel %vm491_vm2, %v485_v39, %v502_v6  ;;  %v571_v49 = vadd.s32 1, %v3869_v12  ;;  %v855_v8 = vsub.s32 4, %v831_v50 }
  0xf9   :  { %v739_v7 = vshrl.u32 %v721_v23, %v737_v48  ;;  %v742_v29 = vadd.s32 127, %v741_v42  ;;  %v504_v54 = vsel %vm490_vm1, %v501_v15, %v503_v36  ;;  %v837_v40 = vclz %v3878_v9 }
  0xfa   :  { %v493_v24 = vsel %vm489_vm15, %v473_v43, %v476_v13  ;;  %v495_v21 = vsel %vm491_vm2, %v479_v11, %v494_v41  ;;  %v4835_v52 = vmul.u32.u64.low %v4775_v61, %v504_v54  ;;  %v4836_v10 = vmul.u32.u64.high %v4775_v61, %v504_v54, %v4835_v52 }
  0xfb   :  { %v740_v35 = vor.u32 %v739_v7, %v738_v46  ;;  %v743_v1 = vshll.u32 %v742_v29, 23  ;;  %v3879_v39 = vadd.s32 4294967294, %v837_v40  ;;  %vm572_vm5 = vcmp.gt.s32.totalorder %v571_v49, 0 }
  0xfc   :  { %v4839_v23 = vmul.u32.u64.low %v4775_v61, %v500_v60  ;;  %v4840_v48 = vmul.u32.u64.high %v4775_v61, %v500_v60, %v4839_v23  ;;  %v825_v13 = vadd.s32 %v4748_v57, %v4754_v17  ;;  %v496_v11 = vsel %vm490_vm1, %v493_v24, %v495_v21 }
  0xfd   :  { %v744_v12 = vor.u32 4788187, %v743_v1  ;;  %v573_v43 = vsel %vm572_vm5, %v571_v49, 0  ;;  %v758_v15 = vadd.s32 3, %v754_v16  ;;  %vm3880_vm6 = vcmp.lt.s32.totalorder %v3879_v39, 0 }
  0xfe   :  { %v4849_v42 = vsel %vm771_vm4, %v855_v8, %v831_v50  ;;  %v575_v41 = vand.u32 31, %v573_v43  ;;  %v747_v46 = vcvt.s32.f32 %v740_v35  ;;  %v840_v9 = vsel %vm3880_vm6, 0, %v3879_v39 }
  0xff   :  { %v745_v6 = vand.u32 2147483647, %v744_v12  ;;  %vm514_vm7 = vc.u32 %v4836_v10, %v4839_v23  ;;  %v841_v60 = vsub.s32 32, %v840_v9  ;;  %v845_v36 = vsub.s32 4294967266, %v840_v9 }
 0x100   :  { %v512_v57 = vmul.u32 %v4775_v61, %v496_v11  ;;  %v515_v17 = vadd.s32 1, %v4840_v48  ;;  %v842_v49 = vshll.u32 %v4801_v14, %v840_v9  ;;  %v4856_v16 = vshrl.u32 %v573_v43, 5 }
 0x101   :  { %v748_v44 = vmul.f32 %v747_v46, %v745_v6  ;;  %v576_v8 = vsub.s32 32, %v575_v41  ;;  %v843_v50 = vshrl.u32 %v825_v13, %v841_v60  ;;  %v846_v7 = vadd.s32 127, %v845_v36 }
 0x102   :  { %v516_v29 = vsel %vm514_vm7, %v515_v17, %v4840_v48  ;;  %v578_v54 = vshll.u32 %v7237_v0, %v575_v41  ;;  %v581_v61 = vshll.u32 %v7238_v51, %v575_v41  ;;  %v584_v48 = vshll.u32 %v7239_v47, %v575_v41 }
 0x103   :  { %v749_v40 = vxor.u32 2147483648, %v748_v44  ;;  %v517_v24 = vadd.s32 %v516_v29, %v512_v57  ;;  %v579_v21 = vshrl.u32 %v7238_v51, %v576_v8  ;;  %v844_v35 = vor.u32 %v843_v50, %v842_v49 }
 0x104   :  { %v847_v1 = vshll.u32 %v846_v7, 23  ;;  %v582_v52 = vshrl.u32 %v7239_v47, %v576_v8  ;;  %v585_v14 = vshrl.u32 %v7240_v19, %v576_v8  ;;  %v587_v46 = vshll.u32 %v7240_v19, %v575_v41 }
 0x105   :  { %v750_v39 = vsel %vm667_vm13, %v749_v40, %v748_v44  ;;  %v518_v12 = vadd.s32 536870912, %v517_v24  ;;  %v580_v13 = vor.u32 %v579_v21, %v578_v54  ;;  %v851_v6 = vcvt.s32.f32 %v844_v35 }
 0x106   :  { %v753_v11 = vsel %vm4779_vm14, %v4665_v56, %v750_v39  ;;  %v848_v43 = vor.u32 4788187, %v847_v1  ;;  %v583_v60 = vor.u32 %v582_v52, %v581_v61  ;;  %v588_v36 = vshrl.u32 %v7241_v55, %v576_v8 }
 0x107   :  { %4133 = vcosq.f32 %v753_v11  ;;  %v4871_v9 = vshrl.u32 %v518_v12, 30  ;;  %v586_v17 = vor.u32 %v585_v14, %v584_v48  ;;  %v591_v44 = vshrl.u32 %v7245_v45, %v576_v8 }
 0x108   :  { %4135 = vsinq.f32 %v753_v11  ;;  %v849_v57 = vand.u32 2147483647, %v848_v43  ;;  %v759_v49 = vand.u32 3, %v758_v15  ;;  %v7246_v50 = vand.u32 2147483647, %v4667_v20 }
 0x109   :  { %v520_v7 = vshll.u32 %v4871_v9, 30  ;;  %v589_v29 = vor.u32 %v588_v36, %v587_v46  ;;  %v590_v21 = vshll.u32 %v7241_v55, %v575_v41  ;;  %v7249_v61 = vor.u32 8388608, %v4771_v18 }
 0x10a   :  { %vm4877_vm8 = vcmp.le.f32.partialorder %v7246_v50, 0.7853982  ;;  %v852_v54 = vmul.f32 %v851_v6, %v849_v57  ;;  %v577_v1 = vshrl.u32 %v7237_v0, %v576_v8  ;;  %vm593_vm9 = vcmp.lt.s32.totalorder %v4856_v16, 1 }
 0x10b   :  { %v858_v40 = vsel %vm4877_vm8, 0, %v4849_v42  ;;  %v4888_v35 = vshll.u32 %v7249_v61, 8  ;;  %v4890_v15 = vsub.s32 %v517_v24, %v520_v7  ;;  %vm596_vm10 = vcmp.lt.s32.totalorder %v4856_v16, 4 }
 0x10c   :  { %v853_v52 = vxor.u32 2147483648, %v852_v54  ;;  %v592_v14 = vor.u32 %v591_v44, %v590_v21  ;;  %v598_v39 = vsel %vm596_vm10, %v586_v17, 2102212464  ;;  %v601_v42 = vsel %vm593_vm9, %v580_v13, %v583_v60  ;;  %v331_v44 = vpop.permute.xlu1 %330 }
 0x10d   :  { %vm760_vm11 = vcmp.lt.s32.totalorder %v759_v49, 2  ;;  %v523_v18 = vsub.s32 0, %v4890_v15  ;;  %vm594_vm12 = vcmp.lt.s32.totalorder %v4856_v16, 2  ;;  %vm595_vm13 = vcmp.lt.s32.totalorder %v4856_v16, 3 }
 0x10e   :  { %v602_v41 = vsel %vm596_vm10, %v589_v29, 920167782  ;;  %vm757_vm14 = vweird.f32 %v4665_v56  ;;  %v854_v8 = vsel %vm771_vm4, %v853_v52, %v852_v54  ;;  %v597_v24 = vsel %vm593_vm9, %v577_v1, %v580_v13 }
 0x10f   :  { %v599_v12 = vsel %vm595_vm13, %v583_v60, %v598_v39  ;;  %v603_v48 = vsel %vm595_vm13, %v586_v17, %v602_v41  ;;  %v857_v11 = vsel %vm4877_vm8, %v4667_v20, %v854_v8  ;;  %v3866_v43 = vmin.u32 %v523_v18, %v4890_v15 }
 0x110   :  { %v604_v6 = vsel %vm594_vm12, %v601_v42, %v603_v48  ;;  %v605_v46 = vsel %vm593_vm9, %v583_v60, %v586_v17  ;;  %4137 = vcosq.f32 %v857_v11  ;;  %v606_v13 = vsel %vm596_vm10, %v592_v14, 1326507024 }
 0x111   :  { %v4924_v36 = vmul.u32.u64.low %v4888_v35, %v604_v6  ;;  %v4925_v57 = vmul.u32.u64.high %v4888_v35, %v604_v6, %v4924_v36  ;;  %v4134_v50 = vpop.eup %4133  ;;  %vm761_vm15 = vcmp.eq.s32.totalorder %v759_v49, 0  ;;  %vm764_vm0 = vcmp.eq.s32.totalorder %v759_v49, 2 }
 0x112   :  { %4139 = vsinq.f32 %v857_v11  ;;  %vm459_vm1 = vcmp.lt.s32.totalorder %v4671_v53, 0  ;;  %v525_v30 = vclz %v3866_v43  ;;  %v4136_v7 = vpop.eup %4135  ;;  %v765_v54 = vxor.u32 2147483648, %v4134_v50 }
 0x113   :  { %v862_v60 = vadd.s32 3, %v858_v40  ;;  %v600_v17 = vsel %vm594_vm12, %v597_v24, %v599_v12  ;;  %v607_v21 = vsel %vm595_vm13, %v589_v29, %v606_v13  ;;  %v762_v61 = vxor.u32 2147483648, %v4136_v7 }
 0x114   :  { %v3867_v1 = vadd.s32 4294967294, %v525_v30  ;;  %v608_v52 = vsel %vm594_vm12, %v605_v46, %v607_v21  ;;  %v399_v14 = vadd.f32 %v331_v44, %v4530_v25  ;;  %v766_v39 = vsel %vm764_vm0, %v765_v54, %v4136_v7 }
 0x115   :  { %v4937_v42 = vmul.u32.u64.low %v4888_v35, %v608_v52  ;;  %v4938_v18 = vmul.u32.u64.high %v4888_v35, %v608_v52, %v4937_v42  ;;  %v619_v40 = vadd.s32 1, %v4925_v57  ;;  %v763_v41 = vsel %vm761_vm15, %v4134_v50, %v762_v61 }
 0x116   :  { %vm3868_vm2 = vcmp.lt.s32.totalorder %v3867_v1, 0  ;;  %v400_v8 = vadd.f32 %v331_v44, %v4533_v26  ;;  %v4944_v29 = vadd.f32 %v399_v14, %v4477_v62  ;;  %v767_v16 = vsel %vm760_vm11, %v763_v41, %v766_v39 }
 0x117   :  { %v863_v24 = vand.u32 3, %v862_v60  ;;  %v528_v12 = vsel %vm3868_vm2, 0, %v3867_v1  ;;  %v543_v25 = vsub.s32 4, %v4871_v9  ;;  %v768_v48 = vsel %vm757_vm14, nan, %v767_v16 }
 0x118   :  { %vm861_vm3 = vweird.f32 %v4667_v20  ;;  %v513_v11 = vadd.s32 %v4839_v23, %v4836_v10  ;;  %v529_v43 = vsub.s32 32, %v528_v12  ;;  %v533_v6 = vsub.s32 4294967266, %v528_v12  ;;  %3787 = vst [vmem:[#allocation2 + $0x10] sm:$0xff] %v768_v48 }
 0x119   :  { %v7250_v62 = vand.u32 2147483647, %v4671_v53  ;;  %v616_v49 = vmul.u32 %v4888_v35, %v600_v17  ;;  %vm618_vm5 = vc.u32 %v4938_v18, %v4924_v36  ;;  %v4963_v56 = vadd.f32 %v400_v8, %v4480_v63 }
 0x11a   :  { %v530_v46 = vshll.u32 %v4890_v15, %v528_v12  ;;  %v531_v10 = vshrl.u32 %v513_v11, %v529_v43  ;;  %v534_v23 = vadd.s32 127, %v533_v6  ;;  %v620_v13 = vsel %vm618_vm5, %v619_v40, %v4925_v57  ;;  %v4138_v44 = vpop.eup %4137  ;;  %v326_v15 = vpop.permute.xlu0 %325 }
 0x11b   :  { %vm4955_vm4 = vcmp.le.f32.partialorder %v7250_v62, 0.7853982  ;;  %vm864_vm6 = vcmp.lt.s32.totalorder %v863_v24, 2  ;;  %v544_v50 = vsel %vm459_vm1, %v543_v25, %v4871_v9  ;;  %v621_v30 = vadd.s32 %v620_v13, %v616_v49 }
 0x11c   :  { %v1084_v35 = vand.u32 2139095040, %v4944_v29  ;;  %v4140_v7 = vpop.eup %4139  ;;  %v869_v54 = vxor.u32 2147483648, %v4138_v44  ;;  %v532_v60 = vor.u32 %v531_v10, %v530_v46  ;;  %v535_v63 = vshll.u32 %v534_v23, 23 }
 0x11d   :  { %v1081_v17 = vand.u32 2147483647, %v4944_v29  ;;  %v866_v21 = vxor.u32 2147483648, %v4140_v7  ;;  %vm868_vm7 = vcmp.eq.s32.totalorder %v863_v24, 2  ;;  %v622_v61 = vadd.s32 536870912, %v621_v30 }
 0x11e   :  { %v1085_v57 = vshrl.u32 %v1084_v35, 23  ;;  %vm865_vm8 = vcmp.eq.s32.totalorder %v863_v24, 0  ;;  %v870_v1 = vsel %vm868_vm7, %v869_v54, %v4140_v7  ;;  %v536_v52 = vor.u32 4788187, %v535_v63 }
 0x11f   :  { %v546_v9 = vsel %vm4955_vm4, 0, %v544_v50  ;;  %v867_v14 = vsel %vm865_vm8, %v4138_v44, %v866_v21  ;;  %v4974_v39 = vshrl.u32 %v622_v61, 30  ;;  %v397_v40 = vadd.f32 %v326_v15, %v4536_v27 }
 0x120   :  { %v3889_v42 = vadd.s32 4294967169, %v1085_v57  ;;  %v871_v41 = vsel %vm864_vm6, %v867_v14, %v870_v1  ;;  %v537_v8 = vand.u32 2147483647, %v536_v52  ;;  %v539_v16 = vcvt.s32.f32 %v532_v60 }
 0x121   :  { %v1088_v12 = vand.u32 8388607, %v1081_v17  ;;  %v872_v25 = vsel %vm861_vm3, nan, %v871_v41  ;;  %v624_v48 = vshll.u32 %v4974_v39, 30  ;;  %v550_v6 = vadd.s32 3, %v546_v9 }
 0x122   :  { %v1091_v11 = vadd.s32 1, %v3889_v42  ;;  %3788 = vst [vmem:[#allocation2 + $0x18] sm:$0xff] %v872_v25  ;;  %v540_v43 = vmul.f32 %v539_v16, %v537_v8  ;;  %v1188_v62 = vand.u32 2139095040, %v4963_v56  ;;  %v398_v27 = vadd.f32 %v326_v15, %v4539_v28 }
 0x123   :  { %v4985_v24 = vsub.s32 %v621_v30, %v624_v48  ;;  %v4988_v49 = vadd.f32 %v397_v40, %v4469_v58  ;;  %v1089_v10 = vor.u32 8388608, %v1088_v12  ;;  %v4993_v35 = vand.u32 3, %v550_v6 }
 0x124   :  { %vm1092_vm9 = vcmp.gt.s32.totalorder %v1091_v11, 0  ;;  %v541_v46 = vxor.u32 2147483648, %v540_v43  ;;  %v1189_v44 = vshrl.u32 %v1188_v62, 23  ;;  %v617_v28 = vadd.s32 %v4924_v36, %v4938_v18 }
 0x125   :  { %v1093_v20 = vsel %vm1092_vm9, %v1091_v11, 0  ;;  %v627_v23 = vsub.s32 0, %v4985_v24  ;;  %v4998_v30 = vadd.f32 %v398_v27, %v4472_v59  ;;  %v1185_v60 = vand.u32 2147483647, %v4963_v56 }
 0x126   :  { %v1095_v13 = vand.u32 31, %v1093_v20  ;;  %v542_v50 = vsel %vm459_vm1, %v541_v46, %v540_v43  ;;  %v647_v63 = vsub.s32 4, %v4974_v39  ;;  %v5006_v15 = vshrl.u32 %v1093_v20, 5 }
 0x127   :  { %v545_v58 = vsel %vm4955_vm4, %v4671_v53, %v542_v50  ;;  %v3870_v7 = vmin.u32 %v627_v23, %v4985_v24  ;;  %v5008_v21 = vshll.u32 %v1089_v10, 8  ;;  %v3893_v18 = vadd.s32 4294967169, %v1189_v44 }
 0x128   :  { %v1096_v54 = vsub.s32 32, %v1095_v13  ;;  %4141 = vcosq.f32 %v545_v58  ;;  %v1098_v59 = vshll.u32 %v7237_v0, %v1095_v13  ;;  %v1101_v61 = vshll.u32 %v7238_v51, %v1095_v13 }
 0x129   :  { %4143 = vsinq.f32 %v545_v58  ;;  %v629_v36 = vclz %v3870_v7  ;;  %v1104_v1 = vshll.u32 %v7239_v47, %v1095_v13  ;;  %v1107_v14 = vshll.u32 %v7240_v19, %v1095_v13 }
 0x12a   :  { %v1099_v26 = vshrl.u32 %v7238_v51, %v1096_v54  ;;  %v1102_v57 = vshrl.u32 %v7239_v47, %v1096_v54  ;;  %v1105_v9 = vshrl.u32 %v7240_v19, %v1096_v54  ;;  %v1108_v42 = vshrl.u32 %v7241_v55, %v1096_v54 }
 0x12b   :  { %v3871_v52 = vadd.s32 4294967294, %v629_v36  ;;  %vm556_vm10 = vcmp.eq.s32.totalorder %v4993_v35, 2  ;;  %vm563_vm11 = vcmp.lt.s32.totalorder %v4669_v22, 0  ;;  %v1110_v8 = vshll.u32 %v7241_v55, %v1095_v13 }
 0x12c   :  { %v1100_v40 = vor.u32 %v1099_v26, %v1098_v59  ;;  %v1103_v41 = vor.u32 %v1102_v57, %v1101_v61  ;;  %v1111_v16 = vshrl.u32 %v7245_v45, %v1096_v54  ;;  %vm553_vm12 = vcmp.eq.s32.totalorder %v4993_v35, 0 }
 0x12d   :  { %vm3872_vm13 = vcmp.lt.s32.totalorder %v3871_v52, 0  ;;  %v1097_v12 = vshrl.u32 %v7237_v0, %v1096_v54  ;;  %v1106_v25 = vor.u32 %v1105_v9, %v1104_v1  ;;  %v1109_v48 = vor.u32 %v1108_v42, %v1107_v14 }
 0x12e   :  { %vm552_vm14 = vcmp.lt.s32.totalorder %v4993_v35, 2  ;;  %v632_v11 = vsel %vm3872_vm13, 0, %v3871_v52  ;;  %v1112_v43 = vor.u32 %v1111_v16, %v1110_v8  ;;  %vm1113_vm15 = vcmp.lt.s32.totalorder %v5006_v15, 1 }
 0x12f   :  { %vm1114_vm0 = vcmp.lt.s32.totalorder %v5006_v15, 2  ;;  %vm549_vm1 = vweird.f32 %v4671_v53  ;;  %v7253_v6 = vand.u32 2147483647, %v4669_v22  ;;  %v633_v27 = vsub.s32 32, %v632_v11 }
 0x130   :  { %v637_v46 = vsub.s32 4294967266, %v632_v11  ;;  %vm1115_vm3 = vcmp.lt.s32.totalorder %v5006_v15, 3  ;;  %vm1116_vm4 = vcmp.lt.s32.totalorder %v5006_v15, 4  ;;  %v634_v10 = vshll.u32 %v4985_v24, %v632_v11 }
 0x131   :  { %vm5030_vm2 = vcmp.le.f32.partialorder %v7253_v6, 0.7853982  ;;  %v1118_v20 = vsel %vm1116_vm4, %v1106_v25, 2102212464  ;;  %v1121_v23 = vsel %vm1113_vm15, %v1100_v40, %v1103_v41  ;;  %v1122_v13 = vsel %vm1116_vm4, %v1109_v48, 920167782 }
 0x132   :  { %v635_v44 = vshrl.u32 %v617_v28, %v633_v27  ;;  %v638_v50 = vadd.s32 127, %v637_v46  ;;  %v1117_v58 = vsel %vm1113_vm15, %v1097_v12, %v1100_v40  ;;  %v1123_v7 = vsel %vm1115_vm3, %v1106_v25, %v1122_v13  ;;  %v4142_v54 = vpop.eup %4141 }
 0x133   :  { %v1119_v36 = vsel %vm1115_vm3, %v1103_v41, %v1118_v20  ;;  %v1124_v24 = vsel %vm1114_vm0, %v1121_v23, %v1123_v7  ;;  %v1125_v59 = vsel %vm1113_vm15, %v1103_v41, %v1106_v25  ;;  %v1126_v26 = vsel %vm1116_vm4, %v1112_v43, 1326507024  ;;  %v4144_v61 = vpop.eup %4143 }
 0x134   :  { %v557_v28 = vxor.u32 2147483648, %v4142_v54  ;;  %v636_v57 = vor.u32 %v635_v44, %v634_v10  ;;  %v639_v1 = vshll.u32 %v638_v50, 23  ;;  %v1127_v52 = vsel %vm1115_vm3, %v1109_v48, %v1126_v26 }
 0x135   :  { %v554_v9 = vxor.u32 2147483648, %v4144_v61  ;;  %v1128_v14 = vsel %vm1114_vm0, %v1125_v59, %v1127_v52  ;;  %v5054_v42 = vmul.u32.u64.low %v5008_v21, %v1124_v24  ;;  %v5055_v40 = vmul.u32.u64.high %v5008_v21, %v1124_v24, %v5054_v42 }
 0x136   :  { %v558_v41 = vsel %vm556_vm10, %v557_v28, %v4144_v61  ;;  %v640_v8 = vor.u32 4788187, %v639_v1  ;;  %v648_v16 = vsel %vm563_vm11, %v647_v63, %v4974_v39  ;;  %v1192_v12 = vand.u32 8388607, %v1185_v60 }
 0x137   :  { %v555_v25 = vsel %vm553_vm12, %v4142_v54, %v554_v9  ;;  %v5068_v48 = vmul.u32.u64.low %v5008_v21, %v1128_v14  ;;  %v5069_v11 = vmul.u32.u64.high %v5008_v21, %v1128_v14, %v5068_v48  ;;  %v1195_v43 = vadd.s32 1, %v3893_v18 }
 0x138   :  { %v559_v6 = vsel %vm552_vm14, %v555_v25, %v558_v41  ;;  %v641_v27 = vand.u32 2147483647, %v640_v8  ;;  %v643_v46 = vcvt.s32.f32 %v636_v57  ;;  %v1120_v10 = vsel %vm1114_vm0, %v1117_v58, %v1119_v36 }
 0x139   :  { %v560_v39 = vsel %vm549_vm1, nan, %v559_v6  ;;  %v650_v63 = vsel %vm5030_vm2, 0, %v648_v16  ;;  %v1139_v20 = vadd.s32 1, %v5055_v40  ;;  %vm1196_vm5 = vcmp.gt.s32.totalorder %v1195_v43, 0 }
 0x13a   :  { %v644_v23 = vmul.f32 %v643_v46, %v641_v27  ;;  %3785 = vst [vmem:[#allocation2] sm:$0xff] %v560_v39  ;;  %v1197_v18 = vsel %vm1196_vm5, %v1195_v43, 0  ;;  %v1136_v35 = vmul.u32 %v5008_v21, %v1120_v10  ;;  %vm1138_vm6 = vc.u32 %v5069_v11, %v5054_v42 }
 0x13b   :  { %v1199_v13 = vand.u32 31, %v1197_v18  ;;  %v654_v44 = vadd.s32 3, %v650_v63  ;;  %v1140_v53 = vsel %vm1138_vm6, %v1139_v20, %v5055_v40  ;;  %v1193_v50 = vor.u32 8388608, %v1192_v12 }
 0x13c   :  { %v645_v15 = vxor.u32 2147483648, %v644_v23  ;;  %v1141_v58 = vadd.s32 %v1140_v53, %v1136_v35  ;;  %v5084_v7 = vshrl.u32 %v1197_v18, 5  ;;  %v876_v36 = vand.u32 2139095040, %v4988_v49 }
 0x13d   :  { %v1200_v54 = vsub.s32 32, %v1199_v13  ;;  %v1202_v21 = vshll.u32 %v7237_v0, %v1199_v13  ;;  %v1205_v59 = vshll.u32 %v7238_v51, %v1199_v13  ;;  %v1208_v26 = vshll.u32 %v7239_v47, %v1199_v13 }
 0x13e   :  { %v646_v24 = vsel %vm563_vm11, %v645_v15, %v644_v23  ;;  %v1142_v28 = vadd.s32 536870912, %v1141_v58  ;;  %v1211_v1 = vshll.u32 %v7240_v19, %v1199_v13  ;;  %v1214_v25 = vshll.u32 %v7241_v55, %v1199_v13 }
 0x13f   :  { %v649_v61 = vsel %vm5030_vm2, %v4669_v22, %v646_v24  ;;  %v1203_v57 = vshrl.u32 %v7238_v51, %v1200_v54  ;;  %v1206_v52 = vshrl.u32 %v7239_v47, %v1200_v54  ;;  %v1209_v9 = vshrl.u32 %v7240_v19, %v1200_v54 }
 0x140   :  { %4145 = vcosq.f32 %v649_v61  ;;  %v1212_v14 = vshrl.u32 %v7241_v55, %v1200_v54  ;;  %v1143_v40 = vshrl.u32 %v1142_v28, 30  ;;  %v1215_v8 = vshrl.u32 %v7245_v45, %v1200_v54 }
 0x141   :  { %4147 = vsinq.f32 %v649_v61  ;;  %v1204_v41 = vor.u32 %v1203_v57, %v1202_v21  ;;  %v1207_v16 = vor.u32 %v1206_v52, %v1205_v59  ;;  %v1210_v62 = vor.u32 %v1209_v9, %v1208_v26 }
 0x142   :  { %v1213_v12 = vor.u32 %v1212_v14, %v1211_v1  ;;  %v655_v48 = vand.u32 3, %v654_v44  ;;  %v1144_v43 = vshll.u32 %v1143_v40, 30  ;;  %vm1217_vm7 = vcmp.lt.s32.totalorder %v5084_v7, 1 }
 0x143   :  { %v1216_v6 = vor.u32 %v1215_v8, %v1214_v25  ;;  %vm1220_vm8 = vcmp.lt.s32.totalorder %v5084_v7, 4  ;;  %v1225_v27 = vsel %vm1217_vm7, %v1204_v41, %v1207_v16  ;;  %v1233_v46 = vshll.u32 %v1193_v50, 8 }
 0x144   :  { %v5106_v10 = vsub.s32 %v1141_v58, %v1144_v43  ;;  %vm1219_vm9 = vcmp.lt.s32.totalorder %v5084_v7, 3  ;;  %v1226_v39 = vsel %vm1220_vm8, %v1213_v12, 920167782  ;;  %v877_v63 = vshrl.u32 %v876_v36, 23 }
 0x145   :  { %v1201_v20 = vshrl.u32 %v7237_v0, %v1200_v54  ;;  %vm1218_vm10 = vcmp.lt.s32.totalorder %v5084_v7, 2  ;;  %v1222_v23 = vsel %vm1220_vm8, %v1210_v62, 2102212464  ;;  %v1227_v18 = vsel %vm1219_vm9, %v1210_v62, %v1226_v39 }
 0x146   :  { %vm653_vm11 = vweird.f32 %v4669_v22  ;;  %v1147_v35 = vsub.s32 0, %v5106_v10  ;;  %v1167_v13 = vsub.s32 4, %v1143_v40  ;;  %v1228_v15 = vsel %vm1218_vm10, %v1225_v27, %v1227_v18 }
 0x147   :  { %v1229_v44 = vsel %vm1217_vm7, %v1207_v16, %v1210_v62  ;;  %v1221_v53 = vsel %vm1217_vm7, %v1201_v20, %v1204_v41  ;;  %v1230_v50 = vsel %vm1220_vm8, %v1216_v6, 1326507024  ;;  %v1223_v24 = vsel %vm1219_vm9, %v1207_v16, %v1222_v23 }
 0x148   :  { %v5127_v58 = vmul.u32.u64.low %v1233_v46, %v1228_v15  ;;  %v5128_v54 = vmul.u32.u64.high %v1233_v46, %v1228_v15, %v5127_v58  ;;  %v3890_v36 = vmin.u32 %v1147_v35, %v5106_v10  ;;  %v1231_v21 = vsel %vm1219_vm9, %v1213_v12, %v1230_v50 }
 0x149   :  { %v3881_v59 = vadd.s32 4294967169, %v877_v63  ;;  %vm657_vm12 = vcmp.eq.s32.totalorder %v655_v48, 0  ;;  %vm660_vm13 = vcmp.eq.s32.totalorder %v655_v48, 2  ;;  %vm1083_vm14 = vcmp.lt.s32.totalorder %v4944_v29, 0 }
 0x14a   :  { %v4146_v26 = vpop.eup %4145  ;;  %v1232_v61 = vsel %vm1218_vm10, %v1229_v44, %v1231_v21  ;;  %v1149_v1 = vclz %v3890_v36  ;;  %v1168_v52 = vsel %vm1083_vm14, %v1167_v13, %v1143_v40  ;;  %v873_v9 = vand.u32 2147483647, %v4988_v49  ;;  %v341_v40 = vpop.permute.xlu1 %340 }
 0x14b   :  { %v4148_v28 = vpop.eup %4147  ;;  %v661_v57 = vxor.u32 2147483648, %v4146_v26  ;;  %v1224_v41 = vsel %vm1218_vm10, %v1221_v53, %v1223_v24  ;;  %v5144_v8 = vmul.u32.u64.low %v1233_v46, %v1232_v61  ;;  %v5145_v16 = vmul.u32.u64.high %v1233_v46, %v1232_v61, %v5144_v8 }
 0x14c   :  { %v658_v14 = vxor.u32 2147483648, %v4148_v28  ;;  %v3891_v12 = vadd.s32 4294967294, %v1149_v1  ;;  %v1243_v25 = vadd.s32 1, %v5128_v54  ;;  %v883_v43 = vadd.s32 1, %v3881_v59 }
 0x14d   :  { %v662_v62 = vsel %vm660_vm13, %v661_v57, %v4148_v28  ;;  %vm656_vm15 = vcmp.lt.s32.totalorder %v655_v48, 2  ;;  %vm5151_vm0 = vcmp.le.f32.partialorder %v1081_v17, 0.7853982  ;;  %v1137_v7 = vadd.s32 %v5054_v42, %v5069_v11 }
 0x14e   :  { %v659_v6 = vsel %vm657_vm12, %v4146_v26, %v658_v14  ;;  %vm3892_vm1 = vcmp.lt.s32.totalorder %v3891_v12, 0  ;;  %v1170_v39 = vsel %vm5151_vm0, 0, %v1168_v52  ;;  %vm884_vm2 = vcmp.gt.s32.totalorder %v883_v43, 0 }
 0x14f   :  { %v663_v27 = vsel %vm656_vm15, %v659_v6, %v662_v62  ;;  %v1152_v48 = vsel %vm3892_vm1, 0, %v3891_v12  ;;  %v1240_v20 = vmul.u32 %v1233_v46, %v1224_v41  ;;  %vm1242_vm3 = vc.u32 %v5145_v16, %v5127_v58 }
 0x150   :  { %v664_v63 = vsel %vm653_vm11, nan, %v663_v27  ;;  %v1153_v17 = vsub.s32 32, %v1152_v48  ;;  %v1157_v23 = vsub.s32 4294967266, %v1152_v48  ;;  %v1244_v18 = vsel %vm1242_vm3, %v1243_v25, %v5128_v54 }
 0x151   :  { %3786 = vst [vmem:[#allocation2 + $0x8] sm:$0xff] %v664_v63  ;;  %v880_v42 = vand.u32 8388607, %v873_v9  ;;  %v1174_v11 = vadd.s32 3, %v1170_v39  ;;  %v1245_v35 = vadd.s32 %v1244_v18, %v1240_v20  ;;  %v885_v13 = vsel %vm884_vm2, %v883_v43, 0 }
 0x152   :  { %v980_v15 = vand.u32 2139095040, %v4998_v30  ;;  %v1154_v22 = vshll.u32 %v5106_v10, %v1152_v48  ;;  %v1155_v44 = vshrl.u32 %v1137_v7, %v1153_v17  ;;  %v1158_v46 = vadd.s32 127, %v1157_v23 }
 0x153   :  { %v887_v53 = vand.u32 31, %v885_v13  ;;  %v1246_v50 = vadd.s32 536870912, %v1245_v35  ;;  %v5168_v59 = vand.u32 3, %v1174_v11  ;;  %v881_v26 = vor.u32 8388608, %v880_v42 }
 0x154   :  { %v1156_v36 = vor.u32 %v1155_v44, %v1154_v22  ;;  %v1159_v24 = vshll.u32 %v1158_v46, 23  ;;  %v977_v61 = vand.u32 2147483647, %v4998_v30  ;;  %v981_v10 = vshrl.u32 %v980_v15, 23 }
 0x155   :  { %v888_v21 = vsub.s32 32, %v887_v53  ;;  %v5170_v54 = vshrl.u32 %v1246_v50, 30  ;;  %v890_v57 = vshll.u32 %v7237_v0, %v887_v53  ;;  %v893_v14 = vshll.u32 %v7238_v51, %v887_v53 }
 0x156   :  { %v1160_v28 = vor.u32 4788187, %v1159_v24  ;;  %v1163_v12 = vcvt.s32.f32 %v1156_v36  ;;  %v899_v25 = vshll.u32 %v7240_v19, %v887_v53  ;;  %v886_v7 = vshrl.u32 %v885_v13, 5 }
 0x157   :  { %v891_v1 = vshrl.u32 %v7238_v51, %v888_v21  ;;  %v1248_v52 = vshll.u32 %v5170_v54, 30  ;;  %v894_v41 = vshrl.u32 %v7239_v47, %v888_v21  ;;  %v897_v8 = vshrl.u32 %v7240_v19, %v888_v21 }
 0x158   :  { %v1161_v62 = vand.u32 2147483647, %v1160_v28  ;;  %v900_v43 = vshrl.u32 %v7241_v55, %v888_v21  ;;  %v896_v39 = vshll.u32 %v7239_v47, %v887_v53  ;;  %v903_v17 = vshrl.u32 %v7245_v45, %v888_v21 }
 0x159   :  { %v5181_v6 = vsub.s32 %v1245_v35, %v1248_v52  ;;  %v892_v27 = vor.u32 %v891_v1, %v890_v57  ;;  %v895_v48 = vor.u32 %v894_v41, %v893_v14  ;;  %v1241_v23 = vadd.s32 %v5127_v58, %v5145_v16 }
 0x15a   :  { %v1164_v63 = vmul.f32 %v1163_v12, %v1161_v62  ;;  %v901_v20 = vor.u32 %v900_v43, %v899_v25  ;;  %v898_v42 = vor.u32 %v897_v8, %v896_v39  ;;  %v5188_v11 = vshll.u32 %v881_v26, 8 }
 0x15b   :  { %v1251_v18 = vsub.s32 0, %v5181_v6  ;;  %v902_v35 = vshll.u32 %v7241_v55, %v887_v53  ;;  %v3885_v13 = vadd.s32 4294967169, %v981_v10  ;;  %v5193_v22 = vand.u32 8388607, %v977_v61 }
 0x15c   :  { %v1165_v15 = vxor.u32 2147483648, %v1164_v63  ;;  %v889_v46 = vshrl.u32 %v7237_v0, %v888_v21  ;;  %vm905_vm4 = vcmp.lt.s32.totalorder %v886_v7, 1  ;;  %vm908_vm5 = vcmp.lt.s32.totalorder %v886_v7, 4 }
 0x15d   :  { %v3894_v44 = vmin.u32 %v1251_v18, %v5181_v6  ;;  %v904_v16 = vor.u32 %v903_v17, %v902_v35  ;;  %v913_v50 = vsel %vm905_vm4, %v892_v27, %v895_v48  ;;  %v914_v36 = vsel %vm908_vm5, %v901_v20, 920167782 }
 0x15e   :  { %v1166_v58 = vsel %vm1083_vm14, %v1165_v15, %v1164_v63  ;;  %vm1187_vm6 = vcmp.lt.s32.totalorder %v4963_v56, 0  ;;  %vm907_vm7 = vcmp.lt.s32.totalorder %v886_v7, 3  ;;  %v910_v21 = vsel %vm908_vm5, %v898_v42, 2102212464 }
 0x15f   :  { %v1169_v53 = vsel %vm5151_vm0, %v4944_v29, %v1166_v58  ;;  %v1253_v24 = vclz %v3894_v44  ;;  %vm906_vm8 = vcmp.lt.s32.totalorder %v886_v7, 2  ;;  %v909_v26 = vsel %vm905_vm4, %v889_v46, %v892_v27 }
 0x160   :  { %4149 = vcosq.f32 %v1169_v53  ;;  %v915_v28 = vsel %vm907_vm7, %v898_v42, %v914_v36  ;;  %v917_v10 = vsel %vm905_vm4, %v895_v48, %v898_v42  ;;  %vm5212_vm9 = vcmp.le.f32.partialorder %v1185_v60, 0.7853982 }
 0x161   :  { %4151 = vsinq.f32 %v1169_v53  ;;  %v3895_v57 = vadd.s32 4294967294, %v1253_v24  ;;  %v916_v1 = vsel %vm906_vm8, %v913_v50, %v915_v28  ;;  %v911_v14 = vsel %vm907_vm7, %v895_v48, %v910_v21 }
 0x162   :  { %v918_v41 = vsel %vm908_vm5, %v904_v16, 1326507024  ;;  %v5219_v8 = vmul.u32.u64.low %v5188_v11, %v916_v1  ;;  %v5220_v62 = vmul.u32.u64.high %v5188_v11, %v916_v1, %v5219_v8  ;;  %v1271_v12 = vsub.s32 4, %v5170_v54 }
 0x163   :  { %vm3896_vm10 = vcmp.lt.s32.totalorder %v3895_v57, 0  ;;  %v919_v25 = vsel %vm907_vm7, %v901_v20, %v918_v41  ;;  %v987_v43 = vadd.s32 1, %v3885_v13  ;;  %v403_v39 = vadd.f32 %v341_v40, %v4542_v31 }
 0x164   :  { %v1256_v27 = vsel %vm3896_vm10, 0, %v3895_v57  ;;  %v920_v60 = vsel %vm906_vm8, %v917_v10, %v919_v25  ;;  %v404_v63 = vadd.f32 %v341_v40, %v4545_v32  ;;  %v912_v18 = vsel %vm906_vm8, %v909_v26, %v911_v14 }
 0x165   :  { %v1257_v48 = vsub.s32 32, %v1256_v27  ;;  %v1261_v17 = vsub.s32 4294967266, %v1256_v27  ;;  %vm988_vm11 = vcmp.gt.s32.totalorder %v987_v43, 0  ;;  %v1258_v42 = vshll.u32 %v5181_v6, %v1256_v27 }
 0x166   :  { %v5231_v15 = vmul.u32.u64.low %v5188_v11, %v920_v60  ;;  %v5232_v35 = vmul.u32.u64.high %v5188_v11, %v920_v60, %v5231_v15  ;;  %v989_v20 = vsel %vm988_vm11, %v987_v43, 0  ;;  %vm1173_vm12 = vweird.f32 %v4944_v29 }
 0x167   :  { %v1259_v13 = vshrl.u32 %v1241_v23, %v1257_v48  ;;  %v1262_v44 = vadd.s32 127, %v1261_v17  ;;  %v931_v31 = vadd.s32 1, %v5220_v62  ;;  %v991_v46 = vand.u32 31, %v989_v20 }
 0x168   :  { %vm1176_vm13 = vcmp.lt.s32.totalorder %v5168_v59, 2  ;;  %v1272_v32 = vsel %vm1187_vm6, %v1271_v12, %v5170_v54  ;;  %v5241_v6 = vadd.f32 %v403_v39, %v4483_v2  ;;  %v5244_v7 = vadd.f32 %v404_v63, %v4486_v3 }
 0x169   :  { %vm1177_vm14 = vcmp.eq.s32.totalorder %v5168_v59, 0  ;;  %v1260_v58 = vor.u32 %v1259_v13, %v1258_v42  ;;  %v1263_v23 = vshll.u32 %v1262_v44, 23  ;;  %v992_v16 = vsub.s32 32, %v991_v46 }
 0x16a   :  { %v4150_v50 = vpop.eup %4149  ;;  %vm1180_vm15 = vcmp.eq.s32.totalorder %v5168_v59, 2  ;;  %v928_v36 = vmul.u32 %v5188_v11, %v912_v18  ;;  %vm930_vm0 = vc.u32 %v5232_v35, %v5219_v8  ;;  %v985_v54 = vor.u32 8388608, %v5193_v22 }
 0x16b   :  { %v4152_v2 = vpop.eup %4151  ;;  %v1181_v53 = vxor.u32 2147483648, %v4150_v50  ;;  %v1264_v24 = vor.u32 4788187, %v1263_v23  ;;  %v1274_v3 = vsel %vm5212_vm9, 0, %v1272_v32  ;;  %v932_v21 = vsel %vm930_vm0, %v931_v31, %v5220_v62 }
 0x16c   :  { %v1178_v26 = vxor.u32 2147483648, %v4152_v2  ;;  %v933_v28 = vadd.s32 %v932_v21, %v928_v36  ;;  %v990_v57 = vshrl.u32 %v989_v20, 5  ;;  %v1000_v1 = vshll.u32 %v7239_v47, %v991_v46 }
 0x16d   :  { %v1182_v10 = vsel %vm1180_vm15, %v1181_v53, %v4152_v2  ;;  %v1265_v11 = vand.u32 2147483647, %v1264_v24  ;;  %v1267_v40 = vcvt.s32.f32 %v1260_v58  ;;  %v1001_v14 = vshrl.u32 %v7240_v19, %v992_v16 }
 0x16e   :  { %v1179_v41 = vsel %vm1177_vm14, %v4150_v50, %v1178_v26  ;;  %v934_v12 = vadd.s32 536870912, %v933_v28  ;;  %v995_v25 = vshrl.u32 %v7238_v51, %v992_v16  ;;  %v998_v43 = vshrl.u32 %v7239_v47, %v992_v16 }
 0x16f   :  { %v1183_v62 = vsel %vm1176_vm13, %v1179_v41, %v1182_v10  ;;  %v1268_v27 = vmul.f32 %v1267_v40, %v1265_v11  ;;  %v994_v60 = vshll.u32 %v7237_v0, %v991_v46  ;;  %v997_v39 = vshll.u32 %v7238_v51, %v991_v46 }
 0x170   :  { %v1184_v63 = vsel %vm1173_vm12, nan, %v1183_v62  ;;  %v935_v48 = vshrl.u32 %v934_v12, 30  ;;  %v1002_v17 = vor.u32 %v1001_v14, %v1000_v1  ;;  %v1004_v18 = vshrl.u32 %v7241_v55, %v992_v16 }
 0x171   :  { %v1269_v42 = vxor.u32 2147483648, %v1268_v27  ;;  %3791 = vst [vmem:[#allocation2 + $0x30] sm:$0xff] %v1184_v63  ;;  %vm875_vm1 = vcmp.lt.s32.totalorder %v4988_v49, 0  ;;  %v1003_v15 = vshll.u32 %v7240_v19, %v991_v46  ;;  %v1006_v59 = vshll.u32 %v7241_v55, %v991_v46 }
 0x172   :  { %v1007_v20 = vshrl.u32 %v7245_v45, %v992_v16  ;;  %v1278_v13 = vadd.s32 3, %v1274_v3  ;;  %v936_v44 = vshll.u32 %v935_v48, 30  ;;  %v996_v31 = vor.u32 %v995_v25, %v994_v60 }
 0x173   :  { %v999_v32 = vor.u32 %v998_v43, %v997_v39  ;;  %v1270_v29 = vsel %vm1187_vm6, %v1269_v42, %v1268_v27  ;;  %v1005_v58 = vor.u32 %v1004_v18, %v1003_v15  ;;  %vm1012_vm2 = vcmp.lt.s32.totalorder %v990_v57, 4 }
 0x174   :  { %v1008_v23 = vor.u32 %v1007_v20, %v1006_v59  ;;  %v1273_v50 = vsel %vm5212_vm9, %v4963_v56, %v1270_v29  ;;  %v5277_v36 = vsub.s32 %v933_v28, %v936_v44  ;;  %v993_v46 = vshrl.u32 %v7237_v0, %v992_v16 }
 0x175   :  { %v1014_v2 = vsel %vm1012_vm2, %v1002_v17, 2102212464  ;;  %4153 = vcosq.f32 %v1273_v50  ;;  %v959_v53 = vsub.s32 4, %v935_v48  ;;  %vm1009_vm3 = vcmp.lt.s32.totalorder %v990_v57, 1 }
 0x176   :  { %vm1011_vm4 = vcmp.lt.s32.totalorder %v990_v57, 3  ;;  %4155 = vsinq.f32 %v1273_v50  ;;  %v939_v24 = vsub.s32 0, %v5277_v36  ;;  %v1013_v3 = vsel %vm1009_vm3, %v993_v46, %v996_v31 }
 0x177   :  { %v1017_v21 = vsel %vm1009_vm3, %v996_v31, %v999_v32  ;;  %v1015_v26 = vsel %vm1011_vm4, %v999_v32, %v1014_v2  ;;  %v1018_v1 = vsel %vm1012_vm2, %v1005_v58, 920167782  ;;  %v1021_v52 = vsel %vm1009_vm3, %v999_v32, %v1002_v17 }
 0x178   :  { %v1022_v28 = vsel %vm1012_vm2, %v1008_v23, 1326507024  ;;  %v3882_v10 = vmin.u32 %v939_v24, %v5277_v36  ;;  %vm1010_vm5 = vcmp.lt.s32.totalorder %v990_v57, 2  ;;  %v1019_v16 = vsel %vm1011_vm4, %v1002_v17, %v1018_v1 }
 0x179   :  { %v1023_v11 = vsel %vm1011_vm4, %v1005_v58, %v1022_v28  ;;  %v1279_v40 = vand.u32 3, %v1278_v13  ;;  %v1020_v14 = vsel %vm1010_vm5, %v1017_v21, %v1019_v16  ;;  %v1025_v12 = vshll.u32 %v985_v54, 8 }
 0x17a   :  { %v1024_v41 = vsel %vm1010_vm5, %v1021_v52, %v1023_v11  ;;  %v941_v25 = vclz %v3882_v10  ;;  %v960_v43 = vsel %vm875_vm1, %v959_v53, %v935_v48  ;;  %v1016_v62 = vsel %vm1010_vm5, %v1013_v3, %v1015_v26 }
 0x17b   :  { %v5289_v27 = vmul.u32.u64.low %v1025_v12, %v1024_v41  ;;  %v5290_v60 = vmul.u32.u64.high %v1025_v12, %v1024_v41, %v5289_v27  ;;  %v5292_v39 = vmul.u32.u64.low %v1025_v12, %v1020_v14  ;;  %v5293_v63 = vmul.u32.u64.high %v1025_v12, %v1020_v14, %v5292_v39 }
 0x17c   :  { %vm1277_vm6 = vweird.f32 %v4963_v56  ;;  %vm5298_vm7 = vcmp.le.f32.partialorder %v873_v9, 0.7853982  ;;  %v3883_v22 = vadd.s32 4294967294, %v941_v25  ;;  %v1500_v54 = vand.u32 2139095040, %v5241_v6 }
 0x17d   :  { %vm1280_vm8 = vcmp.lt.s32.totalorder %v1279_v40, 2  ;;  %vm1281_vm9 = vcmp.eq.s32.totalorder %v1279_v40, 0  ;;  %vm1284_vm10 = vcmp.eq.s32.totalorder %v1279_v40, 2  ;;  %v929_v48 = vadd.s32 %v5219_v8, %v5232_v35  ;;  %v336_v35 = vpop.permute.xlu0 %335 }
 0x17e   :  { %vm3884_vm11 = vcmp.lt.s32.totalorder %v3883_v22, 0  ;;  %v962_v17 = vsel %vm5298_vm7, 0, %v960_v43  ;;  %v1032_v18 = vmul.u32 %v1025_v12, %v1016_v62  ;;  %v1501_v42 = vshrl.u32 %v1500_v54, 23 }
 0x17f   :  { %v4154_v15 = vpop.eup %4153  ;;  %v944_v9 = vsel %vm3884_vm11, 0, %v3883_v22  ;;  %vm1034_vm12 = vc.u32 %v5290_v60, %v5292_v39  ;;  %v1035_v59 = vadd.s32 1, %v5293_v63  ;;  %v1497_v20 = vand.u32 2147483647, %v5241_v6 }
 0x180   :  { %v4156_v13 = vpop.eup %4155  ;;  %v1285_v44 = vxor.u32 2147483648, %v4154_v15  ;;  %v945_v31 = vsub.s32 32, %v944_v9  ;;  %v949_v32 = vsub.s32 4294967266, %v944_v9  ;;  %v1604_v8 = vand.u32 2139095040, %v5244_v7 }
 0x181   :  { %v1282_v29 = vxor.u32 2147483648, %v4156_v13  ;;  %v946_v58 = vshll.u32 %v5277_v36, %v944_v9  ;;  %v1036_v23 = vsel %vm1034_vm12, %v1035_v59, %v5293_v63  ;;  %v3905_v50 = vadd.s32 4294967169, %v1501_v42 }
 0x182   :  { %v1286_v46 = vsel %vm1284_vm10, %v1285_v44, %v4156_v13  ;;  %v947_v2 = vshrl.u32 %v929_v48, %v945_v31  ;;  %v950_v53 = vadd.s32 127, %v949_v32  ;;  %v1037_v24 = vadd.s32 %v1036_v23, %v1032_v18 }
 0x183   :  { %v1283_v3 = vsel %vm1281_vm9, %v4154_v15, %v1282_v29  ;;  %v966_v21 = vadd.s32 3, %v962_v17  ;;  %v1507_v26 = vadd.s32 1, %v3905_v50  ;;  %v401_v1 = vadd.f32 %v336_v35, %v4548_v33 }
 0x184   :  { %v1287_v52 = vsel %vm1280_vm8, %v1283_v3, %v1286_v46  ;;  %v948_v28 = vor.u32 %v947_v2, %v946_v58  ;;  %v951_v10 = vshll.u32 %v950_v53, 23  ;;  %v1038_v16 = vadd.s32 536870912, %v1037_v24 }
 0x185   :  { %v1288_v36 = vsel %vm1277_vm6, nan, %v1287_v52  ;;  %v1504_v11 = vand.u32 8388607, %v1497_v20  ;;  %vm1508_vm13 = vcmp.gt.s32.totalorder %v1507_v26, 0  ;;  %v1605_v25 = vshrl.u32 %v1604_v8, 23 }
 0x186   :  { %3792 = vst [vmem:[#allocation2 + $0x38] sm:$0xff] %v1288_v36  ;;  %v952_v14 = vor.u32 4788187, %v951_v10  ;;  %v1039_v41 = vshrl.u32 %v1038_v16, 30  ;;  %v1509_v12 = vsel %vm1508_vm13, %v1507_v26, 0  ;;  %v5321_v43 = vand.u32 3, %v966_v21 }
 0x187   :  { %v1511_v33 = vand.u32 31, %v1509_v12  ;;  %v5324_v40 = vadd.f32 %v336_v35, %v4551_v34  ;;  %v955_v27 = vcvt.s32.f32 %v948_v28  ;;  %vm979_vm14 = vcmp.lt.s32.totalorder %v4998_v30, 0 }
 0x188   :  { %v953_v62 = vand.u32 2147483647, %v952_v14  ;;  %v1040_v56 = vshll.u32 %v1039_v41, 30  ;;  %v5328_v63 = vadd.f32 %v401_v1, %v4489_v4  ;;  %v5331_v22 = vadd.s32 %v5292_v39, %v5290_v60 }
 0x189   :  { %v1505_v54 = vor.u32 8388608, %v1504_v11  ;;  %v1512_v48 = vsub.s32 32, %v1511_v33  ;;  %v1601_v17 = vand.u32 2147483647, %v5244_v7  ;;  %v1510_v34 = vshrl.u32 %v1509_v12, 5 }
 0x18a   :  { %v956_v18 = vmul.f32 %v955_v27, %v953_v62  ;;  %v5334_v42 = vsub.s32 %v1037_v24, %v1040_v56  ;;  %v3909_v15 = vadd.s32 4294967169, %v1605_v25  ;;  %v1063_v9 = vsub.s32 4, %v1039_v41 }
 0x18b   :  { %v1514_v59 = vshll.u32 %v7237_v0, %v1511_v33  ;;  %v1515_v13 = vshrl.u32 %v7238_v51, %v1512_v48  ;;  %v1518_v4 = vshrl.u32 %v7239_v47, %v1512_v48  ;;  %v1517_v39 = vshll.u32 %v7238_v51, %v1511_v33 }
 0x18c   :  { %v957_v44 = vxor.u32 2147483648, %v956_v18  ;;  %v1043_v60 = vsub.s32 0, %v5334_v42  ;;  %v1521_v31 = vshrl.u32 %v7240_v19, %v1512_v48  ;;  %v1520_v8 = vshll.u32 %v7239_v47, %v1511_v33 }
 0x18d   :  { %v1516_v32 = vor.u32 %v1515_v13, %v1514_v59  ;;  %v1523_v35 = vshll.u32 %v7240_v19, %v1511_v33  ;;  %v1524_v29 = vshrl.u32 %v7241_v55, %v1512_v48  ;;  %v1519_v50 = vor.u32 %v1518_v4, %v1517_v39 }
 0x18e   :  { %v958_v58 = vsel %vm875_vm1, %v957_v44, %v956_v18  ;;  %v3886_v23 = vmin.u32 %v1043_v60, %v5334_v42  ;;  %v1526_v46 = vshll.u32 %v7241_v55, %v1511_v33  ;;  %v1522_v53 = vor.u32 %v1521_v31, %v1520_v8 }
 0x18f   :  { %v961_v2 = vsel %vm5298_vm7, %v4988_v49, %v958_v58  ;;  %v1525_v24 = vor.u32 %v1524_v29, %v1523_v35  ;;  %v1527_v3 = vshrl.u32 %v7245_v45, %v1512_v48  ;;  %v5353_v26 = vshll.u32 %v1505_v54, 8 }
 0x190   :  { %4157 = vcosq.f32 %v961_v2  ;;  %v1045_v21 = vclz %v3886_v23  ;;  %v1611_v1 = vadd.s32 1, %v3909_v15  ;;  %vm5357_vm15 = vcmp.le.f32.partialorder %v977_v61, 0.7853982 }
 0x191   :  { %4159 = vsinq.f32 %v961_v2  ;;  %v1064_v57 = vsel %vm979_vm14, %v1063_v9, %v1039_v41  ;;  %v1513_v28 = vshrl.u32 %v7237_v0, %v1512_v48  ;;  %v1528_v10 = vor.u32 %v1527_v3, %v1526_v46 }
 0x192   :  { %v3887_v16 = vadd.s32 4294967294, %v1045_v21  ;;  %vm1529_vm0 = vcmp.lt.s32.totalorder %v1510_v34, 1  ;;  %vm1531_vm1 = vcmp.lt.s32.totalorder %v1510_v34, 3  ;;  %vm1532_vm2 = vcmp.lt.s32.totalorder %v1510_v34, 4 }
 0x193   :  { %v1534_v36 = vsel %vm1532_vm2, %v1522_v53, 2102212464  ;;  %v1537_v11 = vsel %vm1529_vm0, %v1516_v32, %v1519_v50  ;;  %v1538_v14 = vsel %vm1532_vm2, %v1525_v24, 920167782  ;;  %v1541_v12 = vsel %vm1529_vm0, %v1519_v50, %v1522_v53 }
 0x194   :  { %vm3888_vm3 = vcmp.lt.s32.totalorder %v3887_v16, 0  ;;  %vm1530_vm4 = vcmp.lt.s32.totalorder %v1510_v34, 2  ;;  %v1539_v61 = vsel %vm1531_vm1, %v1522_v53, %v1538_v14  ;;  %v1542_v25 = vsel %vm1532_vm2, %v1528_v10, 1326507024 }
 0x195   :  { %vm969_vm5 = vcmp.eq.s32.totalorder %v5321_v43, 0  ;;  %v1048_v33 = vsel %vm3888_vm3, 0, %v3887_v16  ;;  %v1533_v41 = vsel %vm1529_vm0, %v1513_v28, %v1516_v32  ;;  %v1540_v62 = vsel %vm1530_vm4, %v1537_v11, %v1539_v61 }
 0x196   :  { %v1543_v27 = vsel %vm1531_vm1, %v1525_v24, %v1542_v25  ;;  %vm968_vm6 = vcmp.lt.s32.totalorder %v5321_v43, 2  ;;  %v1049_v56 = vsub.s32 32, %v1048_v33  ;;  %v1053_v54 = vsub.s32 4294967266, %v1048_v33 }
 0x197   :  { %v1535_v48 = vsel %vm1531_vm1, %v1519_v50, %v1534_v36  ;;  %v1544_v18 = vsel %vm1530_vm4, %v1541_v12, %v1543_v27  ;;  %vm965_vm7 = vweird.f32 %v4988_v49  ;;  %v1050_v4 = vshll.u32 %v5334_v42, %v1048_v33 }
 0x198   :  { %v5373_v15 = vmul.u32.u64.low %v5353_v26, %v1544_v18  ;;  %v5374_v9 = vmul.u32.u64.high %v5353_v26, %v1544_v18, %v5373_v15  ;;  %v5377_v59 = vmul.u32.u64.low %v5353_v26, %v1540_v62  ;;  %v5378_v13 = vmul.u32.u64.high %v5353_v26, %v1540_v62, %v5377_v59 }
 0x199   :  { %v1051_v44 = vshrl.u32 %v5331_v22, %v1049_v56  ;;  %v1054_v60 = vadd.s32 127, %v1053_v54  ;;  %vm1612_vm8 = vcmp.gt.s32.totalorder %v1611_v1, 0  ;;  %v1536_v39 = vsel %vm1530_vm4, %v1533_v41, %v1535_v48 }
 0x19a   :  { %v1608_v31 = vand.u32 8388607, %v1601_v17  ;;  %v1613_v32 = vsel %vm1612_vm8, %v1611_v1, 0  ;;  %v5388_v8 = vadd.f32 %v5324_v40, %v4492_v5  ;;  %v4158_v35 = vpop.eup %4157  ;;  %v1066_v42 = vsel %vm5357_vm15, 0, %v1064_v57 }
 0x19b   :  { %v1052_v29 = vor.u32 %v1051_v44, %v1050_v4  ;;  %v1055_v58 = vshll.u32 %v1054_v60, 23  ;;  %v1615_v23 = vand.u32 31, %v1613_v32  ;;  %v4160_v22 = vpop.eup %4159  ;;  %vm972_vm9 = vcmp.eq.s32.totalorder %v5321_v43, 2 }
 0x19c   :  { %v973_v34 = vxor.u32 2147483648, %v4158_v35  ;;  %vm1554_vm10 = vc.u32 %v5374_v9, %v5377_v59  ;;  %v1555_v50 = vadd.s32 1, %v5378_v13  ;;  %v970_v46 = vxor.u32 2147483648, %v4160_v22 }
 0x19d   :  { %v1056_v2 = vor.u32 4788187, %v1055_v58  ;;  %v1552_v5 = vmul.u32 %v5353_v26, %v1536_v39  ;;  %v1616_v40 = vsub.s32 32, %v1615_v23  ;;  %v1070_v24 = vadd.s32 3, %v1066_v42 }
 0x19e   :  { %v974_v53 = vsel %vm972_vm9, %v973_v34, %v4160_v22  ;;  %v1556_v3 = vsel %vm1554_vm10, %v1555_v50, %v5378_v13  ;;  %v1609_v21 = vor.u32 8388608, %v1608_v31  ;;  %v971_v1 = vsel %vm969_vm5, %v4158_v35, %v970_v46 }
 0x19f   :  { %v1057_v57 = vand.u32 2147483647, %v1056_v2  ;;  %v1059_v28 = vcvt.s32.f32 %v1052_v29  ;;  %v1557_v10 = vadd.s32 %v1556_v3, %v1552_v5  ;;  %v975_v16 = vsel %vm968_vm6, %v971_v1, %v974_v53 }
 0x1a0   :  { %v1618_v36 = vshll.u32 %v7237_v0, %v1615_v23  ;;  %v1619_v11 = vshrl.u32 %v7238_v51, %v1616_v40  ;;  %v1622_v26 = vshrl.u32 %v7239_v47, %v1616_v40  ;;  %v976_v14 = vsel %vm965_vm7, nan, %v975_v16 }
 0x1a1   :  { %v1060_v12 = vmul.f32 %v1059_v28, %v1057_v57  ;;  %v1558_v61 = vadd.s32 536870912, %v1557_v10  ;;  %v1625_v25 = vshrl.u32 %v7240_v19, %v1616_v40  ;;  %3789 = vst [vmem:[#allocation2 + $0x20] sm:$0xff] %v976_v14  ;;  %v1614_v33 = vshrl.u32 %v1613_v32, 5 }
 0x1a2   :  { %v1621_v41 = vshll.u32 %v7238_v51, %v1615_v23  ;;  %v1624_v43 = vshll.u32 %v7239_v47, %v1615_v23  ;;  %v1628_v62 = vshrl.u32 %v7241_v55, %v1616_v40  ;;  %v1620_v54 = vor.u32 %v1619_v11, %v1618_v36 }
 0x1a3   :  { %v1061_v27 = vxor.u32 2147483648, %v1060_v12  ;;  %v1559_v56 = vshrl.u32 %v1558_v61, 30  ;;  %v1627_v48 = vshll.u32 %v7240_v19, %v1615_v23  ;;  %v1630_v15 = vshll.u32 %v7241_v55, %v1615_v23 }
 0x1a4   :  { %v1623_v18 = vor.u32 %v1622_v26, %v1621_v41  ;;  %v1626_v49 = vor.u32 %v1625_v25, %v1624_v43  ;;  %v1631_v13 = vshrl.u32 %v7245_v45, %v1616_v40  ;;  %v5416_v44 = vand.u32 3, %v1070_v24 }
 0x1a5   :  { %v1062_v4 = vsel %vm979_vm14, %v1061_v27, %v1060_v12  ;;  %v1560_v60 = vshll.u32 %v1559_v56, 30  ;;  %v1629_v39 = vor.u32 %v1628_v62, %v1627_v48  ;;  %v1617_v32 = vshrl.u32 %v7237_v0, %v1616_v40 }
 0x1a6   :  { %v1065_v31 = vsel %vm5357_vm15, %v4998_v30, %v1062_v4  ;;  %v1632_v35 = vor.u32 %v1631_v13, %v1630_v15  ;;  %v1649_v29 = vshll.u32 %v1609_v21, 8  ;;  %vm1633_vm11 = vcmp.lt.s32.totalorder %v1614_v33, 1 }
 0x1a7   :  { %4161 = vcosq.f32 %v1065_v31  ;;  %v5422_v58 = vsub.s32 %v1557_v10, %v1560_v60  ;;  %vm1636_vm12 = vcmp.lt.s32.totalorder %v1614_v33, 4  ;;  %vm1634_vm13 = vcmp.lt.s32.totalorder %v1614_v33, 2 }
 0x1a8   :  { %4163 = vsinq.f32 %v1065_v31  ;;  %v1638_v42 = vsel %vm1636_vm12, %v1626_v49, 2102212464  ;;  %v1641_v23 = vsel %vm1633_vm11, %v1620_v54, %v1623_v18  ;;  %v1583_v34 = vsub.s32 4, %v1559_v56 }
 0x1a9   :  { %v1563_v22 = vsub.s32 0, %v5422_v58  ;;  %vm1635_vm14 = vcmp.lt.s32.totalorder %v1614_v33, 3  ;;  %v1642_v50 = vsel %vm1636_vm12, %v1629_v39, 920167782  ;;  %v1637_v52 = vsel %vm1633_vm11, %v1617_v32, %v1620_v54 }
 0x1aa   :  { %v1643_v46 = vsel %vm1635_vm14, %v1626_v49, %v1642_v50  ;;  %v1645_v2 = vsel %vm1633_vm11, %v1623_v18, %v1626_v49  ;;  %v1646_v5 = vsel %vm1636_vm12, %v1632_v35, 1326507024  ;;  %v1639_v53 = vsel %vm1635_vm14, %v1623_v18, %v1638_v42 }
 0x1ab   :  { %v3906_v40 = vmin.u32 %v1563_v22, %v5422_v58  ;;  %v1644_v24 = vsel %vm1634_vm13, %v1641_v23, %v1643_v46  ;;  %v1647_v3 = vsel %vm1635_vm14, %v1629_v39, %v1646_v5  ;;  %vm1499_vm15 = vcmp.lt.s32.totalorder %v5241_v6, 0 }
 0x1ac   :  { %v1648_v21 = vsel %vm1634_vm13, %v1645_v2, %v1647_v3  ;;  %v5429_v1 = vmul.u32.u64.low %v1649_v29, %v1644_v24  ;;  %v5430_v57 = vmul.u32.u64.high %v1649_v29, %v1644_v24, %v5429_v1  ;;  %v1584_v10 = vsel %vm1499_vm15, %v1583_v34, %v1559_v56 }
 0x1ad   :  { %v1565_v28 = vclz %v3906_v40  ;;  %vm1069_vm0 = vweird.f32 %v4998_v30  ;;  %v1640_v16 = vsel %vm1634_vm13, %v1637_v52, %v1639_v53  ;;  %v1292_v26 = vand.u32 2139095040, %v5328_v63 }
 0x1ae   :  { %v5436_v36 = vmul.u32.u64.low %v1649_v29, %v1648_v21  ;;  %v5437_v11 = vmul.u32.u64.high %v1649_v29, %v1648_v21, %v5436_v36  ;;  %vm1072_vm1 = vcmp.lt.s32.totalorder %v5416_v44, 2  ;;  %vm5443_vm2 = vcmp.le.f32.partialorder %v1497_v20, 0.7853982 }
 0x1af   :  { %v3907_v12 = vadd.s32 4294967294, %v1565_v28  ;;  %v1289_v61 = vand.u32 2147483647, %v5328_v63  ;;  %vm1073_vm3 = vcmp.eq.s32.totalorder %v5416_v44, 0  ;;  %vm1076_vm4 = vcmp.eq.s32.totalorder %v5416_v44, 2 }
 0x1b0   :  { %v1659_v25 = vadd.s32 1, %v5430_v57  ;;  %v1293_v33 = vshrl.u32 %v1292_v26, 23  ;;  %v1553_v43 = vadd.s32 %v5377_v59, %v5374_v9  ;;  %v1586_v20 = vsel %vm5443_vm2, 0, %v1584_v10 }
 0x1b1   :  { %v4162_v41 = vpop.eup %4161  ;;  %vm3908_vm5 = vcmp.lt.s32.totalorder %v3907_v12, 0  ;;  %v1656_v62 = vmul.u32 %v1649_v29, %v1640_v16  ;;  %vm1658_vm6 = vc.u32 %v5437_v11, %v5429_v1  ;;  %v1396_v48 = vand.u32 2139095040, %v5388_v8 }
 0x1b2   :  { %v4164_v27 = vpop.eup %4163  ;;  %v1077_v56 = vxor.u32 2147483648, %v4162_v41  ;;  %v1568_v54 = vsel %vm3908_vm5, 0, %v3907_v12  ;;  %v1296_v13 = vand.u32 8388607, %v1289_v61  ;;  %v1660_v4 = vsel %vm1658_vm6, %v1659_v25, %v5430_v57 }
 0x1b3   :  { %v1074_v18 = vxor.u32 2147483648, %v4164_v27  ;;  %v1569_v49 = vsub.s32 32, %v1568_v54  ;;  %v1573_v15 = vsub.s32 4294967266, %v1568_v54  ;;  %v1570_v59 = vshll.u32 %v5422_v58, %v1568_v54 }
 0x1b4   :  { %v1078_v9 = vsel %vm1076_vm4, %v1077_v56, %v4164_v27  ;;  %v3897_v60 = vadd.s32 4294967169, %v1293_v33  ;;  %v1661_v35 = vadd.s32 %v1660_v4, %v1656_v62  ;;  %v1590_v42 = vadd.s32 3, %v1586_v20 }
 0x1b5   :  { %v1075_v39 = vsel %vm1073_vm3, %v4162_v41, %v1074_v18  ;;  %v1571_v31 = vshrl.u32 %v1553_v43, %v1569_v49  ;;  %v1574_v32 = vadd.s32 127, %v1573_v15  ;;  %v1397_v22 = vshrl.u32 %v1396_v48, 23  ;;  %v351_v15 = vpop.permute.xlu1 %350 }
 0x1b6   :  { %v1079_v29 = vsel %vm1072_vm1, %v1075_v39, %v1078_v9  ;;  %v1299_v23 = vadd.s32 1, %v3897_v60  ;;  %v1662_v52 = vadd.s32 536870912, %v1661_v35  ;;  %v1297_v46 = vor.u32 8388608, %v1296_v13 }
 0x1b7   :  { %v1080_v34 = vsel %vm1069_vm0, nan, %v1079_v29  ;;  %v1572_v50 = vor.u32 %v1571_v31, %v1570_v59  ;;  %v1575_v58 = vshll.u32 %v1574_v32, 23  ;;  %v1393_v2 = vand.u32 2147483647, %v5388_v8 }
 0x1b8   :  { %3790 = vst [vmem:[#allocation2 + $0x28] sm:$0xff] %v1080_v34  ;;  %vm1300_vm7 = vcmp.gt.s32.totalorder %v1299_v23, 0  ;;  %v1663_v40 = vshrl.u32 %v1662_v52, 30  ;;  %v3901_v24 = vadd.s32 4294967169, %v1397_v22  ;;  %v5470_v57 = vand.u32 3, %v1590_v42 }
 0x1b9   :  { %v1576_v5 = vor.u32 4788187, %v1575_v58  ;;  %v1301_v53 = vsel %vm1300_vm7, %v1299_v23, 0  ;;  %v1579_v21 = vcvt.s32.f32 %v1572_v50  ;;  %vm1603_vm8 = vcmp.lt.s32.totalorder %v5244_v7, 0 }
 0x1ba   :  { %v1303_v44 = vand.u32 31, %v1301_v53  ;;  %v1664_v30 = vshll.u32 %v1663_v40, 30  ;;  %v5474_v28 = vadd.s32 %v5429_v1, %v5437_v11  ;;  %v5476_v16 = vshll.u32 %v1297_v46, 8 }
 0x1bb   :  { %v1577_v3 = vand.u32 2147483647, %v1576_v5  ;;  %v5480_v36 = vand.u32 8388607, %v1393_v2  ;;  %v5484_v25 = vshrl.u32 %v1301_v53, 5  ;;  %v5486_v33 = vadd.s32 1, %v3901_v24 }
 0x1bc   :  { %v1304_v10 = vsub.s32 32, %v1303_v44  ;;  %v5482_v12 = vsub.s32 %v1661_v35, %v1664_v30  ;;  %v1687_v41 = vsub.s32 4, %v1663_v40  ;;  %v1306_v43 = vshll.u32 %v7237_v0, %v1303_v44 }
 0x1bd   :  { %v1580_v26 = vmul.f32 %v1579_v21, %v1577_v3  ;;  %v1309_v27 = vshll.u32 %v7238_v51, %v1303_v44  ;;  %v1312_v48 = vshll.u32 %v7239_v47, %v1303_v44  ;;  %v1315_v18 = vshll.u32 %v7240_v19, %v1303_v44 }
 0x1be   :  { %v1307_v1 = vshrl.u32 %v7238_v51, %v1304_v10  ;;  %v1310_v11 = vshrl.u32 %v7239_v47, %v1304_v10  ;;  %v1667_v62 = vsub.s32 0, %v5482_v12  ;;  %v1313_v56 = vshrl.u32 %v7240_v19, %v1304_v10 }
 0x1bf   :  { %v1581_v20 = vxor.u32 2147483648, %v1580_v26  ;;  %v1316_v49 = vshrl.u32 %v7241_v55, %v1304_v10  ;;  %v1318_v4 = vshll.u32 %v7241_v55, %v1303_v44  ;;  %v1319_v32 = vshrl.u32 %v7245_v45, %v1304_v10 }
 0x1c0   :  { %v1308_v54 = vor.u32 %v1307_v1, %v1306_v43  ;;  %v3910_v9 = vmin.u32 %v1667_v62, %v5482_v12  ;;  %v1311_v59 = vor.u32 %v1310_v11, %v1309_v27  ;;  %v1314_v39 = vor.u32 %v1313_v56, %v1312_v48  ;;  %v7268_v56 = vld [vmem:[#allocation5_spill] sm:$0xff]  ;;  %v7269_v48 = vld [vmem:[#allocation6_spill] sm:$0xff] }
 0x1c1   :  { %v1582_v13 = vsel %vm1499_vm15, %v1581_v20, %v1580_v26  ;;  %v1317_v31 = vor.u32 %v1316_v49, %v1315_v18  ;;  %v407_v29 = vadd.f32 %v351_v15, %v4554_v37  ;;  %v408_v42 = vadd.f32 %v351_v15, %v4557_v38 }
 0x1c2   :  { %v1585_v60 = vsel %vm5443_vm2, %v5241_v6, %v1582_v13  ;;  %v1669_v35 = vclz %v3910_v9  ;;  %vm5509_vm9 = vcmp.le.f32.partialorder %v1601_v17, 0.7853982  ;;  %v1688_v14 = vsel %vm1603_vm8, %v1687_v41, %v1663_v40 }
 0x1c3   :  { %4165 = vcosq.f32 %v1585_v60  ;;  %v1305_v22 = vshrl.u32 %v7237_v0, %v1304_v10  ;;  %v1320_v34 = vor.u32 %v1319_v32, %v1318_v4  ;;  %vm1321_vm10 = vcmp.lt.s32.totalorder %v5484_v25, 1 }
 0x1c4   :  { %4167 = vsinq.f32 %v1585_v60  ;;  %v3911_v50 = vadd.s32 4294967294, %v1669_v35  ;;  %vm1323_vm11 = vcmp.lt.s32.totalorder %v5484_v25, 3  ;;  %vm1324_vm12 = vcmp.lt.s32.totalorder %v5484_v25, 4 }
 0x1c5   :  { %v1326_v37 = vsel %vm1324_vm12, %v1314_v39, 2102212464  ;;  %v1329_v38 = vsel %vm1321_vm10, %v1308_v54, %v1311_v59  ;;  %v1330_v58 = vsel %vm1324_vm12, %v1317_v31, 920167782  ;;  %v1333_v17 = vsel %vm1321_vm10, %v1311_v59, %v1314_v39 }
 0x1c6   :  { %vm3912_vm13 = vcmp.lt.s32.totalorder %v3911_v50, 0  ;;  %vm1322_vm14 = vcmp.lt.s32.totalorder %v5484_v25, 2  ;;  %v1331_v52 = vsel %vm1323_vm11, %v1314_v39, %v1330_v58  ;;  %v1334_v46 = vsel %vm1324_vm12, %v1320_v34, 1326507024 }
 0x1c7   :  { %vm1593_vm15 = vcmp.eq.s32.totalorder %v5470_v57, 0  ;;  %v1672_v5 = vsel %vm3912_vm13, 0, %v3911_v50  ;;  %v1325_v40 = vsel %vm1321_vm10, %v1305_v22, %v1308_v54  ;;  %v1332_v53 = vsel %vm1322_vm14, %v1329_v38, %v1331_v52 }
 0x1c8   :  { %v1335_v24 = vsel %vm1323_vm11, %v1317_v31, %v1334_v46  ;;  %vm1592_vm0 = vcmp.lt.s32.totalorder %v5470_v57, 2  ;;  %v1673_v44 = vsub.s32 32, %v1672_v5  ;;  %v1677_v3 = vsub.s32 4294967266, %v1672_v5 }
 0x1c9   :  { %v1327_v21 = vsel %vm1323_vm11, %v1311_v59, %v1326_v37  ;;  %v1336_v30 = vsel %vm1322_vm14, %v1333_v17, %v1335_v24  ;;  %vm1589_vm1 = vweird.f32 %v5241_v6  ;;  %v1674_v1 = vshll.u32 %v5482_v12, %v1672_v5 }
 0x1ca   :  { %v5534_v10 = vmul.u32.u64.low %v5476_v16, %v1336_v30  ;;  %v5535_v26 = vmul.u32.u64.high %v5476_v16, %v1336_v30, %v5534_v10  ;;  %v5538_v41 = vmul.u32.u64.low %v5476_v16, %v1332_v53  ;;  %v5539_v43 = vmul.u32.u64.high %v5476_v16, %v1332_v53, %v5538_v41 }
 0x1cb   :  { %v1675_v11 = vshrl.u32 %v5474_v28, %v1673_v44  ;;  %v1678_v20 = vadd.s32 127, %v1677_v3  ;;  %vm1404_vm2 = vcmp.gt.s32.totalorder %v5486_v33, 0  ;;  %v1328_v62 = vsel %vm1322_vm14, %v1325_v40, %v1327_v21 }
 0x1cc   :  { %v1405_v27 = vsel %vm1404_vm2, %v5486_v33, 0  ;;  %v5549_v54 = vadd.f32 %v407_v29, %v7268_v56  ;;  %v5552_v18 = vadd.f32 %v408_v42, %v7269_v48  ;;  %v1690_v28 = vsel %vm5509_vm9, 0, %v1688_v14 }
 0x1cd   :  { %v4166_v49 = vpop.eup %4165  ;;  %v1676_v15 = vor.u32 %v1675_v11, %v1674_v1  ;;  %v1679_v13 = vshll.u32 %v1678_v20, 23  ;;  %v1407_v12 = vand.u32 31, %v1405_v27  ;;  %vm1596_vm3 = vcmp.eq.s32.totalorder %v5470_v57, 2 }
 0x1ce   :  { %v4168_v9 = vpop.eup %4167  ;;  %v1597_v25 = vxor.u32 2147483648, %v4166_v49  ;;  %vm1346_vm4 = vc.u32 %v5535_v26, %v5538_v41  ;;  %v1347_v33 = vadd.s32 1, %v5539_v43  ;;  %v1344_v60 = vmul.u32 %v5476_v16, %v1328_v62 }
 0x1cf   :  { %v1594_v59 = vxor.u32 2147483648, %v4168_v9  ;;  %v1680_v4 = vor.u32 4788187, %v1679_v13  ;;  %v1408_v39 = vsub.s32 32, %v1407_v12  ;;  %v1694_v32 = vadd.s32 3, %v1690_v28 }
 0x1d0   :  { %v1598_v31 = vsel %vm1596_vm3, %v1597_v25, %v4168_v9  ;;  %v1348_v35 = vsel %vm1346_vm4, %v1347_v33, %v5539_v43  ;;  %v1401_v29 = vor.u32 8388608, %v5480_v36  ;;  %v1683_v22 = vcvt.s32.f32 %v1676_v15 }
 0x1d1   :  { %v1595_v42 = vsel %vm1593_vm15, %v4166_v49, %v1594_v59  ;;  %v1681_v14 = vand.u32 2147483647, %v1680_v4  ;;  %v1349_v34 = vadd.s32 %v1348_v35, %v1344_v60  ;;  %v1410_v37 = vshll.u32 %v7237_v0, %v1407_v12 }
 0x1d2   :  { %v1599_v50 = vsel %vm1592_vm0, %v1595_v42, %v1598_v31  ;;  %v1411_v16 = vshrl.u32 %v7238_v51, %v1408_v39  ;;  %v1414_v38 = vshrl.u32 %v7239_v47, %v1408_v39  ;;  %v1417_v52 = vshrl.u32 %v7240_v19, %v1408_v39 }
 0x1d3   :  { %v1600_v58 = vsel %vm1589_vm1, nan, %v1599_v50  ;;  %v1684_v17 = vmul.f32 %v1683_v22, %v1681_v14  ;;  %v1350_v36 = vadd.s32 536870912, %v1349_v34  ;;  %v1406_v46 = vshrl.u32 %v1405_v27, 5 }
 0x1d4   :  { %3795 = vst [vmem:[#allocation2 + $0x50] sm:$0xff] %v1600_v58  ;;  %v1413_v5 = vshll.u32 %v7238_v51, %v1407_v12  ;;  %v1416_v57 = vshll.u32 %v7239_v47, %v1407_v12  ;;  %v1420_v40 = vshrl.u32 %v7241_v55, %v1408_v39  ;;  %v1412_v44 = vor.u32 %v1411_v16, %v1410_v37 }
 0x1d5   :  { %v1685_v53 = vxor.u32 2147483648, %v1684_v17  ;;  %v1351_v24 = vshrl.u32 %v1350_v36, 30  ;;  %v1419_v3 = vshll.u32 %v7240_v19, %v1407_v12  ;;  %v1422_v30 = vshll.u32 %v7241_v55, %v1407_v12 }
 0x1d6   :  { %v1415_v21 = vor.u32 %v1414_v38, %v1413_v5  ;;  %v1418_v6 = vor.u32 %v1417_v52, %v1416_v57  ;;  %v1423_v10 = vshrl.u32 %v7245_v45, %v1408_v39  ;;  %v5581_v20 = vshll.u32 %v1401_v29, 8 }
 0x1d7   :  { %v1686_v43 = vsel %vm1603_vm8, %v1685_v53, %v1684_v17  ;;  %v1352_v1 = vshll.u32 %v1351_v24, 30  ;;  %v1421_v11 = vor.u32 %v1420_v40, %v1419_v3  ;;  %v5586_v27 = vand.u32 3, %v1694_v32 }
 0x1d8   :  { %v1689_v62 = vsel %vm5509_vm9, %v5244_v7, %v1686_v43  ;;  %v1409_v56 = vshrl.u32 %v7237_v0, %v1408_v39  ;;  %v1424_v48 = vor.u32 %v1423_v10, %v1422_v30  ;;  %vm1425_vm5 = vcmp.lt.s32.totalorder %v1406_v46, 1 }
 0x1d9   :  { %4169 = vcosq.f32 %v1689_v62  ;;  %v5589_v49 = vsub.s32 %v1349_v34, %v1352_v1  ;;  %vm1428_vm6 = vcmp.lt.s32.totalorder %v1406_v46, 4  ;;  %vm1426_vm7 = vcmp.lt.s32.totalorder %v1406_v46, 2 }
 0x1da   :  { %4171 = vsinq.f32 %v1689_v62  ;;  %v1430_v15 = vsel %vm1428_vm6, %v1418_v6, 2102212464  ;;  %v1433_v13 = vsel %vm1425_vm5, %v1412_v44, %v1415_v21  ;;  %v1375_v12 = vsub.s32 4, %v1351_v24 }
 0x1db   :  { %v1355_v28 = vsub.s32 0, %v5589_v49  ;;  %vm1427_vm8 = vcmp.lt.s32.totalorder %v1406_v46, 3  ;;  %v1434_v23 = vsel %vm1428_vm6, %v1421_v11, 920167782  ;;  %v1429_v9 = vsel %vm1425_vm5, %v1409_v56, %v1412_v44 }
 0x1dc   :  { %v1435_v25 = vsel %vm1427_vm8, %v1418_v6, %v1434_v23  ;;  %v1437_v33 = vsel %vm1425_vm5, %v1415_v21, %v1418_v6  ;;  %v1438_v59 = vsel %vm1428_vm6, %v1424_v48, 1326507024  ;;  %v1431_v60 = vsel %vm1427_vm8, %v1415_v21, %v1430_v15  ;;  %v346_v21 = vpop.permute.xlu0 %345 }
 0x1dd   :  { %v3898_v4 = vmin.u32 %v1355_v28, %v5589_v49  ;;  %v1436_v39 = vsel %vm1426_vm7, %v1433_v13, %v1435_v25  ;;  %v1439_v31 = vsel %vm1427_vm8, %v1421_v11, %v1438_v59  ;;  %vm1291_vm9 = vcmp.lt.s32.totalorder %v5328_v63, 0  ;;  %v7272_v13 = vld [vmem:[#allocation13_spill] sm:$0xff] }
 0x1de   :  { %v1440_v32 = vsel %vm1426_vm7, %v1437_v33, %v1439_v31  ;;  %v5597_v35 = vmul.u32.u64.low %v5581_v20, %v1436_v39  ;;  %v5598_v29 = vmul.u32.u64.high %v5581_v20, %v1436_v39, %v5597_v35  ;;  %v1376_v14 = vsel %vm1291_vm9, %v1375_v12, %v1351_v24 }
 0x1df   :  { %v1357_v42 = vclz %v3898_v4  ;;  %vm1693_vm10 = vweird.f32 %v5244_v7  ;;  %v1432_v22 = vsel %vm1426_vm7, %v1429_v9, %v1431_v60  ;;  %v1913_v37 = vand.u32 2147483647, %v5549_v54  ;;  %v7273_v7 = vld [vmem:[#allocation7_spill] sm:$0xff] }
 0x1e0   :  { %v5605_v34 = vmul.u32.u64.low %v5581_v20, %v1440_v32  ;;  %v5606_v50 = vmul.u32.u64.high %v5581_v20, %v1440_v32, %v5605_v34  ;;  %vm1696_vm11 = vcmp.lt.s32.totalorder %v5586_v27, 2  ;;  %vm5612_vm12 = vcmp.le.f32.partialorder %v1289_v61, 0.7853982 }
 0x1e1   :  { %v3899_v38 = vadd.s32 4294967294, %v1357_v42  ;;  %v1916_v58 = vand.u32 2139095040, %v5549_v54  ;;  %vm1697_vm13 = vcmp.eq.s32.totalorder %v5586_v27, 0  ;;  %vm1700_vm14 = vcmp.eq.s32.totalorder %v5586_v27, 2 }
 0x1e2   :  { %v1345_v17 = vadd.s32 %v5538_v41, %v5535_v26  ;;  %v1451_v36 = vadd.s32 1, %v5598_v29  ;;  %v1378_v61 = vsel %vm5612_vm12, 0, %v1376_v14  ;;  %v1448_v46 = vmul.u32 %v5581_v20, %v1432_v22 }
 0x1e3   :  { %v4170_v52 = vpop.eup %4169  ;;  %vm3900_vm15 = vcmp.lt.s32.totalorder %v3899_v38, 0  ;;  %v1917_v5 = vshrl.u32 %v1916_v58, 23  ;;  %vm1450_vm0 = vc.u32 %v5606_v50, %v5597_v35  ;;  %v1920_v24 = vand.u32 8388607, %v1913_v37 }
 0x1e4   :  { %v4172_v57 = vpop.eup %4171  ;;  %v1701_v40 = vxor.u32 2147483648, %v4170_v52  ;;  %v1360_v53 = vsel %vm3900_vm15, 0, %v3899_v38  ;;  %v2020_v3 = vand.u32 2139095040, %v5552_v18  ;;  %v1452_v10 = vsel %vm1450_vm0, %v1451_v36, %v5598_v29 }
 0x1e5   :  { %v1698_v44 = vxor.u32 2147483648, %v4172_v57  ;;  %v1361_v26 = vsub.s32 32, %v1360_v53  ;;  %v1365_v41 = vsub.s32 4294967266, %v1360_v53  ;;  %v1362_v30 = vshll.u32 %v5589_v49, %v1360_v53 }
 0x1e6   :  { %v1702_v6 = vsel %vm1700_vm14, %v1701_v40, %v4172_v57  ;;  %v3921_v43 = vadd.s32 4294967169, %v1917_v5  ;;  %v1453_v62 = vadd.s32 %v1452_v10, %v1448_v46  ;;  %v1382_v48 = vadd.s32 3, %v1378_v61 }
 0x1e7   :  { %v1699_v1 = vsel %vm1697_vm13, %v4170_v52, %v1698_v44  ;;  %v1363_v11 = vshrl.u32 %v1345_v17, %v1361_v26  ;;  %v1366_v20 = vadd.s32 127, %v1365_v41  ;;  %v405_v28 = vadd.f32 %v346_v21, %v7272_v13 }
 0x1e8   :  { %v1703_v56 = vsel %vm1696_vm11, %v1699_v1, %v1702_v6  ;;  %v1923_v15 = vadd.s32 1, %v3921_v43  ;;  %v1454_v9 = vadd.s32 536870912, %v1453_v62  ;;  %v1921_v25 = vor.u32 8388608, %v1920_v24 }
 0x1e9   :  { %v1704_v12 = vsel %vm1693_vm10, nan, %v1703_v56  ;;  %v1364_v49 = vor.u32 %v1363_v11, %v1362_v30  ;;  %v1367_v23 = vshll.u32 %v1366_v20, 23  ;;  %v2021_v60 = vshrl.u32 %v2020_v3, 23 }
 0x1ea   :  { %3796 = vst [vmem:[#allocation2 + $0x58] sm:$0xff] %v1704_v12  ;;  %vm1924_vm1 = vcmp.gt.s32.totalorder %v1923_v15, 0  ;;  %v1455_v59 = vshrl.u32 %v1454_v9, 30  ;;  %v5640_v39 = vand.u32 3, %v1382_v48  ;;  %vm1395_vm2 = vcmp.lt.s32.totalorder %v5388_v8, 0  ;;  %v7274_v48 = vld [vmem:[#allocation14_spill] sm:$0xff] }
 0x1eb   :  { %v1368_v33 = vor.u32 4788187, %v1367_v23  ;;  %v1925_v4 = vsel %vm1924_vm1, %v1923_v15, 0  ;;  %v1371_v32 = vcvt.s32.f32 %v1364_v49  ;;  %v5644_v42 = vadd.f32 %v405_v28, %v7273_v7 }
 0x1ec   :  { %v1927_v27 = vand.u32 31, %v1925_v4  ;;  %v1456_v29 = vshll.u32 %v1455_v59, 30  ;;  %v5647_v14 = vadd.s32 %v5597_v35, %v5606_v50  ;;  %v5649_v34 = vshll.u32 %v1921_v25, 8 }
 0x1ed   :  { %v1369_v31 = vand.u32 2147483647, %v1368_v33  ;;  %v2017_v38 = vand.u32 2147483647, %v5552_v18  ;;  %v1926_v36 = vshrl.u32 %v1925_v4, 5  ;;  %v3925_v52 = vadd.s32 4294967169, %v2021_v60 }
 0x1ee   :  { %v1928_v22 = vsub.s32 32, %v1927_v27  ;;  %v5652_v17 = vsub.s32 %v1453_v62, %v1456_v29  ;;  %v1479_v61 = vsub.s32 4, %v1455_v59  ;;  %v1930_v46 = vshll.u32 %v7237_v0, %v1927_v27 }
 0x1ef   :  { %v1372_v58 = vmul.f32 %v1371_v32, %v1369_v31  ;;  %v1933_v50 = vshll.u32 %v7238_v51, %v1927_v27  ;;  %v1936_v44 = vshll.u32 %v7239_v47, %v1927_v27  ;;  %v1939_v26 = vshll.u32 %v7240_v19, %v1927_v27 }
 0x1f0   :  { %v1931_v5 = vshrl.u32 %v7238_v51, %v1928_v22  ;;  %v1934_v57 = vshrl.u32 %v7239_v47, %v1928_v22  ;;  %v1459_v35 = vsub.s32 0, %v5652_v17  ;;  %v1937_v53 = vshrl.u32 %v7240_v19, %v1928_v22 }
 0x1f1   :  { %v1373_v40 = vxor.u32 2147483648, %v1372_v58  ;;  %v1940_v41 = vshrl.u32 %v7241_v55, %v1928_v22  ;;  %v1942_v10 = vshll.u32 %v7241_v55, %v1927_v27  ;;  %v1943_v20 = vshrl.u32 %v7245_v45, %v1928_v22 }
 0x1f2   :  { %v1932_v24 = vor.u32 %v1931_v5, %v1930_v46  ;;  %v3902_v6 = vmin.u32 %v1459_v35, %v5652_v17  ;;  %v1935_v30 = vor.u32 %v1934_v57, %v1933_v50  ;;  %v1938_v1 = vor.u32 %v1937_v53, %v1936_v44  ;;  %v7277_v53 = vld [vmem:[#allocation8_spill] sm:$0xff] }
 0x1f3   :  { %v1374_v3 = vsel %vm1291_vm9, %v1373_v40, %v1372_v58  ;;  %v1941_v11 = vor.u32 %v1940_v41, %v1939_v26  ;;  %v2027_v56 = vadd.s32 1, %v3925_v52  ;;  %v406_v15 = vadd.f32 %v346_v21, %v7274_v48 }
 0x1f4   :  { %v1377_v43 = vsel %vm5612_vm12, %v5328_v63, %v1374_v3  ;;  %v1461_v62 = vclz %v3902_v6  ;;  %vm5674_vm3 = vcmp.le.f32.partialorder %v1393_v2, 0.7853982  ;;  %v1480_v16 = vsel %vm1395_vm2, %v1479_v61, %v1455_v59 }
 0x1f5   :  { %4173 = vcosq.f32 %v1377_v43  ;;  %v1929_v28 = vshrl.u32 %v7237_v0, %v1928_v22  ;;  %v1944_v12 = vor.u32 %v1943_v20, %v1942_v10  ;;  %vm1945_vm4 = vcmp.lt.s32.totalorder %v1926_v36, 1 }
 0x1f6   :  { %4175 = vsinq.f32 %v1377_v43  ;;  %v3903_v49 = vadd.s32 4294967294, %v1461_v62  ;;  %vm1947_vm5 = vcmp.lt.s32.totalorder %v1926_v36, 3  ;;  %vm1948_vm6 = vcmp.lt.s32.totalorder %v1926_v36, 4 }
 0x1f7   :  { %v1950_v23 = vsel %vm1948_vm6, %v1938_v1, 2102212464  ;;  %v1953_v9 = vsel %vm1945_vm4, %v1932_v24, %v1935_v30  ;;  %v1954_v21 = vsel %vm1948_vm6, %v1941_v11, 920167782  ;;  %v1957_v25 = vsel %vm1945_vm4, %v1935_v30, %v1938_v1 }
 0x1f8   :  { %vm3904_vm7 = vcmp.lt.s32.totalorder %v3903_v49, 0  ;;  %vm1946_vm8 = vcmp.lt.s32.totalorder %v1926_v36, 2  ;;  %v1955_v2 = vsel %vm1947_vm5, %v1938_v1, %v1954_v21  ;;  %v1958_v33 = vsel %vm1948_vm6, %v1944_v12, 1326507024 }
 0x1f9   :  { %vm1385_vm9 = vcmp.eq.s32.totalorder %v5640_v39, 0  ;;  %v1464_v4 = vsel %vm3904_vm7, 0, %v3903_v49  ;;  %v1949_v59 = vsel %vm1945_vm4, %v1929_v28, %v1932_v24  ;;  %v1956_v60 = vsel %vm1946_vm8, %v1953_v9, %v1955_v2 }
 0x1fa   :  { %v1959_v27 = vsel %vm1947_vm5, %v1941_v11, %v1958_v33  ;;  %vm1384_vm10 = vcmp.lt.s32.totalorder %v5640_v39, 2  ;;  %v1465_v31 = vsub.s32 32, %v1464_v4  ;;  %v1469_v32 = vsub.s32 4294967266, %v1464_v4 }
 0x1fb   :  { %v1951_v29 = vsel %vm1947_vm5, %v1935_v30, %v1950_v23  ;;  %v1960_v7 = vsel %vm1946_vm8, %v1957_v25, %v1959_v27  ;;  %vm1381_vm11 = vweird.f32 %v5328_v63  ;;  %v1466_v46 = vshll.u32 %v5652_v17, %v1464_v4 }
 0x1fc   :  { %v5690_v22 = vmul.u32.u64.low %v5649_v34, %v1960_v7  ;;  %v5691_v58 = vmul.u32.u64.high %v5649_v34, %v1960_v7, %v5690_v22  ;;  %v5694_v52 = vmul.u32.u64.low %v5649_v34, %v1956_v60  ;;  %v5695_v61 = vmul.u32.u64.high %v5649_v34, %v1956_v60, %v5694_v52 }
 0x1fd   :  { %v1467_v5 = vshrl.u32 %v5647_v14, %v1465_v31  ;;  %v1470_v57 = vadd.s32 127, %v1469_v32  ;;  %vm2028_vm12 = vcmp.gt.s32.totalorder %v2027_v56, 0  ;;  %v1952_v40 = vsel %vm1946_vm8, %v1949_v59, %v1951_v29 }
 0x1fe   :  { %v2024_v35 = vand.u32 8388607, %v2017_v38  ;;  %v2029_v50 = vsel %vm2028_vm12, %v2027_v56, 0  ;;  %v5704_v24 = vadd.f32 %v406_v15, %v7277_v53  ;;  %v1482_v3 = vsel %vm5674_vm3, 0, %v1480_v16 }
 0x1ff   :  { %v4174_v44 = vpop.eup %4173  ;;  %v1468_v26 = vor.u32 %v1467_v5, %v1466_v46  ;;  %v1471_v41 = vshll.u32 %v1470_v57, 23  ;;  %v2031_v17 = vand.u32 31, %v2029_v50  ;;  %vm1388_vm13 = vcmp.eq.s32.totalorder %v5640_v39, 2 }
 0x200   :  { %v4176_v6 = vpop.eup %4175  ;;  %v1389_v14 = vxor.u32 2147483648, %v4174_v44  ;;  %vm1970_vm14 = vc.u32 %v5691_v58, %v5694_v52  ;;  %v1971_v36 = vadd.s32 1, %v5695_v61  ;;  %v1968_v43 = vmul.u32 %v5649_v34, %v1952_v40 }
 0x201   :  { %v1386_v30 = vxor.u32 2147483648, %v4176_v6  ;;  %v1472_v10 = vor.u32 4788187, %v1471_v41  ;;  %v2032_v1 = vsub.s32 32, %v2031_v17  ;;  %v1486_v20 = vadd.s32 3, %v1482_v3 }
 0x202   :  { %v1390_v11 = vsel %vm1388_vm13, %v1389_v14, %v4176_v6  ;;  %v1972_v62 = vsel %vm1970_vm14, %v1971_v36, %v5695_v61  ;;  %v2025_v56 = vor.u32 8388608, %v2024_v35  ;;  %v1475_v16 = vcvt.s32.f32 %v1468_v26 }
 0x203   :  { %v1387_v48 = vsel %vm1385_vm9, %v4174_v44, %v1386_v30  ;;  %v1473_v15 = vand.u32 2147483647, %v1472_v10  ;;  %v1973_v28 = vadd.s32 %v1972_v62, %v1968_v43  ;;  %v2034_v49 = vshll.u32 %v7237_v0, %v2031_v17 }
 0x204   :  { %v1391_v12 = vsel %vm1384_vm10, %v1387_v48, %v1390_v11  ;;  %v2035_v23 = vshrl.u32 %v7238_v51, %v2032_v1  ;;  %v2038_v34 = vshrl.u32 %v7239_v47, %v2032_v1  ;;  %v2041_v2 = vshrl.u32 %v7240_v19, %v2032_v1 }
 0x205   :  { %v1392_v9 = vsel %vm1381_vm11, nan, %v1391_v12  ;;  %v1476_v21 = vmul.f32 %v1475_v16, %v1473_v15  ;;  %v1974_v25 = vadd.s32 536870912, %v1973_v28  ;;  %v2030_v33 = vshrl.u32 %v2029_v50, 5 }
 0x206   :  { %3793 = vst [vmem:[#allocation2 + $0x40] sm:$0xff] %v1392_v9  ;;  %v2037_v4 = vshll.u32 %v7238_v51, %v2031_v17  ;;  %v2040_v39 = vshll.u32 %v7239_v47, %v2031_v17  ;;  %v2044_v59 = vshrl.u32 %v7241_v55, %v2032_v1  ;;  %v2036_v31 = vor.u32 %v2035_v23, %v2034_v49 }
 0x207   :  { %v1477_v60 = vxor.u32 2147483648, %v1476_v21  ;;  %v1975_v27 = vshrl.u32 %v1974_v25, 30  ;;  %v2043_v32 = vshll.u32 %v7240_v19, %v2031_v17  ;;  %v2046_v7 = vshll.u32 %v7241_v55, %v2031_v17 }
 0x208   :  { %v2039_v29 = vor.u32 %v2038_v34, %v2037_v4  ;;  %v2042_v63 = vor.u32 %v2041_v2, %v2040_v39  ;;  %v2047_v22 = vshrl.u32 %v7245_v45, %v2032_v1  ;;  %v5732_v46 = vand.u32 3, %v1486_v20 }
 0x209   :  { %v1478_v61 = vsel %vm1395_vm2, %v1477_v60, %v1476_v21  ;;  %v1976_v5 = vshll.u32 %v1975_v27, 30  ;;  %v2045_v57 = vor.u32 %v2044_v59, %v2043_v32  ;;  %v2033_v35 = vshrl.u32 %v7237_v0, %v2032_v1 }
 0x20a   :  { %v1481_v40 = vsel %vm5674_vm3, %v5388_v8, %v1478_v61  ;;  %v2048_v50 = vor.u32 %v2047_v22, %v2046_v7  ;;  %v2065_v53 = vshll.u32 %v2025_v56, 8  ;;  %vm2049_vm15 = vcmp.lt.s32.totalorder %v2030_v33, 1 }
 0x20b   :  { %4177 = vcosq.f32 %v1481_v40  ;;  %v5738_v44 = vsub.s32 %v1973_v28, %v1976_v5  ;;  %vm2052_vm0 = vcmp.lt.s32.totalorder %v2030_v33, 4  ;;  %vm2050_vm1 = vcmp.lt.s32.totalorder %v2030_v33, 2 }
 0x20c   :  { %4179 = vsinq.f32 %v1481_v40  ;;  %v2054_v26 = vsel %vm2052_vm0, %v2042_v63, 2102212464  ;;  %v2057_v41 = vsel %vm2049_vm15, %v2036_v31, %v2039_v29  ;;  %v1999_v17 = vsub.s32 4, %v1975_v27 }
 0x20d   :  { %v1979_v3 = vsub.s32 0, %v5738_v44  ;;  %vm2051_vm2 = vcmp.lt.s32.totalorder %v2030_v33, 3  ;;  %v2058_v6 = vsel %vm2052_vm0, %v2045_v57, 920167782  ;;  %v2053_v13 = vsel %vm2049_vm15, %v2033_v35, %v2036_v31 }
 0x20e   :  { %v2059_v14 = vsel %vm2051_vm2, %v2042_v63, %v2058_v6  ;;  %v2061_v36 = vsel %vm2049_vm15, %v2039_v29, %v2042_v63  ;;  %v2062_v30 = vsel %vm2052_vm0, %v2048_v50, 1326507024  ;;  %v2055_v43 = vsel %vm2051_vm2, %v2039_v29, %v2054_v26 }
 0x20f   :  { %v3922_v10 = vmin.u32 %v1979_v3, %v5738_v44  ;;  %v2060_v1 = vsel %vm2050_vm1, %v2057_v41, %v2059_v14  ;;  %v2063_v11 = vsel %vm2051_vm2, %v2045_v57, %v2062_v30  ;;  %vm1915_vm3 = vcmp.lt.s32.totalorder %v5549_v54, 0 }
 0x210   :  { %v2064_v20 = vsel %vm2050_vm1, %v2061_v36, %v2063_v11  ;;  %v5745_v62 = vmul.u32.u64.low %v2065_v53, %v2060_v1  ;;  %v5746_v56 = vmul.u32.u64.high %v2065_v53, %v2060_v1, %v5745_v62  ;;  %v2000_v15 = vsel %vm1915_vm3, %v1999_v17, %v1975_v27 }
 0x211   :  { %v1981_v48 = vclz %v3922_v10  ;;  %vm1485_vm4 = vweird.f32 %v5388_v8  ;;  %v2056_v16 = vsel %vm2050_vm1, %v2053_v13, %v2055_v43  ;;  %v1708_v49 = vand.u32 2139095040, %v5644_v42 }
 0x212   :  { %v5752_v28 = vmul.u32.u64.low %v2065_v53, %v2064_v20  ;;  %v5753_v12 = vmul.u32.u64.high %v2065_v53, %v2064_v20, %v5752_v28  ;;  %vm1488_vm5 = vcmp.lt.s32.totalorder %v5732_v46, 2  ;;  %vm5759_vm6 = vcmp.le.f32.partialorder %v1913_v37, 0.7853982 }
 0x213   :  { %v3923_v34 = vadd.s32 4294967294, %v1981_v48  ;;  %v1705_v9 = vand.u32 2147483647, %v5644_v42  ;;  %vm1489_vm7 = vcmp.eq.s32.totalorder %v5732_v46, 0  ;;  %vm1492_vm8 = vcmp.eq.s32.totalorder %v5732_v46, 2 }
 0x214   :  { %v2075_v21 = vadd.s32 1, %v5746_v56  ;;  %v1709_v25 = vshrl.u32 %v1708_v49, 23  ;;  %v1969_v33 = vadd.s32 %v5694_v52, %v5691_v58  ;;  %v2002_v37 = vsel %vm5759_vm6, 0, %v2000_v15 }
 0x215   :  { %v4178_v2 = vpop.eup %4177  ;;  %vm3924_vm9 = vcmp.lt.s32.totalorder %v3923_v34, 0  ;;  %v2072_v4 = vmul.u32 %v2065_v53, %v2056_v16  ;;  %vm2074_vm10 = vc.u32 %v5753_v12, %v5745_v62  ;;  %v1812_v27 = vand.u32 2139095040, %v5704_v24 }
 0x216   :  { %v4180_v39 = vpop.eup %4179  ;;  %v1493_v59 = vxor.u32 2147483648, %v4178_v2  ;;  %v1984_v60 = vsel %vm3924_vm9, 0, %v3923_v34  ;;  %v1712_v63 = vand.u32 8388607, %v1705_v9  ;;  %v2076_v7 = vsel %vm2074_vm10, %v2075_v21, %v5746_v56 }
 0x217   :  { %v1490_v31 = vxor.u32 2147483648, %v4180_v39  ;;  %v1985_v32 = vsub.s32 32, %v1984_v60  ;;  %v1989_v29 = vsub.s32 4294967266, %v1984_v60  ;;  %v1986_v52 = vshll.u32 %v5738_v44, %v1984_v60 }
 0x218   :  { %v1494_v58 = vsel %vm1492_vm8, %v1493_v59, %v4180_v39  ;;  %v3913_v22 = vadd.s32 4294967169, %v1709_v25  ;;  %v2077_v40 = vadd.s32 %v2076_v7, %v2072_v4  ;;  %v2006_v50 = vadd.s32 3, %v2002_v37 }
 0x219   :  { %v1491_v61 = vsel %vm1489_vm7, %v4178_v2, %v1490_v31  ;;  %v1987_v5 = vshrl.u32 %v1969_v33, %v1985_v32  ;;  %v1990_v57 = vadd.s32 127, %v1989_v29  ;;  %v1813_v26 = vshrl.u32 %v1812_v27, 23  ;;  %v361_v31 = vpop.permute.xlu1 %360 }
 0x21a   :  { %v1495_v35 = vsel %vm1488_vm5, %v1491_v61, %v1494_v58  ;;  %v1715_v53 = vadd.s32 1, %v3913_v22  ;;  %v2078_v17 = vadd.s32 536870912, %v2077_v40  ;;  %v1713_v6 = vor.u32 8388608, %v1712_v63 }
 0x21b   :  { %v1496_v41 = vsel %vm1485_vm4, nan, %v1495_v35  ;;  %v1988_v3 = vor.u32 %v1987_v5, %v1986_v52  ;;  %v1991_v44 = vshll.u32 %v1990_v57, 23  ;;  %v1809_v13 = vand.u32 2147483647, %v5704_v24  ;;  %v7280_v57 = vld [vmem:[#allocation15_spill] sm:$0xff]  ;;  %v7281_v35 = vld [vmem:[#allocation16_spill] sm:$0xff] }
 0x21c   :  { %3794 = vst [vmem:[#allocation2 + $0x48] sm:$0xff] %v1496_v41  ;;  %vm1716_vm11 = vcmp.gt.s32.totalorder %v1715_v53, 0  ;;  %v2079_v36 = vshrl.u32 %v2078_v17, 30  ;;  %v3917_v10 = vadd.s32 4294967169, %v1813_v26  ;;  %v5786_v11 = vand.u32 3, %v2006_v50 }
 0x21d   :  { %v1992_v14 = vor.u32 4788187, %v1991_v44  ;;  %v1717_v30 = vsel %vm1716_vm11, %v1715_v53, 0  ;;  %v1995_v1 = vcvt.s32.f32 %v1988_v3  ;;  %vm2019_vm12 = vcmp.lt.s32.totalorder %v5552_v18, 0 }
 0x21e   :  { %v1719_v46 = vand.u32 31, %v1717_v30  ;;  %v2080_v8 = vshll.u32 %v2079_v36, 30  ;;  %v5790_v20 = vadd.s32 %v5745_v62, %v5753_v12  ;;  %v5792_v48 = vshll.u32 %v1713_v6, 8 }
 0x21f   :  { %v1993_v43 = vand.u32 2147483647, %v1992_v14  ;;  %v5796_v15 = vand.u32 8388607, %v1809_v13  ;;  %v5800_v49 = vshrl.u32 %v1717_v30, 5  ;;  %v5802_v34 = vadd.s32 1, %v3917_v10 }
 0x220   :  { %v1720_v56 = vsub.s32 32, %v1719_v46  ;;  %v5798_v28 = vsub.s32 %v2077_v40, %v2080_v8  ;;  %v2103_v21 = vsub.s32 4, %v2079_v36  ;;  %v1722_v25 = vshll.u32 %v7237_v0, %v1719_v46 }
 0x221   :  { %v1996_v16 = vmul.f32 %v1995_v1, %v1993_v43  ;;  %v1725_v37 = vshll.u32 %v7238_v51, %v1719_v46  ;;  %v1728_v59 = vshll.u32 %v7239_v47, %v1719_v46  ;;  %v1731_v60 = vshll.u32 %v7240_v19, %v1719_v46 }
 0x222   :  { %v1723_v62 = vshrl.u32 %v7238_v51, %v1720_v56  ;;  %v1726_v12 = vshrl.u32 %v7239_v47, %v1720_v56  ;;  %v2083_v33 = vsub.s32 0, %v5798_v28  ;;  %v1729_v4 = vshrl.u32 %v7240_v19, %v1720_v56 }
 0x223   :  { %v1997_v2 = vxor.u32 2147483648, %v1996_v16  ;;  %v1732_v27 = vshrl.u32 %v7241_v55, %v1720_v56  ;;  %v1734_v58 = vshll.u32 %v7241_v55, %v1719_v46  ;;  %v1735_v61 = vshrl.u32 %v7245_v45, %v1720_v56 }
 0x224   :  { %v1724_v39 = vor.u32 %v1723_v62, %v1722_v25  ;;  %v3926_v29 = vmin.u32 %v2083_v33, %v5798_v28  ;;  %v1727_v63 = vor.u32 %v1726_v12, %v1725_v37  ;;  %v1730_v7 = vor.u32 %v1729_v4, %v1728_v59  ;;  %v7284_v59 = vld [vmem:[#allocation9_spill] sm:$0xff] }
 0x225   :  { %v1998_v32 = vsel %vm1915_vm3, %v1997_v2, %v1996_v16  ;;  %v1733_v22 = vor.u32 %v1732_v27, %v1731_v60  ;;  %v411_v40 = vadd.f32 %v361_v31, %v7280_v57  ;;  %v412_v50 = vadd.f32 %v361_v31, %v7281_v35  ;;  %v7285_v27 = vld [vmem:[#allocation10_spill] sm:$0xff] }
 0x226   :  { %v2001_v52 = vsel %vm5759_vm6, %v5549_v54, %v1998_v32  ;;  %v2085_v5 = vclz %v3926_v29  ;;  %vm5825_vm13 = vcmp.le.f32.partialorder %v2017_v38, 0.7853982  ;;  %v2104_v23 = vsel %vm2019_vm12, %v2103_v21, %v2079_v36 }
 0x227   :  { %4181 = vcosq.f32 %v2001_v52  ;;  %v1721_v26 = vshrl.u32 %v7237_v0, %v1720_v56  ;;  %v1736_v41 = vor.u32 %v1735_v61, %v1734_v58  ;;  %vm1737_vm14 = vcmp.lt.s32.totalorder %v5800_v49, 1 }
 0x228   :  { %4183 = vsinq.f32 %v2001_v52  ;;  %v3927_v3 = vadd.s32 4294967294, %v2085_v5  ;;  %vm1739_vm15 = vcmp.lt.s32.totalorder %v5800_v49, 3  ;;  %vm1740_vm0 = vcmp.lt.s32.totalorder %v5800_v49, 4 }
 0x229   :  { %v1742_v44 = vsel %vm1740_vm0, %v1730_v7, 2102212464  ;;  %v1745_v17 = vsel %vm1737_vm14, %v1724_v39, %v1727_v63  ;;  %v1746_v6 = vsel %vm1740_vm0, %v1733_v22, 920167782  ;;  %v1749_v38 = vsel %vm1737_vm14, %v1727_v63, %v1730_v7 }
 0x22a   :  { %vm3928_vm1 = vcmp.lt.s32.totalorder %v3927_v3, 0  ;;  %vm1738_vm2 = vcmp.lt.s32.totalorder %v5800_v49, 2  ;;  %v1747_v14 = vsel %vm1739_vm15, %v1730_v7, %v1746_v6  ;;  %v1750_v36 = vsel %vm1740_vm0, %v1736_v41, 1326507024 }
 0x22b   :  { %vm2009_vm3 = vcmp.eq.s32.totalorder %v5786_v11, 0  ;;  %v2088_v30 = vsel %vm3928_vm1, 0, %v3927_v3  ;;  %v1741_v10 = vsel %vm1737_vm14, %v1721_v26, %v1724_v39  ;;  %v1748_v46 = vsel %vm1738_vm2, %v1745_v17, %v1747_v14 }
 0x22c   :  { %v1751_v43 = vsel %vm1739_vm15, %v1733_v22, %v1750_v36  ;;  %vm2008_vm4 = vcmp.lt.s32.totalorder %v5786_v11, 2  ;;  %v2089_v1 = vsub.s32 32, %v2088_v30  ;;  %v2093_v8 = vsub.s32 4294967266, %v2088_v30 }
 0x22d   :  { %v1743_v56 = vsel %vm1739_vm15, %v1727_v63, %v1742_v44  ;;  %v1752_v16 = vsel %vm1738_vm2, %v1749_v38, %v1751_v43  ;;  %vm2005_vm5 = vweird.f32 %v5549_v54  ;;  %v2090_v2 = vshll.u32 %v5798_v28, %v2088_v30 }
 0x22e   :  { %v5850_v21 = vmul.u32.u64.low %v5792_v48, %v1752_v16  ;;  %v5851_v25 = vmul.u32.u64.high %v5792_v48, %v1752_v16, %v5850_v21  ;;  %v5854_v62 = vmul.u32.u64.low %v5792_v48, %v1748_v46  ;;  %v5855_v12 = vmul.u32.u64.high %v5792_v48, %v1748_v46, %v5854_v62 }
 0x22f   :  { %v2091_v33 = vshrl.u32 %v5790_v20, %v2089_v1  ;;  %v2094_v37 = vadd.s32 127, %v2093_v8  ;;  %vm1820_vm6 = vcmp.gt.s32.totalorder %v5802_v34, 0  ;;  %v1744_v4 = vsel %vm1738_vm2, %v1741_v10, %v1743_v56 }
 0x230   :  { %v1821_v39 = vsel %vm1820_vm6, %v5802_v34, 0  ;;  %v5865_v60 = vadd.f32 %v411_v40, %v7284_v59  ;;  %v5868_v31 = vadd.f32 %v412_v50, %v7285_v27  ;;  %v2106_v20 = vsel %vm5825_vm13, 0, %v2104_v23 }
 0x231   :  { %v4182_v32 = vpop.eup %4181  ;;  %v2092_v29 = vor.u32 %v2091_v33, %v2090_v2  ;;  %v2095_v63 = vshll.u32 %v2094_v37, 23  ;;  %v1823_v28 = vand.u32 31, %v1821_v39  ;;  %vm2012_vm7 = vcmp.eq.s32.totalorder %v5786_v11, 2 }
 0x232   :  { %v4184_v58 = vpop.eup %4183  ;;  %v2013_v49 = vxor.u32 2147483648, %v4182_v32  ;;  %vm1762_vm8 = vc.u32 %v5851_v25, %v5854_v62  ;;  %v1763_v34 = vadd.s32 1, %v5855_v12  ;;  %v1760_v22 = vmul.u32 %v5792_v48, %v1744_v4 }
 0x233   :  { %v2010_v52 = vxor.u32 2147483648, %v4184_v58  ;;  %v2096_v7 = vor.u32 4788187, %v2095_v63  ;;  %v1824_v61 = vsub.s32 32, %v1823_v28  ;;  %v2110_v57 = vadd.s32 3, %v2106_v20 }
 0x234   :  { %v2014_v5 = vsel %vm2012_vm7, %v2013_v49, %v4184_v58  ;;  %v1764_v40 = vsel %vm1762_vm8, %v1763_v34, %v5855_v12  ;;  %v1817_v35 = vor.u32 8388608, %v5796_v15  ;;  %v2099_v26 = vcvt.s32.f32 %v2092_v29 }
 0x235   :  { %v2011_v50 = vsel %vm2009_vm3, %v4182_v32, %v2010_v52  ;;  %v2097_v23 = vand.u32 2147483647, %v2096_v7  ;;  %v1765_v41 = vadd.s32 %v1764_v40, %v1760_v22  ;;  %v1826_v44 = vshll.u32 %v7237_v0, %v1823_v28 }
 0x236   :  { %v2015_v3 = vsel %vm2008_vm4, %v2011_v50, %v2014_v5  ;;  %v1827_v48 = vshrl.u32 %v7238_v51, %v1824_v61  ;;  %v1830_v17 = vshrl.u32 %v7239_v47, %v1824_v61  ;;  %v1833_v14 = vshrl.u32 %v7240_v19, %v1824_v61 }
 0x237   :  { %v2016_v6 = vsel %vm2005_vm5, nan, %v2015_v3  ;;  %v2100_v38 = vmul.f32 %v2099_v26, %v2097_v23  ;;  %v1766_v15 = vadd.s32 536870912, %v1765_v41  ;;  %v1822_v36 = vshrl.u32 %v1821_v39, 5 }
 0x238   :  { %3799 = vst [vmem:[#allocation2 + $0x70] sm:$0xff] %v2016_v6  ;;  %v1829_v30 = vshll.u32 %v7238_v51, %v1823_v28  ;;  %v1832_v11 = vshll.u32 %v7239_v47, %v1823_v28  ;;  %v1836_v10 = vshrl.u32 %v7241_v55, %v1824_v61  ;;  %v1828_v1 = vor.u32 %v1827_v48, %v1826_v44 }
 0x239   :  { %v2101_v46 = vxor.u32 2147483648, %v2100_v38  ;;  %v1767_v43 = vshrl.u32 %v1766_v15, 30  ;;  %v1835_v8 = vshll.u32 %v7240_v19, %v1823_v28  ;;  %v1838_v16 = vshll.u32 %v7241_v55, %v1823_v28 }
 0x23a   :  { %v1831_v56 = vor.u32 %v1830_v17, %v1829_v30  ;;  %v1834_v54 = vor.u32 %v1833_v14, %v1832_v11  ;;  %v1839_v21 = vshrl.u32 %v7245_v45, %v1824_v61  ;;  %v5897_v37 = vshll.u32 %v1817_v35, 8 }
 0x23b   :  { %v2102_v12 = vsel %vm2019_vm12, %v2101_v46, %v2100_v38  ;;  %v1768_v2 = vshll.u32 %v1767_v43, 30  ;;  %v1837_v33 = vor.u32 %v1836_v10, %v1835_v8  ;;  %v5902_v39 = vand.u32 3, %v2110_v57 }
 0x23c   :  { %v2105_v4 = vsel %vm5825_vm13, %v5552_v18, %v2102_v12  ;;  %v1825_v59 = vshrl.u32 %v7237_v0, %v1824_v61  ;;  %v1840_v27 = vor.u32 %v1839_v21, %v1838_v16  ;;  %vm1841_vm9 = vcmp.lt.s32.totalorder %v1822_v36, 1 }
 0x23d   :  { %4185 = vcosq.f32 %v2105_v4  ;;  %v5905_v32 = vsub.s32 %v1765_v41, %v1768_v2  ;;  %vm1844_vm10 = vcmp.lt.s32.totalorder %v1822_v36, 4  ;;  %vm1842_vm11 = vcmp.lt.s32.totalorder %v1822_v36, 2 }
 0x23e   :  { %4187 = vsinq.f32 %v2105_v4  ;;  %v1846_v29 = vsel %vm1844_vm10, %v1834_v54, 2102212464  ;;  %v1849_v63 = vsel %vm1841_vm9, %v1828_v1, %v1831_v56  ;;  %v1791_v28 = vsub.s32 4, %v1767_v43 }
 0x23f   :  { %v1771_v20 = vsub.s32 0, %v5905_v32  ;;  %vm1843_vm12 = vcmp.lt.s32.totalorder %v1822_v36, 3  ;;  %v1850_v53 = vsel %vm1844_vm10, %v1837_v33, 920167782  ;;  %v1845_v58 = vsel %vm1841_vm9, %v1825_v59, %v1828_v1 }
 0x240   :  { %v1851_v49 = vsel %vm1843_vm12, %v1834_v54, %v1850_v53  ;;  %v1853_v34 = vsel %vm1841_vm9, %v1831_v56, %v1834_v54  ;;  %v1854_v52 = vsel %vm1844_vm10, %v1840_v27, 1326507024  ;;  %v1847_v22 = vsel %vm1843_vm12, %v1831_v56, %v1846_v29  ;;  %v356_v56 = vpop.permute.xlu0 %355 }
 0x241   :  { %v3914_v7 = vmin.u32 %v1771_v20, %v5905_v32  ;;  %v1852_v61 = vsel %vm1842_vm11, %v1849_v63, %v1851_v49  ;;  %v1855_v5 = vsel %vm1843_vm12, %v1837_v33, %v1854_v52  ;;  %vm1707_vm13 = vcmp.lt.s32.totalorder %v5644_v42, 0  ;;  %v7288_v63 = vld [vmem:[#allocation17_spill] sm:$0xff] }
 0x242   :  { %v1856_v57 = vsel %vm1842_vm11, %v1853_v34, %v1855_v5  ;;  %v5913_v40 = vmul.u32.u64.low %v5897_v37, %v1852_v61  ;;  %v5914_v35 = vmul.u32.u64.high %v5897_v37, %v1852_v61, %v5913_v40  ;;  %v1792_v23 = vsel %vm1707_vm13, %v1791_v28, %v1767_v43 }
 0x243   :  { %v1773_v50 = vclz %v3914_v7  ;;  %vm2109_vm14 = vweird.f32 %v5552_v18  ;;  %v1848_v26 = vsel %vm1842_vm11, %v1845_v58, %v1847_v22  ;;  %v2329_v44 = vand.u32 2147483647, %v5865_v60  ;;  %v7289_v18 = vld [vmem:[#allocation11_spill] sm:$0xff] }
 0x244   :  { %v5921_v41 = vmul.u32.u64.low %v5897_v37, %v1856_v57  ;;  %v5922_v3 = vmul.u32.u64.high %v5897_v37, %v1856_v57, %v5921_v41  ;;  %vm2112_vm15 = vcmp.lt.s32.totalorder %v5902_v39, 2  ;;  %vm5928_vm0 = vcmp.le.f32.partialorder %v1705_v9, 0.7853982 }
 0x245   :  { %v3915_v17 = vadd.s32 4294967294, %v1773_v50  ;;  %v2332_v6 = vand.u32 2139095040, %v5865_v60  ;;  %vm2113_vm1 = vcmp.eq.s32.totalorder %v5902_v39, 0  ;;  %vm2116_vm2 = vcmp.eq.s32.totalorder %v5902_v39, 2 }
 0x246   :  { %v1761_v38 = vadd.s32 %v5854_v62, %v5851_v25  ;;  %v1867_v15 = vadd.s32 1, %v5914_v35  ;;  %v1794_v9 = vsel %vm5928_vm0, 0, %v1792_v23  ;;  %v1864_v36 = vmul.u32 %v5897_v37, %v1848_v26 }
 0x247   :  { %v4186_v14 = vpop.eup %4185  ;;  %vm3916_vm3 = vcmp.lt.s32.totalorder %v3915_v17, 0  ;;  %v2333_v30 = vshrl.u32 %v2332_v6, 23  ;;  %vm1866_vm4 = vc.u32 %v5922_v3, %v5913_v40  ;;  %v2336_v43 = vand.u32 8388607, %v2329_v44 }
 0x248   :  { %v4188_v11 = vpop.eup %4187  ;;  %v2117_v10 = vxor.u32 2147483648, %v4186_v14  ;;  %v1776_v46 = vsel %vm3916_vm3, 0, %v3915_v17  ;;  %v2436_v8 = vand.u32 2139095040, %v5868_v31  ;;  %v1868_v21 = vsel %vm1866_vm4, %v1867_v15, %v5914_v35 }
 0x249   :  { %v2114_v1 = vxor.u32 2147483648, %v4188_v11  ;;  %v1777_v25 = vsub.s32 32, %v1776_v46  ;;  %v1781_v62 = vsub.s32 4294967266, %v1776_v46  ;;  %v1778_v16 = vshll.u32 %v5905_v32, %v1776_v46 }
 0x24a   :  { %v2118_v54 = vsel %vm2116_vm2, %v2117_v10, %v4188_v11  ;;  %v3937_v12 = vadd.s32 4294967169, %v2333_v30  ;;  %v1869_v4 = vadd.s32 %v1868_v21, %v1864_v36  ;;  %v1798_v27 = vadd.s32 3, %v1794_v9 }
 0x24b   :  { %v2115_v2 = vsel %vm2113_vm1, %v4186_v14, %v2114_v1  ;;  %v1779_v33 = vshrl.u32 %v1761_v38, %v1777_v25  ;;  %v1782_v37 = vadd.s32 127, %v1781_v62  ;;  %v409_v20 = vadd.f32 %v356_v56, %v7288_v63 }
 0x24c   :  { %v2119_v59 = vsel %vm2112_vm15, %v2115_v2, %v2118_v54  ;;  %v2339_v29 = vadd.s32 1, %v3937_v12  ;;  %v1870_v58 = vadd.s32 536870912, %v1869_v4  ;;  %v2337_v49 = vor.u32 8388608, %v2336_v43 }
 0x24d   :  { %v2120_v28 = vsel %vm2109_vm14, nan, %v2119_v59  ;;  %v1780_v32 = vor.u32 %v1779_v33, %v1778_v16  ;;  %v1783_v53 = vshll.u32 %v1782_v37, 23  ;;  %v2437_v22 = vshrl.u32 %v2436_v8, 23 }
 0x24e   :  { %3800 = vst [vmem:[#allocation2 + $0x78] sm:$0xff] %v2120_v28  ;;  %vm2340_vm5 = vcmp.gt.s32.totalorder %v2339_v29, 0  ;;  %v1871_v52 = vshrl.u32 %v1870_v58, 30  ;;  %v5956_v61 = vand.u32 3, %v1798_v27  ;;  %vm1811_vm6 = vcmp.lt.s32.totalorder %v5704_v24, 0  ;;  %v7290_v27 = vld [vmem:[#allocation18_spill] sm:$0xff] }
 0x24f   :  { %v1784_v34 = vor.u32 4788187, %v1783_v53  ;;  %v2341_v7 = vsel %vm2340_vm5, %v2339_v29, 0  ;;  %v1787_v57 = vcvt.s32.f32 %v1780_v32  ;;  %v5960_v50 = vadd.f32 %v409_v20, %v7289_v18 }
 0x250   :  { %v2343_v39 = vand.u32 31, %v2341_v7  ;;  %v1872_v35 = vshll.u32 %v1871_v52, 30  ;;  %v5963_v23 = vadd.s32 %v5913_v40, %v5922_v3  ;;  %v5965_v41 = vshll.u32 %v2337_v49, 8 }
 0x251   :  { %v1785_v5 = vand.u32 2147483647, %v1784_v34  ;;  %v2433_v17 = vand.u32 2147483647, %v5868_v31  ;;  %v2342_v15 = vshrl.u32 %v2341_v7, 5  ;;  %v3941_v14 = vadd.s32 4294967169, %v2437_v22 }
 0x252   :  { %v2344_v26 = vsub.s32 32, %v2343_v39  ;;  %v5968_v38 = vsub.s32 %v1869_v4, %v1872_v35  ;;  %v1895_v9 = vsub.s32 4, %v1871_v52  ;;  %v2346_v36 = vshll.u32 %v7237_v0, %v2343_v39 }
 0x253   :  { %v1788_v6 = vmul.f32 %v1787_v57, %v1785_v5  ;;  %v2349_v3 = vshll.u32 %v7238_v51, %v2343_v39  ;;  %v2352_v1 = vshll.u32 %v7239_v47, %v2343_v39  ;;  %v2355_v25 = vshll.u32 %v7240_v19, %v2343_v39 }
 0x254   :  { %v2347_v30 = vshrl.u32 %v7238_v51, %v2344_v26  ;;  %v2350_v11 = vshrl.u32 %v7239_v47, %v2344_v26  ;;  %v1875_v40 = vsub.s32 0, %v5968_v38  ;;  %v2353_v46 = vshrl.u32 %v7240_v19, %v2344_v26 }
 0x255   :  { %v1789_v10 = vxor.u32 2147483648, %v1788_v6  ;;  %v2356_v62 = vshrl.u32 %v7241_v55, %v2344_v26  ;;  %v2358_v21 = vshll.u32 %v7241_v55, %v2343_v39  ;;  %v2359_v37 = vshrl.u32 %v7245_v45, %v2344_v26 }
 0x256   :  { %v2348_v43 = vor.u32 %v2347_v30, %v2346_v36  ;;  %v3918_v54 = vmin.u32 %v1875_v40, %v5968_v38  ;;  %v2351_v16 = vor.u32 %v2350_v11, %v2349_v3  ;;  %v2354_v2 = vor.u32 %v2353_v46, %v2352_v1  ;;  %v7293_v46 = vld [vmem:[#allocation12_spill] sm:$0xff] }
 0x257   :  { %v1790_v8 = vsel %vm1707_vm13, %v1789_v10, %v1788_v6  ;;  %v2357_v33 = vor.u32 %v2356_v62, %v2355_v25  ;;  %v2443_v59 = vadd.s32 1, %v3941_v14  ;;  %v410_v29 = vadd.f32 %v356_v56, %v7290_v27 }
 0x258   :  { %v1793_v12 = vsel %vm5928_vm0, %v5644_v42, %v1790_v8  ;;  %v1877_v4 = vclz %v3918_v54  ;;  %vm5990_vm7 = vcmp.le.f32.partialorder %v1809_v13, 0.7853982  ;;  %v1896_v48 = vsel %vm1811_vm6, %v1895_v9, %v1871_v52 }
 0x259   :  { %4189 = vcosq.f32 %v1793_v12  ;;  %v2345_v20 = vshrl.u32 %v7237_v0, %v2344_v26  ;;  %v2360_v28 = vor.u32 %v2359_v37, %v2358_v21  ;;  %vm2361_vm8 = vcmp.lt.s32.totalorder %v2342_v15, 1 }
 0x25a   :  { %4191 = vsinq.f32 %v1793_v12  ;;  %v3919_v32 = vadd.s32 4294967294, %v1877_v4  ;;  %vm2363_vm9 = vcmp.lt.s32.totalorder %v2342_v15, 3  ;;  %vm2364_vm10 = vcmp.lt.s32.totalorder %v2342_v15, 4 }
 0x25b   :  { %v2366_v53 = vsel %vm2364_vm10, %v2354_v2, 2102212464  ;;  %v2369_v58 = vsel %vm2361_vm8, %v2348_v43, %v2351_v16  ;;  %v2370_v56 = vsel %vm2364_vm10, %v2357_v33, 920167782  ;;  %v2373_v49 = vsel %vm2361_vm8, %v2351_v16, %v2354_v2 }
 0x25c   :  { %vm3920_vm11 = vcmp.lt.s32.totalorder %v3919_v32, 0  ;;  %vm2362_vm12 = vcmp.lt.s32.totalorder %v2342_v15, 2  ;;  %v2371_v13 = vsel %vm2363_vm9, %v2354_v2, %v2370_v56  ;;  %v2374_v34 = vsel %vm2364_vm10, %v2360_v28, 1326507024 }
 0x25d   :  { %vm1801_vm13 = vcmp.eq.s32.totalorder %v5956_v61, 0  ;;  %v1880_v7 = vsel %vm3920_vm11, 0, %v3919_v32  ;;  %v2365_v52 = vsel %vm2361_vm8, %v2345_v20, %v2348_v43  ;;  %v2372_v22 = vsel %vm2362_vm12, %v2369_v58, %v2371_v13 }
 0x25e   :  { %v2375_v39 = vsel %vm2363_vm9, %v2357_v33, %v2374_v34  ;;  %vm1800_vm14 = vcmp.lt.s32.totalorder %v5956_v61, 2  ;;  %v1881_v5 = vsub.s32 32, %v1880_v7  ;;  %v1885_v57 = vsub.s32 4294967266, %v1880_v7 }
 0x25f   :  { %v2367_v35 = vsel %vm2363_vm9, %v2351_v16, %v2366_v53  ;;  %v2376_v18 = vsel %vm2362_vm12, %v2373_v49, %v2375_v39  ;;  %vm1797_vm15 = vweird.f32 %v5644_v42  ;;  %v1882_v36 = vshll.u32 %v5968_v38, %v1880_v7 }
 0x260   :  { %v6006_v26 = vmul.u32.u64.low %v5965_v41, %v2376_v18  ;;  %v6007_v6 = vmul.u32.u64.high %v5965_v41, %v2376_v18, %v6006_v26  ;;  %v6010_v14 = vmul.u32.u64.low %v5965_v41, %v2372_v22  ;;  %v6011_v9 = vmul.u32.u64.high %v5965_v41, %v2372_v22, %v6010_v14 }
 0x261   :  { %v1883_v30 = vshrl.u32 %v5963_v23, %v1881_v5  ;;  %v1886_v11 = vadd.s32 127, %v1885_v57  ;;  %vm2444_vm0 = vcmp.gt.s32.totalorder %v2443_v59, 0  ;;  %v2368_v10 = vsel %vm2362_vm12, %v2365_v52, %v2367_v35 }
 0x262   :  { %v2440_v40 = vand.u32 8388607, %v2433_v17  ;;  %v2445_v3 = vsel %vm2444_vm0, %v2443_v59, 0  ;;  %v6020_v43 = vadd.f32 %v410_v29, %v7293_v46  ;;  %v1898_v8 = vsel %vm5990_vm7, 0, %v1896_v48 }
 0x263   :  { %v4190_v1 = vpop.eup %4189  ;;  %v1884_v25 = vor.u32 %v1883_v30, %v1882_v36  ;;  %v1887_v62 = vshll.u32 %v1886_v11, 23  ;;  %v2447_v38 = vand.u32 31, %v2445_v3  ;;  %vm1804_vm1 = vcmp.eq.s32.totalorder %v5956_v61, 2 }
 0x264   :  { %v4192_v54 = vpop.eup %4191  ;;  %v1805_v23 = vxor.u32 2147483648, %v4190_v1  ;;  %vm2386_vm2 = vc.u32 %v6007_v6, %v6010_v14  ;;  %v2387_v15 = vadd.s32 1, %v6011_v9  ;;  %v2384_v12 = vmul.u32 %v5965_v41, %v2368_v10 }
 0x265   :  { %v1802_v16 = vxor.u32 2147483648, %v4192_v54  ;;  %v1888_v21 = vor.u32 4788187, %v1887_v62  ;;  %v2448_v2 = vsub.s32 32, %v2447_v38  ;;  %v1902_v37 = vadd.s32 3, %v1898_v8 }
 0x266   :  { %v1806_v33 = vsel %vm1804_vm1, %v1805_v23, %v4192_v54  ;;  %v2388_v4 = vsel %vm2386_vm2, %v2387_v15, %v6011_v9  ;;  %v2441_v59 = vor.u32 8388608, %v2440_v40  ;;  %v1891_v48 = vcvt.s32.f32 %v1884_v25 }
 0x267   :  { %v1803_v27 = vsel %vm1801_vm13, %v4190_v1, %v1802_v16  ;;  %v1889_v29 = vand.u32 2147483647, %v1888_v21  ;;  %v2389_v20 = vadd.s32 %v2388_v4, %v2384_v12  ;;  %v2450_v32 = vshll.u32 %v7237_v0, %v2447_v38 }
 0x268   :  { %v1807_v28 = vsel %vm1800_vm14, %v1803_v27, %v1806_v33  ;;  %v2451_v53 = vshrl.u32 %v7238_v51, %v2448_v2  ;;  %v2454_v41 = vshrl.u32 %v7239_v47, %v2448_v2  ;;  %v2457_v13 = vshrl.u32 %v7240_v19, %v2448_v2 }
 0x269   :  { %v1808_v58 = vsel %vm1797_vm15, nan, %v1807_v28  ;;  %v1892_v56 = vmul.f32 %v1891_v48, %v1889_v29  ;;  %v2390_v49 = vadd.s32 536870912, %v2389_v20  ;;  %v2446_v34 = vshrl.u32 %v2445_v3, 5 }
 0x26a   :  { %3797 = vst [vmem:[#allocation2 + $0x60] sm:$0xff] %v1808_v58  ;;  %v2453_v7 = vshll.u32 %v7238_v51, %v2447_v38  ;;  %v2456_v61 = vshll.u32 %v7239_v47, %v2447_v38  ;;  %v2460_v52 = vshrl.u32 %v7241_v55, %v2448_v2  ;;  %v2452_v5 = vor.u32 %v2451_v53, %v2450_v32 }
 0x26b   :  { %v1893_v22 = vxor.u32 2147483648, %v1892_v56  ;;  %v2391_v39 = vshrl.u32 %v2390_v49, 30  ;;  %v2459_v57 = vshll.u32 %v7240_v19, %v2447_v38  ;;  %v2462_v18 = vshll.u32 %v7241_v55, %v2447_v38 }
 0x26c   :  { %v2455_v35 = vor.u32 %v2454_v41, %v2453_v7  ;;  %v2458_v42 = vor.u32 %v2457_v13, %v2456_v61  ;;  %v2463_v26 = vshrl.u32 %v7245_v45, %v2448_v2  ;;  %v6048_v36 = vand.u32 3, %v1902_v37 }
 0x26d   :  { %v1894_v9 = vsel %vm1811_vm6, %v1893_v22, %v1892_v56  ;;  %v2392_v30 = vshll.u32 %v2391_v39, 30  ;;  %v2461_v11 = vor.u32 %v2460_v52, %v2459_v57  ;;  %v2449_v40 = vshrl.u32 %v7237_v0, %v2448_v2 }
 0x26e   :  { %v1897_v10 = vsel %vm5990_vm7, %v5704_v24, %v1894_v9  ;;  %v2464_v3 = vor.u32 %v2463_v26, %v2462_v18  ;;  %v2481_v46 = vshll.u32 %v2441_v59, 8  ;;  %vm2465_vm3 = vcmp.lt.s32.totalorder %v2446_v34, 1 }
 0x26f   :  { %4193 = vcosq.f32 %v1897_v10  ;;  %v6054_v1 = vsub.s32 %v2389_v20, %v2392_v30  ;;  %vm2468_vm4 = vcmp.lt.s32.totalorder %v2446_v34, 4  ;;  %vm2466_vm5 = vcmp.lt.s32.totalorder %v2446_v34, 2 }
 0x270   :  { %4195 = vsinq.f32 %v1897_v10  ;;  %v2470_v25 = vsel %vm2468_vm4, %v2458_v42, 2102212464  ;;  %v2473_v62 = vsel %vm2465_vm3, %v2452_v5, %v2455_v35  ;;  %v2415_v38 = vsub.s32 4, %v2391_v39 }
 0x271   :  { %v2395_v8 = vsub.s32 0, %v6054_v1  ;;  %vm2467_vm6 = vcmp.lt.s32.totalorder %v2446_v34, 3  ;;  %v2474_v54 = vsel %vm2468_vm4, %v2461_v11, 920167782  ;;  %v2469_v63 = vsel %vm2465_vm3, %v2449_v40, %v2452_v5 }
 0x272   :  { %v2475_v23 = vsel %vm2467_vm6, %v2458_v42, %v2474_v54  ;;  %v2477_v15 = vsel %vm2465_vm3, %v2455_v35, %v2458_v42  ;;  %v2478_v16 = vsel %vm2468_vm4, %v2464_v3, 1326507024  ;;  %v2471_v12 = vsel %vm2467_vm6, %v2455_v35, %v2470_v25 }
 0x273   :  { %v3938_v21 = vmin.u32 %v2395_v8, %v6054_v1  ;;  %v2476_v2 = vsel %vm2466_vm5, %v2473_v62, %v2475_v23  ;;  %v2479_v33 = vsel %vm2467_vm6, %v2461_v11, %v2478_v16  ;;  %vm2331_vm7 = vcmp.lt.s32.totalorder %v5865_v60, 0 }
 0x274   :  { %v2480_v37 = vsel %vm2466_vm5, %v2477_v15, %v2479_v33  ;;  %v6061_v4 = vmul.u32.u64.low %v2481_v46, %v2476_v2  ;;  %v6062_v59 = vmul.u32.u64.high %v2481_v46, %v2476_v2, %v6061_v4  ;;  %v2416_v29 = vsel %vm2331_vm7, %v2415_v38, %v2391_v39 }
 0x275   :  { %v2397_v27 = vclz %v3938_v21  ;;  %vm1901_vm8 = vweird.f32 %v5704_v24  ;;  %v2472_v48 = vsel %vm2466_vm5, %v2469_v63, %v2471_v12  ;;  %v2124_v32 = vand.u32 2139095040, %v5960_v50 }
 0x276   :  { %v6068_v20 = vmul.u32.u64.low %v2481_v46, %v2480_v37  ;;  %v6069_v28 = vmul.u32.u64.high %v2481_v46, %v2480_v37, %v6068_v20  ;;  %vm1904_vm9 = vcmp.lt.s32.totalorder %v6048_v36, 2  ;;  %vm6075_vm10 = vcmp.le.f32.partialorder %v2329_v44, 0.7853982 }
 0x277   :  { %v3939_v41 = vadd.s32 4294967294, %v2397_v27  ;;  %v2121_v58 = vand.u32 2147483647, %v5960_v50  ;;  %vm1905_vm11 = vcmp.eq.s32.totalorder %v6048_v36, 0  ;;  %vm1908_vm12 = vcmp.eq.s32.totalorder %v6048_v36, 2 }
 0x278   :  { %v2491_v56 = vadd.s32 1, %v6062_v59  ;;  %v2125_v49 = vshrl.u32 %v2124_v32, 23  ;;  %v2385_v34 = vadd.s32 %v6010_v14, %v6007_v6  ;;  %v2418_v44 = vsel %vm6075_vm10, 0, %v2416_v29 }
 0x279   :  { %v4194_v13 = vpop.eup %4193  ;;  %vm3940_vm13 = vcmp.lt.s32.totalorder %v3939_v41, 0  ;;  %v2488_v7 = vmul.u32 %v2481_v46, %v2472_v48  ;;  %vm2490_vm14 = vc.u32 %v6069_v28, %v6061_v4  ;;  %v2228_v39 = vand.u32 2139095040, %v6020_v43 }
 0x27a   :  { %v4196_v61 = vpop.eup %4195  ;;  %v1909_v52 = vxor.u32 2147483648, %v4194_v13  ;;  %v2400_v22 = vsel %vm3940_vm13, 0, %v3939_v41  ;;  %v2128_v42 = vand.u32 8388607, %v2121_v58  ;;  %v2492_v18 = vsel %vm2490_vm14, %v2491_v56, %v6062_v59 }
 0x27b   :  { %v1906_v5 = vxor.u32 2147483648, %v4196_v61  ;;  %v2401_v57 = vsub.s32 32, %v2400_v22  ;;  %v2405_v35 = vsub.s32 4294967266, %v2400_v22  ;;  %v2402_v14 = vshll.u32 %v6054_v1, %v2400_v22 }
 0x27c   :  { %v1910_v6 = vsel %vm1908_vm12, %v1909_v52, %v4196_v61  ;;  %v3929_v26 = vadd.s32 4294967169, %v2125_v49  ;;  %v2493_v10 = vadd.s32 %v2492_v18, %v2488_v7  ;;  %v2422_v3 = vadd.s32 3, %v2418_v44 }
 0x27d   :  { %v1907_v9 = vsel %vm1905_vm11, %v4194_v13, %v1906_v5  ;;  %v2403_v30 = vshrl.u32 %v2385_v34, %v2401_v57  ;;  %v2406_v11 = vadd.s32 127, %v2405_v35  ;;  %v2229_v25 = vshrl.u32 %v2228_v39, 23  ;;  %v371_v5 = vpop.permute.xlu1 %370 }
 0x27e   :  { %v1911_v40 = vsel %vm1904_vm9, %v1907_v9, %v1910_v6  ;;  %v2131_v46 = vadd.s32 1, %v3929_v26  ;;  %v2494_v38 = vadd.s32 536870912, %v2493_v10  ;;  %v2129_v54 = vor.u32 8388608, %v2128_v42 }
 0x27f   :  { %v1912_v62 = vsel %vm1901_vm8, nan, %v1911_v40  ;;  %v2404_v8 = vor.u32 %v2403_v30, %v2402_v14  ;;  %v2407_v1 = vshll.u32 %v2406_v11, 23  ;;  %v2225_v63 = vand.u32 2147483647, %v6020_v43  ;;  %v7296_v11 = vld [vmem:[#allocation19_spill] sm:$0xff]  ;;  %v7297_v40 = vld [vmem:[#allocation20_spill] sm:$0xff] }
 0x280   :  { %3798 = vst [vmem:[#allocation2 + $0x68] sm:$0xff] %v1912_v62  ;;  %vm2132_vm15 = vcmp.gt.s32.totalorder %v2131_v46, 0  ;;  %v2495_v15 = vshrl.u32 %v2494_v38, 30  ;;  %v3933_v21 = vadd.s32 4294967169, %v2229_v25  ;;  %v6102_v33 = vand.u32 3, %v2422_v3 }
 0x281   :  { %v2408_v23 = vor.u32 4788187, %v2407_v1  ;;  %v2133_v16 = vsel %vm2132_vm15, %v2131_v46, 0  ;;  %v2411_v2 = vcvt.s32.f32 %v2404_v8  ;;  %vm2435_vm0 = vcmp.lt.s32.totalorder %v5868_v31, 0 }
 0x282   :  { %v2135_v36 = vand.u32 31, %v2133_v16  ;;  %v2496_v24 = vshll.u32 %v2495_v15, 30  ;;  %v6106_v37 = vadd.s32 %v6061_v4, %v6069_v28  ;;  %v6108_v27 = vshll.u32 %v2129_v54, 8 }
 0x283   :  { %v2409_v12 = vand.u32 2147483647, %v2408_v23  ;;  %v6112_v29 = vand.u32 8388607, %v2225_v63  ;;  %v6116_v32 = vshrl.u32 %v2133_v16, 5  ;;  %v6118_v41 = vadd.s32 1, %v3933_v21 }
 0x284   :  { %v2136_v59 = vsub.s32 32, %v2135_v36  ;;  %v6114_v20 = vsub.s32 %v2493_v10, %v2496_v24  ;;  %v2519_v56 = vsub.s32 4, %v2495_v15  ;;  %v2138_v49 = vshll.u32 %v7237_v0, %v2135_v36 }
 0x285   :  { %v2412_v48 = vmul.f32 %v2411_v2, %v2409_v12  ;;  %v2141_v44 = vshll.u32 %v7238_v51, %v2135_v36  ;;  %v2144_v52 = vshll.u32 %v7239_v47, %v2135_v36  ;;  %v2147_v22 = vshll.u32 %v7240_v19, %v2135_v36 }
 0x286   :  { %v2139_v4 = vshrl.u32 %v7238_v51, %v2136_v59  ;;  %v2142_v28 = vshrl.u32 %v7239_v47, %v2136_v59  ;;  %v2499_v34 = vsub.s32 0, %v6114_v20  ;;  %v2145_v7 = vshrl.u32 %v7240_v19, %v2136_v59 }
 0x287   :  { %v2413_v13 = vxor.u32 2147483648, %v2412_v48  ;;  %v2148_v39 = vshrl.u32 %v7241_v55, %v2136_v59  ;;  %v2150_v6 = vshll.u32 %v7241_v55, %v2135_v36  ;;  %v2151_v9 = vshrl.u32 %v7245_v45, %v2136_v59 }
 0x288   :  { %v2140_v61 = vor.u32 %v2139_v4, %v2138_v49  ;;  %v3942_v35 = vmin.u32 %v2499_v34, %v6114_v20  ;;  %v2143_v42 = vor.u32 %v2142_v28, %v2141_v44  ;;  %v2146_v18 = vor.u32 %v2145_v7, %v2144_v52  ;;  %v7300_v52 = vld [vmem:[#allocation31_spill] sm:$0xff] }
 0x289   :  { %v2414_v57 = vsel %vm2331_vm7, %v2413_v13, %v2412_v48  ;;  %v2149_v26 = vor.u32 %v2148_v39, %v2147_v22  ;;  %v415_v10 = vadd.f32 %v371_v5, %v7296_v11  ;;  %v416_v3 = vadd.f32 %v371_v5, %v7297_v40  ;;  %v7301_v39 = vld [vmem:[#allocation32_spill] sm:$0xff] }
 0x28a   :  { %v2417_v14 = vsel %vm6075_vm10, %v5865_v60, %v2414_v57  ;;  %v2501_v30 = vclz %v3942_v35  ;;  %vm6141_vm1 = vcmp.le.f32.partialorder %v2433_v17, 0.7853982  ;;  %v2520_v53 = vsel %vm2435_vm0, %v2519_v56, %v2495_v15 }
 0x28b   :  { %4197 = vcosq.f32 %v2417_v14  ;;  %v2137_v25 = vshrl.u32 %v7237_v0, %v2136_v59  ;;  %v2152_v62 = vor.u32 %v2151_v9, %v2150_v6  ;;  %vm2153_vm2 = vcmp.lt.s32.totalorder %v6116_v32, 1 }
 0x28c   :  { %4199 = vsinq.f32 %v2417_v14  ;;  %v3943_v8 = vadd.s32 4294967294, %v2501_v30  ;;  %vm2155_vm3 = vcmp.lt.s32.totalorder %v6116_v32, 3  ;;  %vm2156_vm4 = vcmp.lt.s32.totalorder %v6116_v32, 4 }
 0x28d   :  { %v2158_v1 = vsel %vm2156_vm4, %v2146_v18, 2102212464  ;;  %v2161_v38 = vsel %vm2153_vm2, %v2140_v61, %v2143_v42  ;;  %v2162_v54 = vsel %vm2156_vm4, %v2149_v26, 920167782  ;;  %v2165_v17 = vsel %vm2153_vm2, %v2143_v42, %v2146_v18 }
 0x28e   :  { %vm3944_vm5 = vcmp.lt.s32.totalorder %v3943_v8, 0  ;;  %vm2154_vm6 = vcmp.lt.s32.totalorder %v6116_v32, 2  ;;  %v2163_v23 = vsel %vm2155_vm3, %v2146_v18, %v2162_v54  ;;  %v2166_v15 = vsel %vm2156_vm4, %v2152_v62, 1326507024 }
 0x28f   :  { %vm2425_vm7 = vcmp.eq.s32.totalorder %v6102_v33, 0  ;;  %v2504_v16 = vsel %vm3944_vm5, 0, %v3943_v8  ;;  %v2157_v21 = vsel %vm2153_vm2, %v2137_v25, %v2140_v61  ;;  %v2164_v36 = vsel %vm2154_vm6, %v2161_v38, %v2163_v23 }
 0x290   :  { %v2167_v12 = vsel %vm2155_vm3, %v2149_v26, %v2166_v15  ;;  %vm2424_vm8 = vcmp.lt.s32.totalorder %v6102_v33, 2  ;;  %v2505_v2 = vsub.s32 32, %v2504_v16  ;;  %v2509_v24 = vsub.s32 4294967266, %v2504_v16 }
 0x291   :  { %v2159_v59 = vsel %vm2155_vm3, %v2143_v42, %v2158_v1  ;;  %v2168_v48 = vsel %vm2154_vm6, %v2165_v17, %v2167_v12  ;;  %vm2421_vm9 = vweird.f32 %v5865_v60  ;;  %v2506_v13 = vshll.u32 %v6114_v20, %v2504_v16 }
 0x292   :  { %v6166_v56 = vmul.u32.u64.low %v6108_v27, %v2168_v48  ;;  %v6167_v49 = vmul.u32.u64.high %v6108_v27, %v2168_v48, %v6166_v56  ;;  %v6170_v4 = vmul.u32.u64.low %v6108_v27, %v2164_v36  ;;  %v6171_v28 = vmul.u32.u64.high %v6108_v27, %v2164_v36, %v6170_v4 }
 0x293   :  { %v2507_v34 = vshrl.u32 %v6106_v37, %v2505_v2  ;;  %v2510_v44 = vadd.s32 127, %v2509_v24  ;;  %vm2236_vm10 = vcmp.gt.s32.totalorder %v6118_v41, 0  ;;  %v2160_v7 = vsel %vm2154_vm6, %v2157_v21, %v2159_v59 }
 0x294   :  { %v2237_v61 = vsel %vm2236_vm10, %v6118_v41, 0  ;;  %v6181_v22 = vadd.f32 %v415_v10, %v7300_v52  ;;  %v6184_v5 = vadd.f32 %v416_v3, %v7301_v39  ;;  %v2522_v37 = vsel %vm6141_vm1, 0, %v2520_v53 }
 0x295   :  { %v4198_v57 = vpop.eup %4197  ;;  %v2508_v35 = vor.u32 %v2507_v34, %v2506_v13  ;;  %v2511_v42 = vshll.u32 %v2510_v44, 23  ;;  %v2239_v20 = vand.u32 31, %v2237_v61  ;;  %vm2428_vm11 = vcmp.eq.s32.totalorder %v6102_v33, 2 }
 0x296   :  { %v4200_v6 = vpop.eup %4199  ;;  %v2429_v32 = vxor.u32 2147483648, %v4198_v57  ;;  %vm2178_vm12 = vc.u32 %v6167_v49, %v6170_v4  ;;  %v2179_v41 = vadd.s32 1, %v6171_v28  ;;  %v2176_v26 = vmul.u32 %v6108_v27, %v2160_v7 }
 0x297   :  { %v2426_v14 = vxor.u32 2147483648, %v4200_v6  ;;  %v2512_v18 = vor.u32 4788187, %v2511_v42  ;;  %v2240_v9 = vsub.s32 32, %v2239_v20  ;;  %v2526_v11 = vadd.s32 3, %v2522_v37 }
 0x298   :  { %v2430_v30 = vsel %vm2428_vm11, %v2429_v32, %v4200_v6  ;;  %v2180_v10 = vsel %vm2178_vm12, %v2179_v41, %v6171_v28  ;;  %v2233_v40 = vor.u32 8388608, %v6112_v29  ;;  %v2515_v25 = vcvt.s32.f32 %v2508_v35 }
 0x299   :  { %v2427_v3 = vsel %vm2425_vm7, %v4198_v57, %v2426_v14  ;;  %v2513_v53 = vand.u32 2147483647, %v2512_v18  ;;  %v2181_v62 = vadd.s32 %v2180_v10, %v2176_v26  ;;  %v2242_v1 = vshll.u32 %v7237_v0, %v2239_v20 }
 0x29a   :  { %v2431_v8 = vsel %vm2424_vm8, %v2427_v3, %v2430_v30  ;;  %v2243_v27 = vshrl.u32 %v7238_v51, %v2240_v9  ;;  %v2246_v38 = vshrl.u32 %v7239_v47, %v2240_v9  ;;  %v2249_v23 = vshrl.u32 %v7240_v19, %v2240_v9 }
 0x29b   :  { %v2432_v54 = vsel %vm2421_vm9, nan, %v2431_v8  ;;  %v2516_v17 = vmul.f32 %v2515_v25, %v2513_v53  ;;  %v2182_v29 = vadd.s32 536870912, %v2181_v62  ;;  %v2238_v15 = vshrl.u32 %v2237_v61, 5 }
 0x29c   :  { %3803 = vst [vmem:[#allocation2 + $0x90] sm:$0xff] %v2432_v54  ;;  %v2245_v16 = vshll.u32 %v7238_v51, %v2239_v20  ;;  %v2248_v33 = vshll.u32 %v7239_v47, %v2239_v20  ;;  %v2252_v21 = vshrl.u32 %v7241_v55, %v2240_v9  ;;  %v2244_v2 = vor.u32 %v2243_v27, %v2242_v1 }
 0x29d   :  { %v2517_v36 = vxor.u32 2147483648, %v2516_v17  ;;  %v2183_v12 = vshrl.u32 %v2182_v29, 30  ;;  %v2251_v24 = vshll.u32 %v7240_v19, %v2239_v20  ;;  %v2254_v48 = vshll.u32 %v7241_v55, %v2239_v20 }
 0x29e   :  { %v2247_v59 = vor.u32 %v2246_v38, %v2245_v16  ;;  %v2250_v60 = vor.u32 %v2249_v23, %v2248_v33  ;;  %v2255_v56 = vshrl.u32 %v7245_v45, %v2240_v9  ;;  %v6213_v44 = vshll.u32 %v2233_v40, 8 }
 0x29f   :  { %v2518_v28 = vsel %vm2435_vm0, %v2517_v36, %v2516_v17  ;;  %v2184_v13 = vshll.u32 %v2183_v12, 30  ;;  %v2253_v34 = vor.u32 %v2252_v21, %v2251_v24  ;;  %v6218_v61 = vand.u32 3, %v2526_v11 }
 0x2a0   :  { %v2521_v7 = vsel %vm6141_vm1, %v5868_v31, %v2518_v28  ;;  %v2241_v52 = vshrl.u32 %v7237_v0, %v2240_v9  ;;  %v2256_v39 = vor.u32 %v2255_v56, %v2254_v48  ;;  %vm2257_vm13 = vcmp.lt.s32.totalorder %v2238_v15, 1 }
 0x2a1   :  { %4201 = vcosq.f32 %v2521_v7  ;;  %v6221_v57 = vsub.s32 %v2181_v62, %v2184_v13  ;;  %vm2260_vm14 = vcmp.lt.s32.totalorder %v2238_v15, 4  ;;  %vm2258_vm15 = vcmp.lt.s32.totalorder %v2238_v15, 2 }
 0x2a2   :  { %4203 = vsinq.f32 %v2521_v7  ;;  %v2262_v35 = vsel %vm2260_vm14, %v2250_v60, 2102212464  ;;  %v2265_v42 = vsel %vm2257_vm13, %v2244_v2, %v2247_v59  ;;  %v2207_v20 = vsub.s32 4, %v2183_v12 }
 0x2a3   :  { %v2187_v37 = vsub.s32 0, %v6221_v57  ;;  %vm2259_vm0 = vcmp.lt.s32.totalorder %v2238_v15, 3  ;;  %v2266_v46 = vsel %vm2260_vm14, %v2253_v34, 920167782  ;;  %v2261_v6 = vsel %vm2257_vm13, %v2241_v52, %v2244_v2 }
 0x2a4   :  { %v2267_v32 = vsel %vm2259_vm0, %v2250_v60, %v2266_v46  ;;  %v2269_v41 = vsel %vm2257_vm13, %v2247_v59, %v2250_v60  ;;  %v2270_v14 = vsel %vm2260_vm14, %v2256_v39, 1326507024  ;;  %v2263_v26 = vsel %vm2259_vm0, %v2247_v59, %v2262_v35  ;;  %v366_v59 = vpop.permute.xlu0 %365 }
 0x2a5   :  { %v3930_v18 = vmin.u32 %v2187_v37, %v6221_v57  ;;  %v2268_v9 = vsel %vm2258_vm15, %v2265_v42, %v2267_v32  ;;  %v2271_v30 = vsel %vm2259_vm0, %v2253_v34, %v2270_v14  ;;  %vm2123_vm1 = vcmp.lt.s32.totalorder %v5960_v50, 0  ;;  %v7304_v42 = vld [vmem:[#allocation21_spill] sm:$0xff] }
 0x2a6   :  { %v2272_v11 = vsel %vm2258_vm15, %v2269_v41, %v2271_v30  ;;  %v6229_v10 = vmul.u32.u64.low %v6213_v44, %v2268_v9  ;;  %v6230_v40 = vmul.u32.u64.high %v6213_v44, %v2268_v9, %v6229_v10  ;;  %v2208_v53 = vsel %vm2123_vm1, %v2207_v20, %v2183_v12 }
 0x2a7   :  { %v2189_v3 = vclz %v3930_v18  ;;  %vm2525_vm2 = vweird.f32 %v5868_v31  ;;  %v2264_v25 = vsel %vm2258_vm15, %v2261_v6, %v2263_v26  ;;  %v2745_v1 = vand.u32 2147483647, %v6181_v22  ;;  %v7305_v31 = vld [vmem:[#allocation33_spill] sm:$0xff] }
 0x2a8   :  { %v6237_v62 = vmul.u32.u64.low %v6213_v44, %v2272_v11  ;;  %v6238_v8 = vmul.u32.u64.high %v6213_v44, %v2272_v11, %v6237_v62  ;;  %vm2528_vm3 = vcmp.lt.s32.totalorder %v6218_v61, 2  ;;  %vm6244_vm4 = vcmp.le.f32.partialorder %v2121_v58, 0.7853982 }
 0x2a9   :  { %v3931_v38 = vadd.s32 4294967294, %v2189_v3  ;;  %v2748_v54 = vand.u32 2139095040, %v6181_v22  ;;  %vm2529_vm5 = vcmp.eq.s32.totalorder %v6218_v61, 0  ;;  %vm2532_vm6 = vcmp.eq.s32.totalorder %v6218_v61, 2 }
 0x2aa   :  { %v2177_v17 = vadd.s32 %v6170_v4, %v6167_v49  ;;  %v2283_v29 = vadd.s32 1, %v6230_v40  ;;  %v2210_v58 = vsel %vm6244_vm4, 0, %v2208_v53  ;;  %v2280_v15 = vmul.u32 %v6213_v44, %v2264_v25 }
 0x2ab   :  { %v4202_v23 = vpop.eup %4201  ;;  %vm3932_vm7 = vcmp.lt.s32.totalorder %v3931_v38, 0  ;;  %v2749_v16 = vshrl.u32 %v2748_v54, 23  ;;  %vm2282_vm8 = vc.u32 %v6238_v8, %v6229_v10  ;;  %v2752_v12 = vand.u32 8388607, %v2745_v1 }
 0x2ac   :  { %v4204_v33 = vpop.eup %4203  ;;  %v2533_v21 = vxor.u32 2147483648, %v4202_v23  ;;  %v2192_v36 = vsel %vm3932_vm7, 0, %v3931_v38  ;;  %v2852_v24 = vand.u32 2139095040, %v6184_v5  ;;  %v2284_v56 = vsel %vm2282_vm8, %v2283_v29, %v6230_v40 }
 0x2ad   :  { %v2530_v2 = vxor.u32 2147483648, %v4204_v33  ;;  %v2193_v49 = vsub.s32 32, %v2192_v36  ;;  %v2197_v4 = vsub.s32 4294967266, %v2192_v36  ;;  %v2194_v48 = vshll.u32 %v6221_v57, %v2192_v36 }
 0x2ae   :  { %v2534_v60 = vsel %vm2532_vm6, %v2533_v21, %v4204_v33  ;;  %v3953_v28 = vadd.s32 4294967169, %v2749_v16  ;;  %v2285_v7 = vadd.s32 %v2284_v56, %v2280_v15  ;;  %v2214_v39 = vadd.s32 3, %v2210_v58 }
 0x2af   :  { %v2531_v13 = vsel %vm2529_vm5, %v4202_v23, %v2530_v2  ;;  %v2195_v34 = vshrl.u32 %v2177_v17, %v2193_v49  ;;  %v2198_v44 = vadd.s32 127, %v2197_v4  ;;  %v413_v37 = vadd.f32 %v366_v59, %v7304_v42 }
 0x2b0   :  { %v2535_v52 = vsel %vm2528_vm3, %v2531_v13, %v2534_v60  ;;  %v2755_v35 = vadd.s32 1, %v3953_v28  ;;  %v2286_v6 = vadd.s32 536870912, %v2285_v7  ;;  %v2753_v32 = vor.u32 8388608, %v2752_v12 }
 0x2b1   :  { %v2536_v20 = vsel %vm2525_vm2, nan, %v2535_v52  ;;  %v2196_v57 = vor.u32 %v2195_v34, %v2194_v48  ;;  %v2199_v46 = vshll.u32 %v2198_v44, 23  ;;  %v2853_v26 = vshrl.u32 %v2852_v24, 23 }
 0x2b2   :  { %3804 = vst [vmem:[#allocation2 + $0x98] sm:$0xff] %v2536_v20  ;;  %vm2756_vm9 = vcmp.gt.s32.totalorder %v2755_v35, 0  ;;  %v2287_v14 = vshrl.u32 %v2286_v6, 30  ;;  %v6272_v9 = vand.u32 3, %v2214_v39  ;;  %vm2227_vm10 = vcmp.lt.s32.totalorder %v6020_v43, 0  ;;  %v7306_v39 = vld [vmem:[#allocation22_spill] sm:$0xff] }
 0x2b3   :  { %v2200_v41 = vor.u32 4788187, %v2199_v46  ;;  %v2757_v18 = vsel %vm2756_vm9, %v2755_v35, 0  ;;  %v2203_v11 = vcvt.s32.f32 %v2196_v57  ;;  %v6276_v3 = vadd.f32 %v413_v37, %v7305_v31 }
 0x2b4   :  { %v2759_v61 = vand.u32 31, %v2757_v18  ;;  %v2288_v40 = vshll.u32 %v2287_v14, 30  ;;  %v6279_v53 = vadd.s32 %v6229_v10, %v6238_v8  ;;  %v6281_v62 = vshll.u32 %v2753_v32, 8 }
 0x2b5   :  { %v2201_v30 = vand.u32 2147483647, %v2200_v41  ;;  %v2849_v38 = vand.u32 2147483647, %v6184_v5  ;;  %v2758_v29 = vshrl.u32 %v2757_v18, 5  ;;  %v3957_v23 = vadd.s32 4294967169, %v2853_v26 }
 0x2b6   :  { %v2760_v25 = vsub.s32 32, %v2759_v61  ;;  %v6284_v17 = vsub.s32 %v2285_v7, %v2288_v40  ;;  %v2311_v58 = vsub.s32 4, %v2287_v14  ;;  %v2762_v15 = vshll.u32 %v7237_v0, %v2759_v61 }
 0x2b7   :  { %v2204_v54 = vmul.f32 %v2203_v11, %v2201_v30  ;;  %v2765_v8 = vshll.u32 %v7238_v51, %v2759_v61  ;;  %v2768_v2 = vshll.u32 %v7239_v47, %v2759_v61  ;;  %v2771_v49 = vshll.u32 %v7240_v19, %v2759_v61 }
 0x2b8   :  { %v2763_v16 = vshrl.u32 %v7238_v51, %v2760_v25  ;;  %v2766_v33 = vshrl.u32 %v7239_v47, %v2760_v25  ;;  %v2291_v10 = vsub.s32 0, %v6284_v17  ;;  %v2769_v36 = vshrl.u32 %v7240_v19, %v2760_v25 }
 0x2b9   :  { %v2205_v21 = vxor.u32 2147483648, %v2204_v54  ;;  %v2772_v4 = vshrl.u32 %v7241_v55, %v2760_v25  ;;  %v2774_v56 = vshll.u32 %v7241_v55, %v2759_v61  ;;  %v2775_v44 = vshrl.u32 %v7245_v45, %v2760_v25 }
 0x2ba   :  { %v2764_v12 = vor.u32 %v2763_v16, %v2762_v15  ;;  %v3934_v60 = vmin.u32 %v2291_v10, %v6284_v17  ;;  %v2767_v48 = vor.u32 %v2766_v33, %v2765_v8  ;;  %v2770_v13 = vor.u32 %v2769_v36, %v2768_v2  ;;  %v7309_v36 = vld [vmem:[#allocation34_spill] sm:$0xff] }
 0x2bb   :  { %v2206_v24 = vsel %vm2123_vm1, %v2205_v21, %v2204_v54  ;;  %v2773_v34 = vor.u32 %v2772_v4, %v2771_v49  ;;  %v2859_v52 = vadd.s32 1, %v3957_v23  ;;  %v414_v35 = vadd.f32 %v366_v59, %v7306_v39 }
 0x2bc   :  { %v2209_v28 = vsel %vm6244_vm4, %v5960_v50, %v2206_v24  ;;  %v2293_v7 = vclz %v3934_v60  ;;  %vm6306_vm11 = vcmp.le.f32.partialorder %v2225_v63, 0.7853982  ;;  %v2312_v27 = vsel %vm2227_vm10, %v2311_v58, %v2287_v14 }
 0x2bd   :  { %4205 = vcosq.f32 %v2209_v28  ;;  %v2761_v37 = vshrl.u32 %v7237_v0, %v2760_v25  ;;  %v2776_v20 = vor.u32 %v2775_v44, %v2774_v56  ;;  %vm2777_vm12 = vcmp.lt.s32.totalorder %v2758_v29, 1 }
 0x2be   :  { %4207 = vsinq.f32 %v2209_v28  ;;  %v3935_v57 = vadd.s32 4294967294, %v2293_v7  ;;  %vm2779_vm13 = vcmp.lt.s32.totalorder %v2758_v29, 3  ;;  %vm2780_vm14 = vcmp.lt.s32.totalorder %v2758_v29, 4 }
 0x2bf   :  { %v2782_v46 = vsel %vm2780_vm14, %v2770_v13, 2102212464  ;;  %v2785_v6 = vsel %vm2777_vm12, %v2764_v12, %v2767_v48  ;;  %v2786_v59 = vsel %vm2780_vm14, %v2773_v34, 920167782  ;;  %v2789_v32 = vsel %vm2777_vm12, %v2767_v48, %v2770_v13 }
 0x2c0   :  { %vm3936_vm15 = vcmp.lt.s32.totalorder %v3935_v57, 0  ;;  %vm2778_vm0 = vcmp.lt.s32.totalorder %v2758_v29, 2  ;;  %v2787_v63 = vsel %vm2779_vm13, %v2770_v13, %v2786_v59  ;;  %v2790_v41 = vsel %vm2780_vm14, %v2776_v20, 1326507024 }
 0x2c1   :  { %vm2217_vm1 = vcmp.eq.s32.totalorder %v6272_v9, 0  ;;  %v2296_v18 = vsel %vm3936_vm15, 0, %v3935_v57  ;;  %v2781_v14 = vsel %vm2777_vm12, %v2761_v37, %v2764_v12  ;;  %v2788_v26 = vsel %vm2778_vm0, %v2785_v6, %v2787_v63 }
 0x2c2   :  { %v2791_v61 = vsel %vm2779_vm13, %v2773_v34, %v2790_v41  ;;  %vm2216_vm2 = vcmp.lt.s32.totalorder %v6272_v9, 2  ;;  %v2297_v30 = vsub.s32 32, %v2296_v18  ;;  %v2301_v11 = vsub.s32 4294967266, %v2296_v18 }
 0x2c3   :  { %v2783_v40 = vsel %vm2779_vm13, %v2767_v48, %v2782_v46  ;;  %v2792_v31 = vsel %vm2778_vm0, %v2789_v32, %v2791_v61  ;;  %vm2213_vm3 = vweird.f32 %v5960_v50  ;;  %v2298_v15 = vshll.u32 %v6284_v17, %v2296_v18 }
 0x2c4   :  { %v6322_v25 = vmul.u32.u64.low %v6281_v62, %v2792_v31  ;;  %v6323_v54 = vmul.u32.u64.high %v6281_v62, %v2792_v31, %v6322_v25  ;;  %v6326_v23 = vmul.u32.u64.low %v6281_v62, %v2788_v26  ;;  %v6327_v58 = vmul.u32.u64.high %v6281_v62, %v2788_v26, %v6326_v23 }
 0x2c5   :  { %v2299_v16 = vshrl.u32 %v6279_v53, %v2297_v30  ;;  %v2302_v33 = vadd.s32 127, %v2301_v11  ;;  %vm2860_vm4 = vcmp.gt.s32.totalorder %v2859_v52, 0  ;;  %v2784_v21 = vsel %vm2778_vm0, %v2781_v14, %v2783_v40 }
 0x2c6   :  { %v2856_v10 = vand.u32 8388607, %v2849_v38  ;;  %v2861_v8 = vsel %vm2860_vm4, %v2859_v52, 0  ;;  %v6336_v12 = vadd.f32 %v414_v35, %v7309_v36  ;;  %v2314_v24 = vsel %vm6306_vm11, 0, %v2312_v27 }
 0x2c7   :  { %v4206_v2 = vpop.eup %4205  ;;  %v2300_v49 = vor.u32 %v2299_v16, %v2298_v15  ;;  %v2303_v4 = vshll.u32 %v2302_v33, 23  ;;  %v2863_v17 = vand.u32 31, %v2861_v8  ;;  %vm2220_vm5 = vcmp.eq.s32.totalorder %v6272_v9, 2 }
 0x2c8   :  { %v4208_v60 = vpop.eup %4207  ;;  %v2221_v53 = vxor.u32 2147483648, %v4206_v2  ;;  %vm2802_vm6 = vc.u32 %v6323_v54, %v6326_v23  ;;  %v2803_v29 = vadd.s32 1, %v6327_v58  ;;  %v2800_v28 = vmul.u32 %v6281_v62, %v2784_v21 }
 0x2c9   :  { %v2218_v48 = vxor.u32 2147483648, %v4208_v60  ;;  %v2304_v56 = vor.u32 4788187, %v2303_v4  ;;  %v2864_v13 = vsub.s32 32, %v2863_v17  ;;  %v2318_v44 = vadd.s32 3, %v2314_v24 }
 0x2ca   :  { %v2222_v34 = vsel %vm2220_vm5, %v2221_v53, %v4208_v60  ;;  %v2804_v7 = vsel %vm2802_vm6, %v2803_v29, %v6327_v58  ;;  %v2857_v52 = vor.u32 8388608, %v2856_v10  ;;  %v2307_v27 = vcvt.s32.f32 %v2300_v49 }
 0x2cb   :  { %v2219_v39 = vsel %vm2217_vm1, %v4206_v2, %v2218_v48  ;;  %v2305_v35 = vand.u32 2147483647, %v2304_v56  ;;  %v2805_v37 = vadd.s32 %v2804_v7, %v2800_v28  ;;  %v2866_v57 = vshll.u32 %v7237_v0, %v2863_v17 }
 0x2cc   :  { %v2223_v20 = vsel %vm2216_vm2, %v2219_v39, %v2222_v34  ;;  %v2867_v46 = vshrl.u32 %v7238_v51, %v2864_v13  ;;  %v2870_v62 = vshrl.u32 %v7239_v47, %v2864_v13  ;;  %v2873_v63 = vshrl.u32 %v7240_v19, %v2864_v13 }
 0x2cd   :  { %v2224_v6 = vsel %vm2213_vm3, nan, %v2223_v20  ;;  %v2308_v59 = vmul.f32 %v2307_v27, %v2305_v35  ;;  %v2806_v32 = vadd.s32 536870912, %v2805_v37  ;;  %v2862_v41 = vshrl.u32 %v2861_v8, 5 }
 0x2ce   :  { %3801 = vst [vmem:[#allocation2 + $0x80] sm:$0xff] %v2224_v6  ;;  %v2869_v18 = vshll.u32 %v7238_v51, %v2863_v17  ;;  %v2872_v9 = vshll.u32 %v7239_v47, %v2863_v17  ;;  %v2876_v14 = vshrl.u32 %v7241_v55, %v2864_v13  ;;  %v2868_v30 = vor.u32 %v2867_v46, %v2866_v57 }
 0x2cf   :  { %v2309_v26 = vxor.u32 2147483648, %v2308_v59  ;;  %v2807_v61 = vshrl.u32 %v2806_v32, 30  ;;  %v2875_v11 = vshll.u32 %v7240_v19, %v2863_v17  ;;  %v2878_v31 = vshll.u32 %v7241_v55, %v2863_v17 }
 0x2d0   :  { %v2871_v40 = vor.u32 %v2870_v62, %v2869_v18  ;;  %v2874_v50 = vor.u32 %v2873_v63, %v2872_v9  ;;  %v2879_v25 = vshrl.u32 %v7245_v45, %v2864_v13  ;;  %v6364_v15 = vand.u32 3, %v2318_v44 }
 0x2d1   :  { %v2310_v58 = vsel %vm2227_vm10, %v2309_v26, %v2308_v59  ;;  %v2808_v16 = vshll.u32 %v2807_v61, 30  ;;  %v2877_v33 = vor.u32 %v2876_v14, %v2875_v11  ;;  %v2865_v10 = vshrl.u32 %v7237_v0, %v2864_v13 }
 0x2d2   :  { %v2313_v21 = vsel %vm6306_vm11, %v6020_v43, %v2310_v58  ;;  %v2880_v8 = vor.u32 %v2879_v25, %v2878_v31  ;;  %v2897_v36 = vshll.u32 %v2857_v52, 8  ;;  %vm2881_vm7 = vcmp.lt.s32.totalorder %v2862_v41, 1 }
 0x2d3   :  { %4209 = vcosq.f32 %v2313_v21  ;;  %v6370_v2 = vsub.s32 %v2805_v37, %v2808_v16  ;;  %vm2884_vm8 = vcmp.lt.s32.totalorder %v2862_v41, 4  ;;  %vm2882_vm9 = vcmp.lt.s32.totalorder %v2862_v41, 2 }
 0x2d4   :  { %4211 = vsinq.f32 %v2313_v21  ;;  %v2886_v49 = vsel %vm2884_vm8, %v2874_v50, 2102212464  ;;  %v2889_v4 = vsel %vm2881_vm7, %v2868_v30, %v2871_v40  ;;  %v2831_v17 = vsub.s32 4, %v2807_v61 }
 0x2d5   :  { %v2811_v24 = vsub.s32 0, %v6370_v2  ;;  %vm2883_vm10 = vcmp.lt.s32.totalorder %v2862_v41, 3  ;;  %v2890_v60 = vsel %vm2884_vm8, %v2877_v33, 920167782  ;;  %v2885_v42 = vsel %vm2881_vm7, %v2865_v10, %v2868_v30 }
 0x2d6   :  { %v2891_v53 = vsel %vm2883_vm10, %v2874_v50, %v2890_v60  ;;  %v2893_v29 = vsel %vm2881_vm7, %v2871_v40, %v2874_v50  ;;  %v2894_v48 = vsel %vm2884_vm8, %v2880_v8, 1326507024  ;;  %v2887_v28 = vsel %vm2883_vm10, %v2871_v40, %v2886_v49 }
 0x2d7   :  { %v3954_v56 = vmin.u32 %v2811_v24, %v6370_v2  ;;  %v2892_v13 = vsel %vm2882_vm9, %v2889_v4, %v2891_v53  ;;  %v2895_v34 = vsel %vm2883_vm10, %v2877_v33, %v2894_v48  ;;  %vm2747_vm11 = vcmp.lt.s32.totalorder %v6181_v22, 0 }
 0x2d8   :  { %v2896_v44 = vsel %vm2882_vm9, %v2893_v29, %v2895_v34  ;;  %v6377_v7 = vmul.u32.u64.low %v2897_v36, %v2892_v13  ;;  %v6378_v52 = vmul.u32.u64.high %v2897_v36, %v2892_v13, %v6377_v7  ;;  %v2832_v35 = vsel %vm2747_vm11, %v2831_v17, %v2807_v61 }
 0x2d9   :  { %v2813_v39 = vclz %v3954_v56  ;;  %vm2317_vm12 = vweird.f32 %v6020_v43  ;;  %v2888_v27 = vsel %vm2882_vm9, %v2885_v42, %v2887_v28  ;;  %v2540_v57 = vand.u32 2139095040, %v6276_v3 }
 0x2da   :  { %v6384_v37 = vmul.u32.u64.low %v2897_v36, %v2896_v44  ;;  %v6385_v20 = vmul.u32.u64.high %v2897_v36, %v2896_v44, %v6384_v37  ;;  %vm2320_vm13 = vcmp.lt.s32.totalorder %v6364_v15, 2  ;;  %vm6391_vm14 = vcmp.le.f32.partialorder %v2745_v1, 0.7853982 }
 0x2db   :  { %v3955_v62 = vadd.s32 4294967294, %v2813_v39  ;;  %v2537_v6 = vand.u32 2147483647, %v6276_v3  ;;  %vm2321_vm15 = vcmp.eq.s32.totalorder %v6364_v15, 0  ;;  %vm2324_vm0 = vcmp.eq.s32.totalorder %v6364_v15, 2 }
 0x2dc   :  { %v2907_v59 = vadd.s32 1, %v6378_v52  ;;  %v2541_v32 = vshrl.u32 %v2540_v57, 23  ;;  %v2801_v41 = vadd.s32 %v6326_v23, %v6323_v54  ;;  %v2834_v1 = vsel %vm6391_vm14, 0, %v2832_v35 }
 0x2dd   :  { %v4210_v63 = vpop.eup %4209  ;;  %vm3956_vm1 = vcmp.lt.s32.totalorder %v3955_v62, 0  ;;  %v2904_v18 = vmul.u32 %v2897_v36, %v2888_v27  ;;  %vm2906_vm2 = vc.u32 %v6385_v20, %v6377_v7  ;;  %v2644_v61 = vand.u32 2139095040, %v6336_v12 }
 0x2de   :  { %v4212_v9 = vpop.eup %4211  ;;  %v2325_v14 = vxor.u32 2147483648, %v4210_v63  ;;  %v2816_v26 = vsel %vm3956_vm1, 0, %v3955_v62  ;;  %v2544_v50 = vand.u32 8388607, %v2537_v6  ;;  %v2908_v31 = vsel %vm2906_vm2, %v2907_v59, %v6378_v52 }
 0x2df   :  { %v2322_v30 = vxor.u32 2147483648, %v4212_v9  ;;  %v2817_v11 = vsub.s32 32, %v2816_v26  ;;  %v2821_v40 = vsub.s32 4294967266, %v2816_v26  ;;  %v2818_v23 = vshll.u32 %v6370_v2, %v2816_v26 }
 0x2e0   :  { %v2326_v54 = vsel %vm2324_vm0, %v2325_v14, %v4212_v9  ;;  %v3945_v25 = vadd.s32 4294967169, %v2541_v32  ;;  %v2909_v21 = vadd.s32 %v2908_v31, %v2904_v18  ;;  %v2838_v8 = vadd.s32 3, %v2834_v1 }
 0x2e1   :  { %v2323_v58 = vsel %vm2321_vm15, %v4210_v63, %v2322_v30  ;;  %v2819_v16 = vshrl.u32 %v2801_v41, %v2817_v11  ;;  %v2822_v33 = vadd.s32 127, %v2821_v40  ;;  %v2645_v49 = vshrl.u32 %v2644_v61, 23  ;;  %v381_v30 = vpop.permute.xlu1 %380 }
 0x2e2   :  { %v2327_v10 = vsel %vm2320_vm13, %v2323_v58, %v2326_v54  ;;  %v2547_v36 = vadd.s32 1, %v3945_v25  ;;  %v2910_v17 = vadd.s32 536870912, %v2909_v21  ;;  %v2545_v60 = vor.u32 8388608, %v2544_v50 }
 0x2e3   :  { %v2328_v4 = vsel %vm2317_vm12, nan, %v2327_v10  ;;  %v2820_v24 = vor.u32 %v2819_v16, %v2818_v23  ;;  %v2823_v2 = vshll.u32 %v2822_v33, 23  ;;  %v2641_v42 = vand.u32 2147483647, %v6336_v12  ;;  %v7312_v33 = vld [vmem:[#allocation23_spill] sm:$0xff]  ;;  %v7313_v10 = vld [vmem:[#allocation24_spill] sm:$0xff] }
 0x2e4   :  { %3802 = vst [vmem:[#allocation2 + $0x88] sm:$0xff] %v2328_v4  ;;  %vm2548_vm3 = vcmp.gt.s32.totalorder %v2547_v36, 0  ;;  %v2911_v29 = vshrl.u32 %v2910_v17, 30  ;;  %v3949_v56 = vadd.s32 4294967169, %v2645_v49  ;;  %v6418_v34 = vand.u32 3, %v2838_v8 }
 0x2e5   :  { %v2824_v53 = vor.u32 4788187, %v2823_v2  ;;  %v2549_v48 = vsel %vm2548_vm3, %v2547_v36, 0  ;;  %v2827_v13 = vcvt.s32.f32 %v2820_v24  ;;  %vm2851_vm4 = vcmp.lt.s32.totalorder %v6184_v5, 0 }
 0x2e6   :  { %v2551_v15 = vand.u32 31, %v2549_v48  ;;  %v2912_v43 = vshll.u32 %v2911_v29, 30  ;;  %v6422_v44 = vadd.s32 %v6377_v7, %v6385_v20  ;;  %v6424_v39 = vshll.u32 %v2545_v60, 8 }
 0x2e7   :  { %v2825_v28 = vand.u32 2147483647, %v2824_v53  ;;  %v6428_v35 = vand.u32 8388607, %v2641_v42  ;;  %v6432_v57 = vshrl.u32 %v2549_v48, 5  ;;  %v6434_v62 = vadd.s32 1, %v3949_v56 }
 0x2e8   :  { %v2552_v52 = vsub.s32 32, %v2551_v15  ;;  %v6430_v37 = vsub.s32 %v2909_v21, %v2912_v43  ;;  %v2935_v59 = vsub.s32 4, %v2911_v29  ;;  %v2554_v32 = vshll.u32 %v7237_v0, %v2551_v15 }
 0x2e9   :  { %v2828_v27 = vmul.f32 %v2827_v13, %v2825_v28  ;;  %v2557_v1 = vshll.u32 %v7238_v51, %v2551_v15  ;;  %v2560_v14 = vshll.u32 %v7239_v47, %v2551_v15  ;;  %v2563_v26 = vshll.u32 %v7240_v19, %v2551_v15 }
 0x2ea   :  { %v2555_v7 = vshrl.u32 %v7238_v51, %v2552_v52  ;;  %v2558_v20 = vshrl.u32 %v7239_v47, %v2552_v52  ;;  %v2915_v41 = vsub.s32 0, %v6430_v37  ;;  %v2561_v18 = vshrl.u32 %v7240_v19, %v2552_v52 }
 0x2eb   :  { %v2829_v63 = vxor.u32 2147483648, %v2828_v27  ;;  %v2564_v61 = vshrl.u32 %v7241_v55, %v2552_v52  ;;  %v2566_v54 = vshll.u32 %v7241_v55, %v2551_v15  ;;  %v2567_v58 = vshrl.u32 %v7245_v45, %v2552_v52 }
 0x2ec   :  { %v2556_v9 = vor.u32 %v2555_v7, %v2554_v32  ;;  %v3958_v40 = vmin.u32 %v2915_v41, %v6430_v37  ;;  %v2559_v50 = vor.u32 %v2558_v20, %v2557_v1  ;;  %v2562_v31 = vor.u32 %v2561_v18, %v2560_v14  ;;  %v7316_v14 = vld [vmem:[#allocation35_spill] sm:$0xff] }
 0x2ed   :  { %v2830_v11 = vsel %vm2747_vm11, %v2829_v63, %v2828_v27  ;;  %v2565_v25 = vor.u32 %v2564_v61, %v2563_v26  ;;  %v419_v21 = vadd.f32 %v381_v30, %v7312_v33  ;;  %v420_v8 = vadd.f32 %v381_v30, %v7313_v10  ;;  %v7317_v61 = vld [vmem:[#allocation36_spill] sm:$0xff] }
 0x2ee   :  { %v2833_v23 = vsel %vm6391_vm14, %v6181_v22, %v2830_v11  ;;  %v2917_v16 = vclz %v3958_v40  ;;  %vm6457_vm5 = vcmp.le.f32.partialorder %v2849_v38, 0.7853982  ;;  %v2936_v46 = vsel %vm2851_vm4, %v2935_v59, %v2911_v29 }
 0x2ef   :  { %4213 = vcosq.f32 %v2833_v23  ;;  %v2553_v49 = vshrl.u32 %v7237_v0, %v2552_v52  ;;  %v2568_v4 = vor.u32 %v2567_v58, %v2566_v54  ;;  %vm2569_vm6 = vcmp.lt.s32.totalorder %v6432_v57, 1 }
 0x2f0   :  { %4215 = vsinq.f32 %v2833_v23  ;;  %v3959_v24 = vadd.s32 4294967294, %v2917_v16  ;;  %vm2571_vm7 = vcmp.lt.s32.totalorder %v6432_v57, 3  ;;  %vm2572_vm8 = vcmp.lt.s32.totalorder %v6432_v57, 4 }
 0x2f1   :  { %v2574_v2 = vsel %vm2572_vm8, %v2562_v31, 2102212464  ;;  %v2577_v17 = vsel %vm2569_vm6, %v2556_v9, %v2559_v50  ;;  %v2578_v60 = vsel %vm2572_vm8, %v2565_v25, 920167782  ;;  %v2581_v38 = vsel %vm2569_vm6, %v2559_v50, %v2562_v31 }
 0x2f2   :  { %vm3960_vm9 = vcmp.lt.s32.totalorder %v3959_v24, 0  ;;  %vm2570_vm10 = vcmp.lt.s32.totalorder %v6432_v57, 2  ;;  %v2579_v53 = vsel %vm2571_vm7, %v2562_v31, %v2578_v60  ;;  %v2582_v29 = vsel %vm2572_vm8, %v2568_v4, 1326507024 }
 0x2f3   :  { %vm2841_vm11 = vcmp.eq.s32.totalorder %v6418_v34, 0  ;;  %v2920_v48 = vsel %vm3960_vm9, 0, %v3959_v24  ;;  %v2573_v56 = vsel %vm2569_vm6, %v2553_v49, %v2556_v9  ;;  %v2580_v15 = vsel %vm2570_vm10, %v2577_v17, %v2579_v53 }
 0x2f4   :  { %v2583_v28 = vsel %vm2571_vm7, %v2565_v25, %v2582_v29  ;;  %vm2840_vm12 = vcmp.lt.s32.totalorder %v6418_v34, 2  ;;  %v2921_v13 = vsub.s32 32, %v2920_v48  ;;  %v2925_v43 = vsub.s32 4294967266, %v2920_v48 }
 0x2f5   :  { %v2575_v52 = vsel %vm2571_vm7, %v2559_v50, %v2574_v2  ;;  %v2584_v27 = vsel %vm2570_vm10, %v2581_v38, %v2583_v28  ;;  %vm2837_vm13 = vweird.f32 %v6181_v22  ;;  %v2922_v63 = vshll.u32 %v6430_v37, %v2920_v48 }
 0x2f6   :  { %v6482_v59 = vmul.u32.u64.low %v6424_v39, %v2584_v27  ;;  %v6483_v32 = vmul.u32.u64.high %v6424_v39, %v2584_v27, %v6482_v59  ;;  %v6486_v7 = vmul.u32.u64.low %v6424_v39, %v2580_v15  ;;  %v6487_v20 = vmul.u32.u64.high %v6424_v39, %v2580_v15, %v6486_v7 }
 0x2f7   :  { %v2923_v41 = vshrl.u32 %v6422_v44, %v2921_v13  ;;  %v2926_v1 = vadd.s32 127, %v2925_v43  ;;  %vm2652_vm14 = vcmp.gt.s32.totalorder %v6434_v62, 0  ;;  %v2576_v18 = vsel %vm2570_vm10, %v2573_v56, %v2575_v52 }
 0x2f8   :  { %v2653_v9 = vsel %vm2652_vm14, %v6434_v62, 0  ;;  %v6497_v26 = vadd.f32 %v419_v21, %v7316_v14  ;;  %v6500_v30 = vadd.f32 %v420_v8, %v7317_v61  ;;  %v2938_v44 = vsel %vm6457_vm5, 0, %v2936_v46 }
 0x2f9   :  { %v4214_v11 = vpop.eup %4213  ;;  %v2924_v40 = vor.u32 %v2923_v41, %v2922_v63  ;;  %v2927_v50 = vshll.u32 %v2926_v1, 23  ;;  %v2655_v37 = vand.u32 31, %v2653_v9  ;;  %vm2844_vm15 = vcmp.eq.s32.totalorder %v6418_v34, 2 }
 0x2fa   :  { %v4216_v54 = vpop.eup %4215  ;;  %v2845_v57 = vxor.u32 2147483648, %v4214_v11  ;;  %vm2594_vm0 = vc.u32 %v6483_v32, %v6486_v7  ;;  %v2595_v62 = vadd.s32 1, %v6487_v20  ;;  %v2592_v25 = vmul.u32 %v6424_v39, %v2576_v18 }
 0x2fb   :  { %v2842_v23 = vxor.u32 2147483648, %v4216_v54  ;;  %v2928_v31 = vor.u32 4788187, %v2927_v50  ;;  %v2656_v58 = vsub.s32 32, %v2655_v37  ;;  %v2942_v33 = vadd.s32 3, %v2938_v44 }
 0x2fc   :  { %v2846_v16 = vsel %vm2844_vm15, %v2845_v57, %v4216_v54  ;;  %v2596_v21 = vsel %vm2594_vm0, %v2595_v62, %v6487_v20  ;;  %v2649_v10 = vor.u32 8388608, %v6428_v35  ;;  %v2931_v49 = vcvt.s32.f32 %v2924_v40 }
 0x2fd   :  { %v2843_v8 = vsel %vm2841_vm11, %v4214_v11, %v2842_v23  ;;  %v2929_v46 = vand.u32 2147483647, %v2928_v31  ;;  %v2597_v4 = vadd.s32 %v2596_v21, %v2592_v25  ;;  %v2658_v2 = vshll.u32 %v7237_v0, %v2655_v37 }
 0x2fe   :  { %v2847_v24 = vsel %vm2840_vm12, %v2843_v8, %v2846_v16  ;;  %v2659_v39 = vshrl.u32 %v7238_v51, %v2656_v58  ;;  %v2662_v17 = vshrl.u32 %v7239_v47, %v2656_v58  ;;  %v2665_v53 = vshrl.u32 %v7240_v19, %v2656_v58 }
 0x2ff   :  { %v2848_v60 = vsel %vm2837_vm13, nan, %v2847_v24  ;;  %v2932_v38 = vmul.f32 %v2931_v49, %v2929_v46  ;;  %v2598_v35 = vadd.s32 536870912, %v2597_v4  ;;  %v2654_v29 = vshrl.u32 %v2653_v9, 5 }
 0x300   :  { %3807 = vst [vmem:[#allocation2 + $0xb0] sm:$0xff] %v2848_v60  ;;  %v2661_v48 = vshll.u32 %v7238_v51, %v2655_v37  ;;  %v2664_v34 = vshll.u32 %v7239_v47, %v2655_v37  ;;  %v2668_v56 = vshrl.u32 %v7241_v55, %v2656_v58  ;;  %v2660_v13 = vor.u32 %v2659_v39, %v2658_v2 }
 0x301   :  { %v2933_v15 = vxor.u32 2147483648, %v2932_v38  ;;  %v2599_v28 = vshrl.u32 %v2598_v35, 30  ;;  %v2667_v43 = vshll.u32 %v7240_v19, %v2655_v37  ;;  %v2670_v27 = vshll.u32 %v7241_v55, %v2655_v37 }
 0x302   :  { %v2663_v52 = vor.u32 %v2662_v17, %v2661_v48  ;;  %v2666_v22 = vor.u32 %v2665_v53, %v2664_v34  ;;  %v2671_v59 = vshrl.u32 %v7245_v45, %v2656_v58  ;;  %v6529_v1 = vshll.u32 %v2649_v10, 8 }
 0x303   :  { %v2934_v20 = vsel %vm2851_vm4, %v2933_v15, %v2932_v38  ;;  %v2600_v63 = vshll.u32 %v2599_v28, 30  ;;  %v2669_v41 = vor.u32 %v2668_v56, %v2667_v43  ;;  %v6534_v9 = vand.u32 3, %v2942_v33 }
 0x304   :  { %v2937_v18 = vsel %vm6457_vm5, %v6184_v5, %v2934_v20  ;;  %v2657_v14 = vshrl.u32 %v7237_v0, %v2656_v58  ;;  %v2672_v61 = vor.u32 %v2671_v59, %v2670_v27  ;;  %vm2673_vm1 = vcmp.lt.s32.totalorder %v2654_v29, 1 }
 0x305   :  { %4217 = vcosq.f32 %v2937_v18  ;;  %v6537_v11 = vsub.s32 %v2597_v4, %v2600_v63  ;;  %vm2676_vm2 = vcmp.lt.s32.totalorder %v2654_v29, 4  ;;  %vm2674_vm3 = vcmp.lt.s32.totalorder %v2654_v29, 2 }
 0x306   :  { %4219 = vsinq.f32 %v2937_v18  ;;  %v2678_v40 = vsel %vm2676_vm2, %v2666_v22, 2102212464  ;;  %v2681_v50 = vsel %vm2673_vm1, %v2660_v13, %v2663_v52  ;;  %v2623_v37 = vsub.s32 4, %v2599_v28 }
 0x307   :  { %v2603_v44 = vsub.s32 0, %v6537_v11  ;;  %vm2675_vm4 = vcmp.lt.s32.totalorder %v2654_v29, 3  ;;  %v2682_v36 = vsel %vm2676_vm2, %v2669_v41, 920167782  ;;  %v2677_v54 = vsel %vm2673_vm1, %v2657_v14, %v2660_v13 }
 0x308   :  { %v2683_v57 = vsel %vm2675_vm4, %v2666_v22, %v2682_v36  ;;  %v2685_v62 = vsel %vm2673_vm1, %v2663_v52, %v2666_v22  ;;  %v2686_v23 = vsel %vm2676_vm2, %v2672_v61, 1326507024  ;;  %v2679_v25 = vsel %vm2675_vm4, %v2663_v52, %v2678_v40  ;;  %v376_v52 = vpop.permute.xlu0 %375 }
 0x309   :  { %v3946_v31 = vmin.u32 %v2603_v44, %v6537_v11  ;;  %v2684_v58 = vsel %vm2674_vm3, %v2681_v50, %v2683_v57  ;;  %v2687_v16 = vsel %vm2675_vm4, %v2669_v41, %v2686_v23  ;;  %vm2539_vm5 = vcmp.lt.s32.totalorder %v6276_v3, 0  ;;  %v7320_v50 = vld [vmem:[#allocation25_spill] sm:$0xff] }
 0x30a   :  { %v2688_v33 = vsel %vm2674_vm3, %v2685_v62, %v2687_v16  ;;  %v6545_v21 = vmul.u32.u64.low %v6529_v1, %v2684_v58  ;;  %v6546_v10 = vmul.u32.u64.high %v6529_v1, %v2684_v58, %v6545_v21  ;;  %v2624_v46 = vsel %vm2539_vm5, %v2623_v37, %v2599_v28 }
 0x30b   :  { %v2605_v8 = vclz %v3946_v31  ;;  %vm2941_vm6 = vweird.f32 %v6184_v5  ;;  %v2680_v49 = vsel %vm2674_vm3, %v2677_v54, %v2679_v25  ;;  %v3161_v2 = vand.u32 2147483647, %v6497_v26  ;;  %v7321_v5 = vld [vmem:[#allocation37_spill] sm:$0xff] }
 0x30c   :  { %v6553_v4 = vmul.u32.u64.low %v6529_v1, %v2688_v33  ;;  %v6554_v24 = vmul.u32.u64.high %v6529_v1, %v2688_v33, %v6553_v4  ;;  %vm2944_vm7 = vcmp.lt.s32.totalorder %v6534_v9, 2  ;;  %vm6560_vm8 = vcmp.le.f32.partialorder %v2537_v6, 0.7853982 }
 0x30d   :  { %v3947_v17 = vadd.s32 4294967294, %v2605_v8  ;;  %v3164_v60 = vand.u32 2139095040, %v6497_v26  ;;  %vm2945_vm9 = vcmp.eq.s32.totalorder %v6534_v9, 0  ;;  %vm2948_vm10 = vcmp.eq.s32.totalorder %v6534_v9, 2 }
 0x30e   :  { %v2593_v38 = vadd.s32 %v6486_v7, %v6483_v32  ;;  %v2699_v35 = vadd.s32 1, %v6546_v10  ;;  %v2626_v6 = vsel %vm6560_vm8, 0, %v2624_v46  ;;  %v2696_v29 = vmul.u32 %v6529_v1, %v2680_v49 }
 0x30f   :  { %v4218_v53 = vpop.eup %4217  ;;  %vm3948_vm11 = vcmp.lt.s32.totalorder %v3947_v17, 0  ;;  %v3165_v48 = vshrl.u32 %v3164_v60, 23  ;;  %vm2698_vm12 = vc.u32 %v6554_v24, %v6545_v21  ;;  %v3168_v28 = vand.u32 8388607, %v3161_v2 }
 0x310   :  { %v4220_v34 = vpop.eup %4219  ;;  %v2949_v56 = vxor.u32 2147483648, %v4218_v53  ;;  %v2608_v15 = vsel %vm3948_vm11, 0, %v3947_v17  ;;  %v3268_v43 = vand.u32 2139095040, %v6500_v30  ;;  %v2700_v59 = vsel %vm2698_vm12, %v2699_v35, %v6546_v10 }
 0x311   :  { %v2946_v13 = vxor.u32 2147483648, %v4220_v34  ;;  %v2609_v32 = vsub.s32 32, %v2608_v15  ;;  %v2613_v7 = vsub.s32 4294967266, %v2608_v15  ;;  %v2610_v27 = vshll.u32 %v6537_v11, %v2608_v15 }
 0x312   :  { %v2950_v22 = vsel %vm2948_vm10, %v2949_v56, %v4220_v34  ;;  %v3969_v20 = vadd.s32 4294967169, %v3165_v48  ;;  %v2701_v18 = vadd.s32 %v2700_v59, %v2696_v29  ;;  %v2630_v61 = vadd.s32 3, %v2626_v6 }
 0x313   :  { %v2947_v63 = vsel %vm2945_vm9, %v4218_v53, %v2946_v13  ;;  %v2611_v41 = vshrl.u32 %v2593_v38, %v2609_v32  ;;  %v2614_v1 = vadd.s32 127, %v2613_v7  ;;  %v417_v44 = vadd.f32 %v376_v52, %v7320_v50 }
 0x314   :  { %v2951_v14 = vsel %vm2944_vm7, %v2947_v63, %v2950_v22  ;;  %v3171_v40 = vadd.s32 1, %v3969_v20  ;;  %v2702_v54 = vadd.s32 536870912, %v2701_v18  ;;  %v3169_v57 = vor.u32 8388608, %v3168_v28 }
 0x315   :  { %v2952_v37 = vsel %vm2941_vm6, nan, %v2951_v14  ;;  %v2612_v11 = vor.u32 %v2611_v41, %v2610_v27  ;;  %v2615_v36 = vshll.u32 %v2614_v1, 23  ;;  %v3269_v25 = vshrl.u32 %v3268_v43, 23 }
 0x316   :  { %3808 = vst [vmem:[#allocation2 + $0xb8] sm:$0xff] %v2952_v37  ;;  %vm3172_vm13 = vcmp.gt.s32.totalorder %v3171_v40, 0  ;;  %v2703_v23 = vshrl.u32 %v2702_v54, 30  ;;  %v6588_v58 = vand.u32 3, %v2630_v61  ;;  %vm2643_vm14 = vcmp.lt.s32.totalorder %v6336_v12, 0  ;;  %v7322_v61 = vld [vmem:[#allocation26_spill] sm:$0xff] }
 0x317   :  { %v2616_v62 = vor.u32 4788187, %v2615_v36  ;;  %v3173_v31 = vsel %vm3172_vm13, %v3171_v40, 0  ;;  %v2619_v33 = vcvt.s32.f32 %v2612_v11  ;;  %v6592_v8 = vadd.f32 %v417_v44, %v7321_v5 }
 0x318   :  { %v3175_v9 = vand.u32 31, %v3173_v31  ;;  %v2704_v10 = vshll.u32 %v2703_v23, 30  ;;  %v6595_v46 = vadd.s32 %v6545_v21, %v6554_v24  ;;  %v6597_v4 = vshll.u32 %v3169_v57, 8 }
 0x319   :  { %v2617_v16 = vand.u32 2147483647, %v2616_v62  ;;  %v3265_v17 = vand.u32 2147483647, %v6500_v30  ;;  %v3174_v35 = vshrl.u32 %v3173_v31, 5  ;;  %v3973_v53 = vadd.s32 4294967169, %v3269_v25 }
 0x31a   :  { %v3176_v49 = vsub.s32 32, %v3175_v9  ;;  %v6600_v38 = vsub.s32 %v2701_v18, %v2704_v10  ;;  %v2727_v6 = vsub.s32 4, %v2703_v23  ;;  %v3178_v29 = vshll.u32 %v7237_v0, %v3175_v9 }
 0x31b   :  { %v2620_v60 = vmul.f32 %v2619_v33, %v2617_v16  ;;  %v3181_v24 = vshll.u32 %v7238_v51, %v3175_v9  ;;  %v3184_v13 = vshll.u32 %v7239_v47, %v3175_v9  ;;  %v3187_v32 = vshll.u32 %v7240_v19, %v3175_v9 }
 0x31c   :  { %v3179_v48 = vshrl.u32 %v7238_v51, %v3176_v49  ;;  %v3182_v34 = vshrl.u32 %v7239_v47, %v3176_v49  ;;  %v2707_v21 = vsub.s32 0, %v6600_v38  ;;  %v3185_v15 = vshrl.u32 %v7240_v19, %v3176_v49 }
 0x31d   :  { %v2621_v56 = vxor.u32 2147483648, %v2620_v60  ;;  %v3188_v7 = vshrl.u32 %v7241_v55, %v3176_v49  ;;  %v3190_v59 = vshll.u32 %v7241_v55, %v3175_v9  ;;  %v3191_v1 = vshrl.u32 %v7245_v45, %v3176_v49 }
 0x31e   :  { %v3180_v28 = vor.u32 %v3179_v48, %v3178_v29  ;;  %v3950_v22 = vmin.u32 %v2707_v21, %v6600_v38  ;;  %v3183_v27 = vor.u32 %v3182_v34, %v3181_v24  ;;  %v3186_v63 = vor.u32 %v3185_v15, %v3184_v13  ;;  %v7325_v15 = vld [vmem:[#allocation38_spill] sm:$0xff] }
 0x31f   :  { %v2622_v43 = vsel %vm2539_vm5, %v2621_v56, %v2620_v60  ;;  %v3189_v41 = vor.u32 %v3188_v7, %v3187_v32  ;;  %v3275_v14 = vadd.s32 1, %v3973_v53  ;;  %v418_v40 = vadd.f32 %v376_v52, %v7322_v61 }
 0x320   :  { %v2625_v20 = vsel %vm6560_vm8, %v6276_v3, %v2622_v43  ;;  %v2709_v18 = vclz %v3950_v22  ;;  %vm6622_vm15 = vcmp.le.f32.partialorder %v2641_v42, 0.7853982  ;;  %v2728_v39 = vsel %vm2643_vm14, %v2727_v6, %v2703_v23 }
 0x321   :  { %4221 = vcosq.f32 %v2625_v20  ;;  %v3177_v44 = vshrl.u32 %v7237_v0, %v3176_v49  ;;  %v3192_v37 = vor.u32 %v3191_v1, %v3190_v59  ;;  %vm3193_vm0 = vcmp.lt.s32.totalorder %v3174_v35, 1 }
 0x322   :  { %4223 = vsinq.f32 %v2625_v20  ;;  %v3951_v11 = vadd.s32 4294967294, %v2709_v18  ;;  %vm3195_vm1 = vcmp.lt.s32.totalorder %v3174_v35, 3  ;;  %vm3196_vm2 = vcmp.lt.s32.totalorder %v3174_v35, 4 }
 0x323   :  { %v3198_v36 = vsel %vm3196_vm2, %v3186_v63, 2102212464  ;;  %v3201_v54 = vsel %vm3193_vm0, %v3180_v28, %v3183_v27  ;;  %v3202_v52 = vsel %vm3196_vm2, %v3189_v41, 920167782  ;;  %v3205_v57 = vsel %vm3193_vm0, %v3183_v27, %v3186_v63 }
 0x324   :  { %vm3952_vm3 = vcmp.lt.s32.totalorder %v3951_v11, 0  ;;  %vm3194_vm4 = vcmp.lt.s32.totalorder %v3174_v35, 2  ;;  %v3203_v42 = vsel %vm3195_vm1, %v3186_v63, %v3202_v52  ;;  %v3206_v62 = vsel %vm3196_vm2, %v3192_v37, 1326507024 }
 0x325   :  { %vm2633_vm5 = vcmp.eq.s32.totalorder %v6588_v58, 0  ;;  %v2712_v31 = vsel %vm3952_vm3, 0, %v3951_v11  ;;  %v3197_v23 = vsel %vm3193_vm0, %v3177_v44, %v3180_v28  ;;  %v3204_v25 = vsel %vm3194_vm4, %v3201_v54, %v3203_v42 }
 0x326   :  { %v3207_v9 = vsel %vm3195_vm1, %v3189_v41, %v3206_v62  ;;  %vm2632_vm6 = vcmp.lt.s32.totalorder %v6588_v58, 2  ;;  %v2713_v16 = vsub.s32 32, %v2712_v31  ;;  %v2717_v33 = vsub.s32 4294967266, %v2712_v31 }
 0x327   :  { %v3199_v10 = vsel %vm3195_vm1, %v3183_v27, %v3198_v36  ;;  %v3208_v5 = vsel %vm3194_vm4, %v3205_v57, %v3207_v9  ;;  %vm2629_vm7 = vweird.f32 %v6276_v3  ;;  %v2714_v29 = vshll.u32 %v6600_v38, %v2712_v31 }
 0x328   :  { %v6638_v49 = vmul.u32.u64.low %v6597_v4, %v3208_v5  ;;  %v6639_v60 = vmul.u32.u64.high %v6597_v4, %v3208_v5, %v6638_v49  ;;  %v6642_v53 = vmul.u32.u64.low %v6597_v4, %v3204_v25  ;;  %v6643_v6 = vmul.u32.u64.high %v6597_v4, %v3204_v25, %v6642_v53 }
 0x329   :  { %v2715_v48 = vshrl.u32 %v6595_v46, %v2713_v16  ;;  %v2718_v34 = vadd.s32 127, %v2717_v33  ;;  %vm3276_vm8 = vcmp.gt.s32.totalorder %v3275_v14, 0  ;;  %v3200_v56 = vsel %vm3194_vm4, %v3197_v23, %v3199_v10 }
 0x32a   :  { %v3272_v21 = vand.u32 8388607, %v3265_v17  ;;  %v3277_v24 = vsel %vm3276_vm8, %v3275_v14, 0  ;;  %v6652_v28 = vadd.f32 %v418_v40, %v7325_v15  ;;  %v2730_v43 = vsel %vm6622_vm15, 0, %v2728_v39 }
 0x32b   :  { %v4222_v13 = vpop.eup %4221  ;;  %v2716_v32 = vor.u32 %v2715_v48, %v2714_v29  ;;  %v2719_v7 = vshll.u32 %v2718_v34, 23  ;;  %v3279_v38 = vand.u32 31, %v3277_v24  ;;  %vm2636_vm9 = vcmp.eq.s32.totalorder %v6588_v58, 2 }
 0x32c   :  { %v4224_v22 = vpop.eup %4223  ;;  %v2637_v46 = vxor.u32 2147483648, %v4222_v13  ;;  %vm3218_vm10 = vc.u32 %v6639_v60, %v6642_v53  ;;  %v3219_v35 = vadd.s32 1, %v6643_v6  ;;  %v3216_v20 = vmul.u32 %v6597_v4, %v3200_v56 }
 0x32d   :  { %v2634_v27 = vxor.u32 2147483648, %v4224_v22  ;;  %v2720_v59 = vor.u32 4788187, %v2719_v7  ;;  %v3280_v63 = vsub.s32 32, %v3279_v38  ;;  %v2734_v1 = vadd.s32 3, %v2730_v43 }
 0x32e   :  { %v2638_v41 = vsel %vm2636_vm9, %v2637_v46, %v4224_v22  ;;  %v3220_v18 = vsel %vm3218_vm10, %v3219_v35, %v6643_v6  ;;  %v3273_v14 = vor.u32 8388608, %v3272_v21  ;;  %v2723_v39 = vcvt.s32.f32 %v2716_v32 }
 0x32f   :  { %v2635_v61 = vsel %vm2633_vm5, %v4222_v13, %v2634_v27  ;;  %v2721_v40 = vand.u32 2147483647, %v2720_v59  ;;  %v3221_v44 = vadd.s32 %v3220_v18, %v3216_v20  ;;  %v3282_v11 = vshll.u32 %v7237_v0, %v3279_v38 }
 0x330   :  { %v2639_v37 = vsel %vm2632_vm6, %v2635_v61, %v2638_v41  ;;  %v3283_v36 = vshrl.u32 %v7238_v51, %v3280_v63  ;;  %v3286_v4 = vshrl.u32 %v7239_v47, %v3280_v63  ;;  %v3289_v42 = vshrl.u32 %v7240_v19, %v3280_v63 }
 0x331   :  { %v2640_v54 = vsel %vm2629_vm7, nan, %v2639_v37  ;;  %v2724_v52 = vmul.f32 %v2723_v39, %v2721_v40  ;;  %v3222_v57 = vadd.s32 536870912, %v3221_v44  ;;  %v3278_v62 = vshrl.u32 %v3277_v24, 5 }
 0x332   :  { %3805 = vst [vmem:[#allocation2 + $0xa0] sm:$0xff] %v2640_v54  ;;  %v3285_v31 = vshll.u32 %v7238_v51, %v3279_v38  ;;  %v3288_v58 = vshll.u32 %v7239_v47, %v3279_v38  ;;  %v3292_v23 = vshrl.u32 %v7241_v55, %v3280_v63  ;;  %v3284_v16 = vor.u32 %v3283_v36, %v3282_v11 }
 0x333   :  { %v2725_v25 = vxor.u32 2147483648, %v2724_v52  ;;  %v3223_v9 = vshrl.u32 %v3222_v57, 30  ;;  %v3291_v33 = vshll.u32 %v7240_v19, %v3279_v38  ;;  %v3294_v5 = vshll.u32 %v7241_v55, %v3279_v38 }
 0x334   :  { %v3287_v10 = vor.u32 %v3286_v4, %v3285_v31  ;;  %v3290_v3 = vor.u32 %v3289_v42, %v3288_v58  ;;  %v3295_v49 = vshrl.u32 %v7245_v45, %v3280_v63  ;;  %v6680_v29 = vand.u32 3, %v2734_v1 }
 0x335   :  { %v2726_v6 = vsel %vm2643_vm14, %v2725_v25, %v2724_v52  ;;  %v3224_v48 = vshll.u32 %v3223_v9, 30  ;;  %v3293_v34 = vor.u32 %v3292_v23, %v3291_v33  ;;  %v3281_v21 = vshrl.u32 %v7237_v0, %v3280_v63 }
 0x336   :  { %v2729_v56 = vsel %vm6622_vm15, %v6336_v12, %v2726_v6  ;;  %v3296_v24 = vor.u32 %v3295_v49, %v3294_v5  ;;  %v3313_v15 = vshll.u32 %v3273_v14, 8  ;;  %vm3297_vm11 = vcmp.lt.s32.totalorder %v3278_v62, 1 }
 0x337   :  { %4225 = vcosq.f32 %v2729_v56  ;;  %v6686_v13 = vsub.s32 %v3221_v44, %v3224_v48  ;;  %vm3300_vm12 = vcmp.lt.s32.totalorder %v3278_v62, 4  ;;  %vm3298_vm13 = vcmp.lt.s32.totalorder %v3278_v62, 2 }
 0x338   :  { %4227 = vsinq.f32 %v2729_v56  ;;  %v3302_v32 = vsel %vm3300_vm12, %v3290_v3, 2102212464  ;;  %v3305_v7 = vsel %vm3297_vm11, %v3284_v16, %v3287_v10  ;;  %v3247_v38 = vsub.s32 4, %v3223_v9 }
 0x339   :  { %v3227_v43 = vsub.s32 0, %v6686_v13  ;;  %vm3299_vm14 = vcmp.lt.s32.totalorder %v3278_v62, 3  ;;  %v3306_v22 = vsel %vm3300_vm12, %v3293_v34, 920167782  ;;  %v3301_v50 = vsel %vm3297_vm11, %v3281_v21, %v3284_v16 }
 0x33a   :  { %v3307_v46 = vsel %vm3299_vm14, %v3290_v3, %v3306_v22  ;;  %v3309_v35 = vsel %vm3297_vm11, %v3287_v10, %v3290_v3  ;;  %v3310_v27 = vsel %vm3300_vm12, %v3296_v24, 1326507024  ;;  %v3303_v20 = vsel %vm3299_vm14, %v3287_v10, %v3302_v32 }
 0x33b   :  { %v3970_v59 = vmin.u32 %v3227_v43, %v6686_v13  ;;  %v3308_v63 = vsel %vm3298_vm13, %v3305_v7, %v3307_v46  ;;  %v3311_v41 = vsel %vm3299_vm14, %v3293_v34, %v3310_v27  ;;  %vm3163_vm15 = vcmp.lt.s32.totalorder %v6497_v26, 0 }
 0x33c   :  { %v3312_v1 = vsel %vm3298_vm13, %v3309_v35, %v3311_v41  ;;  %v6693_v18 = vmul.u32.u64.low %v3313_v15, %v3308_v63  ;;  %v6694_v14 = vmul.u32.u64.high %v3313_v15, %v3308_v63, %v6693_v18  ;;  %v3248_v40 = vsel %vm3163_vm15, %v3247_v38, %v3223_v9 }
 0x33d   :  { %v3229_v61 = vclz %v3970_v59  ;;  %vm2733_vm0 = vweird.f32 %v6336_v12  ;;  %v3304_v39 = vsel %vm3298_vm13, %v3301_v50, %v3303_v20  ;;  %v2956_v11 = vand.u32 2139095040, %v6592_v8 }
 0x33e   :  { %v6700_v44 = vmul.u32.u64.low %v3313_v15, %v3312_v1  ;;  %v6701_v37 = vmul.u32.u64.high %v3313_v15, %v3312_v1, %v6700_v44  ;;  %vm2736_vm1 = vcmp.lt.s32.totalorder %v6680_v29, 2  ;;  %vm6707_vm2 = vcmp.le.f32.partialorder %v3161_v2, 0.7853982 }
 0x33f   :  { %v3971_v4 = vadd.s32 4294967294, %v3229_v61  ;;  %v2953_v54 = vand.u32 2147483647, %v6592_v8  ;;  %vm2737_vm3 = vcmp.eq.s32.totalorder %v6680_v29, 0  ;;  %vm2740_vm4 = vcmp.eq.s32.totalorder %v6680_v29, 2 }
 0x340   :  { %v3323_v52 = vadd.s32 1, %v6694_v14  ;;  %v2957_v57 = vshrl.u32 %v2956_v11, 23  ;;  %v3217_v62 = vadd.s32 %v6642_v53, %v6639_v60  ;;  %v3250_v2 = vsel %vm6707_vm2, 0, %v3248_v40 }
 0x341   :  { %v4226_v42 = vpop.eup %4225  ;;  %vm3972_vm5 = vcmp.lt.s32.totalorder %v3971_v4, 0  ;;  %v3320_v31 = vmul.u32 %v3313_v15, %v3304_v39  ;;  %vm3322_vm6 = vc.u32 %v6701_v37, %v6693_v18  ;;  %v3060_v9 = vand.u32 2139095040, %v6652_v28 }
 0x342   :  { %v4228_v58 = vpop.eup %4227  ;;  %v2741_v23 = vxor.u32 2147483648, %v4226_v42  ;;  %v3232_v25 = vsel %vm3972_vm5, 0, %v3971_v4  ;;  %v2960_v3 = vand.u32 8388607, %v2953_v54  ;;  %v3324_v5 = vsel %vm3322_vm6, %v3323_v52, %v6694_v14 }
 0x343   :  { %v2738_v16 = vxor.u32 2147483648, %v4228_v58  ;;  %v3233_v33 = vsub.s32 32, %v3232_v25  ;;  %v3237_v10 = vsub.s32 4294967266, %v3232_v25  ;;  %v3234_v53 = vshll.u32 %v6686_v13, %v3232_v25 }
 0x344   :  { %v2742_v60 = vsel %vm2740_vm4, %v2741_v23, %v4228_v58  ;;  %v3961_v49 = vadd.s32 4294967169, %v2957_v57  ;;  %v3325_v56 = vadd.s32 %v3324_v5, %v3320_v31  ;;  %v3254_v24 = vadd.s32 3, %v3250_v2 }
 0x345   :  { %v2739_v6 = vsel %vm2737_vm3, %v4226_v42, %v2738_v16  ;;  %v3235_v48 = vshrl.u32 %v3217_v62, %v3233_v33  ;;  %v3238_v34 = vadd.s32 127, %v3237_v10  ;;  %v3061_v32 = vshrl.u32 %v3060_v9, 23  ;;  %v391_v16 = vpop.permute.xlu1 %390 }
 0x346   :  { %v2743_v21 = vsel %vm2736_vm1, %v2739_v6, %v2742_v60  ;;  %v2963_v15 = vadd.s32 1, %v3961_v49  ;;  %v3326_v38 = vadd.s32 536870912, %v3325_v56  ;;  %v2961_v22 = vor.u32 8388608, %v2960_v3 }
 0x347   :  { %v2744_v7 = vsel %vm2733_vm0, nan, %v2743_v21  ;;  %v3236_v43 = vor.u32 %v3235_v48, %v3234_v53  ;;  %v3239_v13 = vshll.u32 %v3238_v34, 23  ;;  %v3057_v50 = vand.u32 2147483647, %v6652_v28  ;;  %v7328_v34 = vld [vmem:[#allocation27_spill] sm:$0xff]  ;;  %v7329_v21 = vld [vmem:[#allocation28_spill] sm:$0xff] }
 0x348   :  { %3806 = vst [vmem:[#allocation2 + $0xa8] sm:$0xff] %v2744_v7  ;;  %vm2964_vm7 = vcmp.gt.s32.totalorder %v2963_v15, 0  ;;  %v3327_v35 = vshrl.u32 %v3326_v38, 30  ;;  %v3965_v59 = vadd.s32 4294967169, %v3061_v32  ;;  %v6734_v41 = vand.u32 3, %v3254_v24 }
 0x349   :  { %v3240_v46 = vor.u32 4788187, %v3239_v13  ;;  %v2965_v27 = vsel %vm2964_vm7, %v2963_v15, 0  ;;  %v3243_v63 = vcvt.s32.f32 %v3236_v43  ;;  %vm3267_vm8 = vcmp.lt.s32.totalorder %v6500_v30, 0 }
 0x34a   :  { %v2967_v29 = vand.u32 31, %v2965_v27  ;;  %v3328_v12 = vshll.u32 %v3327_v35, 30  ;;  %v6738_v1 = vadd.s32 %v6693_v18, %v6701_v37  ;;  %v6740_v61 = vshll.u32 %v2961_v22, 8 }
 0x34b   :  { %v3241_v20 = vand.u32 2147483647, %v3240_v46  ;;  %v6744_v40 = vand.u32 8388607, %v3057_v50  ;;  %v6748_v11 = vshrl.u32 %v2965_v27, 5  ;;  %v6750_v4 = vadd.s32 1, %v3965_v59 }
 0x34c   :  { %v2968_v14 = vsub.s32 32, %v2967_v29  ;;  %v6746_v44 = vsub.s32 %v3325_v56, %v3328_v12  ;;  %v3351_v52 = vsub.s32 4, %v3327_v35  ;;  %v2970_v57 = vshll.u32 %v7237_v0, %v2967_v29 }
 0x34d   :  { %v3244_v39 = vmul.f32 %v3243_v63, %v3241_v20  ;;  %v2973_v2 = vshll.u32 %v7238_v51, %v2967_v29  ;;  %v2976_v23 = vshll.u32 %v7239_v47, %v2967_v29  ;;  %v2979_v25 = vshll.u32 %v7240_v19, %v2967_v29 }
 0x34e   :  { %v2971_v18 = vshrl.u32 %v7238_v51, %v2968_v14  ;;  %v2974_v37 = vshrl.u32 %v7239_v47, %v2968_v14  ;;  %v3331_v62 = vsub.s32 0, %v6746_v44  ;;  %v2977_v31 = vshrl.u32 %v7240_v19, %v2968_v14 }
 0x34f   :  { %v3245_v42 = vxor.u32 2147483648, %v3244_v39  ;;  %v2980_v9 = vshrl.u32 %v7241_v55, %v2968_v14  ;;  %v2982_v60 = vshll.u32 %v7241_v55, %v2967_v29  ;;  %v2983_v6 = vshrl.u32 %v7245_v45, %v2968_v14 }
 0x350   :  { %v2972_v58 = vor.u32 %v2971_v18, %v2970_v57  ;;  %v3974_v10 = vmin.u32 %v3331_v62, %v6746_v44  ;;  %v2975_v3 = vor.u32 %v2974_v37, %v2973_v2  ;;  %v2978_v5 = vor.u32 %v2977_v31, %v2976_v23  ;;  %v7332_v23 = vld [vmem:[#allocation39_spill] sm:$0xff] }
 0x351   :  { %v3246_v33 = vsel %vm3163_vm15, %v3245_v42, %v3244_v39  ;;  %v2981_v49 = vor.u32 %v2980_v9, %v2979_v25  ;;  %v423_v56 = vadd.f32 %v391_v16, %v7328_v34  ;;  %v424_v24 = vadd.f32 %v391_v16, %v7329_v21  ;;  %v7333_v9 = vld [vmem:[#allocation40_spill] sm:$0xff] }
 0x352   :  { %v3249_v53 = vsel %vm6707_vm2, %v6497_v26, %v3246_v33  ;;  %v3333_v48 = vclz %v3974_v10  ;;  %vm6773_vm9 = vcmp.le.f32.partialorder %v3265_v17, 0.7853982  ;;  %v3352_v36 = vsel %vm3267_vm8, %v3351_v52, %v3327_v35 }
 0x353   :  { %4229 = vcosq.f32 %v3249_v53  ;;  %v2969_v32 = vshrl.u32 %v7237_v0, %v2968_v14  ;;  %v2984_v7 = vor.u32 %v2983_v6, %v2982_v60  ;;  %vm2985_vm10 = vcmp.lt.s32.totalorder %v6748_v11, 1 }
 0x354   :  { %4231 = vsinq.f32 %v3249_v53  ;;  %v3975_v43 = vadd.s32 4294967294, %v3333_v48  ;;  %vm2987_vm11 = vcmp.lt.s32.totalorder %v6748_v11, 3  ;;  %vm2988_vm12 = vcmp.lt.s32.totalorder %v6748_v11, 4 }
 0x355   :  { %v2990_v13 = vsel %vm2988_vm12, %v2978_v5, 2102212464  ;;  %v2993_v38 = vsel %vm2985_vm10, %v2972_v58, %v2975_v3  ;;  %v2994_v22 = vsel %vm2988_vm12, %v2981_v49, 920167782  ;;  %v2997_v17 = vsel %vm2985_vm10, %v2975_v3, %v2978_v5 }
 0x356   :  { %vm3976_vm13 = vcmp.lt.s32.totalorder %v3975_v43, 0  ;;  %vm2986_vm14 = vcmp.lt.s32.totalorder %v6748_v11, 2  ;;  %v2995_v46 = vsel %vm2987_vm11, %v2978_v5, %v2994_v22  ;;  %v2998_v35 = vsel %vm2988_vm12, %v2984_v7, 1326507024 }
 0x357   :  { %vm3257_vm15 = vcmp.eq.s32.totalorder %v6734_v41, 0  ;;  %v3336_v27 = vsel %vm3976_vm13, 0, %v3975_v43  ;;  %v2989_v59 = vsel %vm2985_vm10, %v2969_v32, %v2972_v58  ;;  %v2996_v29 = vsel %vm2986_vm14, %v2993_v38, %v2995_v46 }
 0x358   :  { %v2999_v20 = vsel %vm2987_vm11, %v2981_v49, %v2998_v35  ;;  %vm3256_vm0 = vcmp.lt.s32.totalorder %v6734_v41, 2  ;;  %v3337_v63 = vsub.s32 32, %v3336_v27  ;;  %v3341_v12 = vsub.s32 4294967266, %v3336_v27 }
 0x359   :  { %v2991_v14 = vsel %vm2987_vm11, %v2975_v3, %v2990_v13  ;;  %v3000_v39 = vsel %vm2986_vm14, %v2997_v17, %v2999_v20  ;;  %vm3253_vm1 = vweird.f32 %v6497_v26  ;;  %v3338_v42 = vshll.u32 %v6746_v44, %v3336_v27 }
 0x35a   :  { %v6798_v52 = vmul.u32.u64.low %v6740_v61, %v3000_v39  ;;  %v6799_v57 = vmul.u32.u64.high %v6740_v61, %v3000_v39, %v6798_v52  ;;  %v6802_v18 = vmul.u32.u64.low %v6740_v61, %v2996_v29  ;;  %v6803_v37 = vmul.u32.u64.high %v6740_v61, %v2996_v29, %v6802_v18 }
 0x35b   :  { %v3339_v62 = vshrl.u32 %v6738_v1, %v3337_v63  ;;  %v3342_v2 = vadd.s32 127, %v3341_v12  ;;  %vm3068_vm2 = vcmp.gt.s32.totalorder %v6750_v4, 0  ;;  %v2992_v31 = vsel %vm2986_vm14, %v2989_v59, %v2991_v14 }
 0x35c   :  { %v3069_v58 = vsel %vm3068_vm2, %v6750_v4, 0  ;;  %v6813_v25 = vadd.f32 %v423_v56, %v7332_v23  ;;  %v6816_v16 = vadd.f32 %v424_v24, %v7333_v9  ;;  %v3354_v1 = vsel %vm6773_vm9, 0, %v3352_v36 }
 0x35d   :  { %v4230_v33 = vpop.eup %4229  ;;  %v3340_v10 = vor.u32 %v3339_v62, %v3338_v42  ;;  %v3343_v3 = vshll.u32 %v3342_v2, 23  ;;  %v3071_v44 = vand.u32 31, %v3069_v58  ;;  %vm3260_vm3 = vcmp.eq.s32.totalorder %v6734_v41, 2 }
 0x35e   :  { %v4232_v60 = vpop.eup %4231  ;;  %v3261_v11 = vxor.u32 2147483648, %v4230_v33  ;;  %vm3010_vm4 = vc.u32 %v6799_v57, %v6802_v18  ;;  %v3011_v4 = vadd.s32 1, %v6803_v37  ;;  %v3008_v49 = vmul.u32 %v6740_v61, %v2992_v31 }
 0x35f   :  { %v3258_v53 = vxor.u32 2147483648, %v4232_v60  ;;  %v3344_v5 = vor.u32 4788187, %v3343_v3  ;;  %v3072_v6 = vsub.s32 32, %v3071_v44  ;;  %v3358_v34 = vadd.s32 3, %v3354_v1 }
 0x360   :  { %v3262_v48 = vsel %vm3260_vm3, %v3261_v11, %v4232_v60  ;;  %v3012_v56 = vsel %vm3010_vm4, %v3011_v4, %v6803_v37  ;;  %v3065_v21 = vor.u32 8388608, %v6744_v40  ;;  %v3347_v32 = vcvt.s32.f32 %v3340_v10 }
 0x361   :  { %v3259_v24 = vsel %vm3257_vm15, %v4230_v33, %v3258_v53  ;;  %v3345_v36 = vand.u32 2147483647, %v3344_v5  ;;  %v3013_v7 = vadd.s32 %v3012_v56, %v3008_v49  ;;  %v3074_v13 = vshll.u32 %v7237_v0, %v3071_v44 }
 0x362   :  { %v3263_v43 = vsel %vm3256_vm0, %v3259_v24, %v3262_v48  ;;  %v3075_v61 = vshrl.u32 %v7238_v51, %v3072_v6  ;;  %v3078_v38 = vshrl.u32 %v7239_v47, %v3072_v6  ;;  %v3081_v46 = vshrl.u32 %v7240_v19, %v3072_v6 }
 0x363   :  { %v3264_v22 = vsel %vm3253_vm1, nan, %v3263_v43  ;;  %v3348_v17 = vmul.f32 %v3347_v32, %v3345_v36  ;;  %v3014_v40 = vadd.s32 536870912, %v3013_v7  ;;  %v3070_v35 = vshrl.u32 %v3069_v58, 5 }
 0x364   :  { %3811 = vst [vmem:[#allocation2 + $0xd0] sm:$0xff] %v3264_v22  ;;  %v3077_v27 = vshll.u32 %v7238_v51, %v3071_v44  ;;  %v3080_v41 = vshll.u32 %v7239_v47, %v3071_v44  ;;  %v3084_v59 = vshrl.u32 %v7241_v55, %v3072_v6  ;;  %v3076_v63 = vor.u32 %v3075_v61, %v3074_v13 }
 0x365   :  { %v3349_v29 = vxor.u32 2147483648, %v3348_v17  ;;  %v3015_v20 = vshrl.u32 %v3014_v40, 30  ;;  %v3083_v12 = vshll.u32 %v7240_v19, %v3071_v44  ;;  %v3086_v39 = vshll.u32 %v7241_v55, %v3071_v44 }
 0x366   :  { %v3079_v14 = vor.u32 %v3078_v38, %v3077_v27  ;;  %v3082_v26 = vor.u32 %v3081_v46, %v3080_v41  ;;  %v3087_v52 = vshrl.u32 %v7245_v45, %v3072_v6  ;;  %v6845_v2 = vshll.u32 %v3065_v21, 8 }
 0x367   :  { %v3350_v37 = vsel %vm3267_vm8, %v3349_v29, %v3348_v17  ;;  %v3016_v42 = vshll.u32 %v3015_v20, 30  ;;  %v3085_v62 = vor.u32 %v3084_v59, %v3083_v12  ;;  %v6850_v58 = vand.u32 3, %v3358_v34 }
 0x368   :  { %v3353_v31 = vsel %vm6773_vm9, %v6500_v30, %v3350_v37  ;;  %v3073_v23 = vshrl.u32 %v7237_v0, %v3072_v6  ;;  %v3088_v9 = vor.u32 %v3087_v52, %v3086_v39  ;;  %vm3089_vm5 = vcmp.lt.s32.totalorder %v3070_v35, 1 }
 0x369   :  { %4233 = vcosq.f32 %v3353_v31  ;;  %v6853_v33 = vsub.s32 %v3013_v7, %v3016_v42  ;;  %vm3092_vm6 = vcmp.lt.s32.totalorder %v3070_v35, 4  ;;  %vm3090_vm7 = vcmp.lt.s32.totalorder %v3070_v35, 2 }
 0x36a   :  { %4235 = vsinq.f32 %v3353_v31  ;;  %v3094_v10 = vsel %vm3092_vm6, %v3082_v26, 2102212464  ;;  %v3097_v3 = vsel %vm3089_vm5, %v3076_v63, %v3079_v14  ;;  %v3039_v44 = vsub.s32 4, %v3015_v20 }
 0x36b   :  { %v3019_v1 = vsub.s32 0, %v6853_v33  ;;  %vm3091_vm8 = vcmp.lt.s32.totalorder %v3070_v35, 3  ;;  %v3098_v15 = vsel %vm3092_vm6, %v3085_v62, 920167782  ;;  %v3093_v60 = vsel %vm3089_vm5, %v3073_v23, %v3076_v63 }
 0x36c   :  { %v3099_v11 = vsel %vm3091_vm8, %v3082_v26, %v3098_v15  ;;  %v3101_v4 = vsel %vm3089_vm5, %v3079_v14, %v3082_v26  ;;  %v3102_v53 = vsel %vm3092_vm6, %v3088_v9, 1326507024  ;;  %v3095_v49 = vsel %vm3091_vm8, %v3079_v14, %v3094_v10  ;;  %v386_v14 = vpop.permute.xlu0 %385 }
 0x36d   :  { %v3962_v5 = vmin.u32 %v3019_v1, %v6853_v33  ;;  %v3100_v6 = vsel %vm3090_vm7, %v3097_v3, %v3099_v11  ;;  %v3103_v48 = vsel %vm3091_vm8, %v3085_v62, %v3102_v53  ;;  %vm2955_vm9 = vcmp.lt.s32.totalorder %v6592_v8, 0  ;;  %v7336_v3 = vld [vmem:[#allocation29_spill] sm:$0xff] }
 0x36e   :  { %v3104_v34 = vsel %vm3090_vm7, %v3101_v4, %v3103_v48  ;;  %v6861_v56 = vmul.u32.u64.low %v6845_v2, %v3100_v6  ;;  %v6862_v21 = vmul.u32.u64.high %v6845_v2, %v3100_v6, %v6861_v56  ;;  %v3040_v36 = vsel %vm2955_vm9, %v3039_v44, %v3015_v20 }
 0x36f   :  { %v3021_v24 = vclz %v3962_v5  ;;  %vm3357_vm10 = vweird.f32 %v6500_v30  ;;  %v3096_v32 = vsel %vm3090_vm7, %v3093_v60, %v3095_v49  ;;  %v3577_v13 = vand.u32 2147483647, %v6813_v25  ;;  %v7337_v30 = vld [vmem:[#allocation41_spill] sm:$0xff] }
 0x370   :  { %v6869_v7 = vmul.u32.u64.low %v6845_v2, %v3104_v34  ;;  %v6870_v43 = vmul.u32.u64.high %v6845_v2, %v3104_v34, %v6869_v7  ;;  %vm3360_vm11 = vcmp.lt.s32.totalorder %v6850_v58, 2  ;;  %vm6876_vm12 = vcmp.le.f32.partialorder %v2953_v54, 0.7853982 }
 0x371   :  { %v3963_v38 = vadd.s32 4294967294, %v3021_v24  ;;  %v3580_v22 = vand.u32 2139095040, %v6813_v25  ;;  %vm3361_vm13 = vcmp.eq.s32.totalorder %v6850_v58, 0  ;;  %vm3364_vm14 = vcmp.eq.s32.totalorder %v6850_v58, 2 }
 0x372   :  { %v3009_v17 = vadd.s32 %v6802_v18, %v6799_v57  ;;  %v3115_v40 = vadd.s32 1, %v6862_v21  ;;  %v3042_v54 = vsel %vm6876_vm12, 0, %v3040_v36  ;;  %v3112_v35 = vmul.u32 %v6845_v2, %v3096_v32 }
 0x373   :  { %v4234_v46 = vpop.eup %4233  ;;  %vm3964_vm15 = vcmp.lt.s32.totalorder %v3963_v38, 0  ;;  %v3581_v27 = vshrl.u32 %v3580_v22, 23  ;;  %vm3114_vm0 = vc.u32 %v6870_v43, %v6861_v56  ;;  %v3584_v20 = vand.u32 8388607, %v3577_v13 }
 0x374   :  { %v4236_v41 = vpop.eup %4235  ;;  %v3365_v59 = vxor.u32 2147483648, %v4234_v46  ;;  %v3024_v29 = vsel %vm3964_vm15, 0, %v3963_v38  ;;  %v3684_v12 = vand.u32 2139095040, %v6816_v16  ;;  %v3116_v52 = vsel %vm3114_vm0, %v3115_v40, %v6862_v21 }
 0x375   :  { %v3362_v63 = vxor.u32 2147483648, %v4236_v41  ;;  %v3025_v57 = vsub.s32 32, %v3024_v29  ;;  %v3029_v18 = vsub.s32 4294967266, %v3024_v29  ;;  %v3026_v39 = vshll.u32 %v6853_v33, %v3024_v29 }
 0x376   :  { %v3366_v26 = vsel %vm3364_vm14, %v3365_v59, %v4236_v41  ;;  %v3985_v37 = vadd.s32 4294967169, %v3581_v27  ;;  %v3117_v31 = vadd.s32 %v3116_v52, %v3112_v35  ;;  %v3046_v9 = vadd.s32 3, %v3042_v54 }
 0x377   :  { %v3363_v42 = vsel %vm3361_vm13, %v4234_v46, %v3362_v63  ;;  %v3027_v62 = vshrl.u32 %v3009_v17, %v3025_v57  ;;  %v3030_v2 = vadd.s32 127, %v3029_v18  ;;  %v421_v1 = vadd.f32 %v386_v14, %v7336_v3 }
 0x378   :  { %v3367_v23 = vsel %vm3360_vm11, %v3363_v42, %v3366_v26  ;;  %v3587_v10 = vadd.s32 1, %v3985_v37  ;;  %v3118_v60 = vadd.s32 536870912, %v3117_v31  ;;  %v3585_v11 = vor.u32 8388608, %v3584_v20 }
 0x379   :  { %v3368_v44 = vsel %vm3357_vm10, nan, %v3367_v23  ;;  %v3028_v33 = vor.u32 %v3027_v62, %v3026_v39  ;;  %v3031_v15 = vshll.u32 %v3030_v2, 23  ;;  %v3685_v49 = vshrl.u32 %v3684_v12, 23 }
 0x37a   :  { %3812 = vst [vmem:[#allocation2 + $0xd8] sm:$0xff] %v3368_v44  ;;  %vm3588_vm1 = vcmp.gt.s32.totalorder %v3587_v10, 0  ;;  %v3119_v53 = vshrl.u32 %v3118_v60, 30  ;;  %v6904_v6 = vand.u32 3, %v3046_v9  ;;  %vm3059_vm2 = vcmp.lt.s32.totalorder %v6652_v28, 0  ;;  %v7338_v9 = vld [vmem:[#allocation30_spill] sm:$0xff] }
 0x37b   :  { %v3032_v4 = vor.u32 4788187, %v3031_v15  ;;  %v3589_v5 = vsel %vm3588_vm1, %v3587_v10, 0  ;;  %v3035_v34 = vcvt.s32.f32 %v3028_v33  ;;  %v6908_v24 = vadd.f32 %v421_v1, %v7337_v30 }
 0x37c   :  { %v3591_v58 = vand.u32 31, %v3589_v5  ;;  %v3120_v21 = vshll.u32 %v3119_v53, 30  ;;  %v3113_v36 = vadd.s32 %v6861_v56, %v6870_v43  ;;  %v6911_v7 = vshll.u32 %v3585_v11, 8 }
 0x37d   :  { %v3033_v48 = vand.u32 2147483647, %v3032_v4  ;;  %v3681_v38 = vand.u32 2147483647, %v6816_v16  ;;  %v3590_v40 = vshrl.u32 %v3589_v5, 5  ;;  %v3989_v46 = vadd.s32 4294967169, %v3685_v49 }
 0x37e   :  { %v3592_v32 = vsub.s32 32, %v3591_v58  ;;  %v6914_v17 = vsub.s32 %v3117_v31, %v3120_v21  ;;  %v3143_v54 = vsub.s32 4, %v3119_v53  ;;  %v3594_v35 = vshll.u32 %v7237_v0, %v3591_v58 }
 0x37f   :  { %v3036_v22 = vmul.f32 %v3035_v34, %v3033_v48  ;;  %v3597_v43 = vshll.u32 %v7238_v51, %v3591_v58  ;;  %v3600_v63 = vshll.u32 %v7239_v47, %v3591_v58  ;;  %v3603_v57 = vshll.u32 %v7240_v19, %v3591_v58 }
 0x380   :  { %v3595_v27 = vshrl.u32 %v7238_v51, %v3592_v32  ;;  %v3598_v41 = vshrl.u32 %v7239_v47, %v3592_v32  ;;  %v3123_v56 = vsub.s32 0, %v6914_v17  ;;  %v3601_v29 = vshrl.u32 %v7240_v19, %v3592_v32 }
 0x381   :  { %v3037_v59 = vxor.u32 2147483648, %v3036_v22  ;;  %v3604_v18 = vshrl.u32 %v7241_v55, %v3592_v32  ;;  %v3606_v52 = vshll.u32 %v7241_v55, %v3591_v58  ;;  %v3607_v2 = vshrl.u32 %v7245_v45, %v3592_v32 }
 0x382   :  { %v3596_v20 = vor.u32 %v3595_v27, %v3594_v35  ;;  %v3966_v26 = vmin.u32 %v3123_v56, %v6914_v17  ;;  %v3599_v39 = vor.u32 %v3598_v41, %v3597_v43  ;;  %v3602_v42 = vor.u32 %v3601_v29, %v3600_v63  ;;  %v7341_v29 = vld [vmem:[#allocation42_spill] sm:$0xff] }
 0x383   :  { %v3038_v12 = vsel %vm2955_vm9, %v3037_v59, %v3036_v22  ;;  %v3605_v62 = vor.u32 %v3604_v18, %v3603_v57  ;;  %v3691_v23 = vadd.s32 1, %v3989_v46  ;;  %v422_v10 = vadd.f32 %v386_v14, %v7338_v9 }
 0x384   :  { %v3041_v37 = vsel %vm6876_vm12, %v6592_v8, %v3038_v12  ;;  %v3125_v31 = vclz %v3966_v26  ;;  %v3144_v3 = vsel %vm3059_vm2, %v3143_v54, %v3119_v53  ;;  %v3593_v1 = vshrl.u32 %v7237_v0, %v3592_v32 }
 0x385   :  { %4237 = vcosq.f32 %v3041_v37  ;;  %v3608_v44 = vor.u32 %v3607_v2, %v3606_v52  ;;  %vm6939_vm3 = vcmp.le.f32.partialorder %v3057_v50, 0.7853982  ;;  %vm3609_vm4 = vcmp.lt.s32.totalorder %v3590_v40, 1 }
 0x386   :  { %4239 = vsinq.f32 %v3041_v37  ;;  %v3967_v33 = vadd.s32 4294967294, %v3125_v31  ;;  %vm3611_vm5 = vcmp.lt.s32.totalorder %v3590_v40, 3  ;;  %vm3612_vm6 = vcmp.lt.s32.totalorder %v3590_v40, 4 }
 0x387   :  { %v3614_v15 = vsel %vm3612_vm6, %v3602_v42, 2102212464  ;;  %v3617_v60 = vsel %vm3609_vm4, %v3596_v20, %v3599_v39  ;;  %v3618_v14 = vsel %vm3612_vm6, %v3605_v62, 920167782  ;;  %v3621_v11 = vsel %vm3609_vm4, %v3599_v39, %v3602_v42 }
 0x388   :  { %vm3968_vm7 = vcmp.lt.s32.totalorder %v3967_v33, 0  ;;  %vm3610_vm8 = vcmp.lt.s32.totalorder %v3590_v40, 2  ;;  %v3619_v4 = vsel %vm3611_vm5, %v3602_v42, %v3618_v14  ;;  %v3622_v53 = vsel %vm3612_vm6, %v3608_v44, 1326507024 }
 0x389   :  { %v3128_v5 = vsel %vm3968_vm7, 0, %v3967_v33  ;;  %v3613_v49 = vsel %vm3609_vm4, %v3593_v1, %v3596_v20  ;;  %v3620_v50 = vsel %vm3610_vm8, %v3617_v60, %v3619_v4  ;;  %v3623_v58 = vsel %vm3611_vm5, %v3605_v62, %v3622_v53 }
 0x38a   :  { %vm3048_vm9 = vcmp.lt.s32.totalorder %v6904_v6, 2  ;;  %v3129_v48 = vsub.s32 32, %v3128_v5  ;;  %v3133_v34 = vsub.s32 4294967266, %v3128_v5  ;;  %v3615_v21 = vsel %vm3611_vm5, %v3599_v39, %v3614_v15 }
 0x38b   :  { %v3624_v30 = vsel %vm3610_vm8, %v3621_v11, %v3623_v58  ;;  %vm3045_vm10 = vweird.f32 %v6592_v8  ;;  %v6955_v46 = vmul.u32.u64.low %v6911_v7, %v3620_v50  ;;  %v6956_v54 = vmul.u32.u64.high %v6911_v7, %v3620_v50, %v6955_v46 }
 0x38c   :  { %v6951_v32 = vmul.u32.u64.low %v6911_v7, %v3624_v30  ;;  %v6952_v22 = vmul.u32.u64.high %v6911_v7, %v3624_v30, %v6951_v32  ;;  %v3130_v35 = vshll.u32 %v6914_v17, %v3128_v5  ;;  %v3131_v27 = vshrl.u32 %v3113_v36, %v3129_v48 }
 0x38d   :  { %v3134_v41 = vadd.s32 127, %v3133_v34  ;;  %vm3692_vm11 = vcmp.gt.s32.totalorder %v3691_v23, 0  ;;  %v3616_v59 = vsel %vm3610_vm8, %v3613_v49, %v3615_v21  ;;  %v3688_v56 = vand.u32 8388607, %v3681_v38 }
 0x38e   :  { %v3693_v43 = vsel %vm3692_vm11, %v3691_v23, 0  ;;  %v6964_v20 = vadd.f32 %v422_v10, %v7341_v29  ;;  %vm3052_vm12 = vcmp.eq.s32.totalorder %v6904_v6, 2  ;;  %v3132_v57 = vor.u32 %v3131_v27, %v3130_v35 }
 0x38f   :  { %v4238_v63 = vpop.eup %4237  ;;  %v3135_v18 = vshll.u32 %v3134_v41, 23  ;;  %v3695_v12 = vand.u32 31, %v3693_v43  ;;  %v3146_v36 = vsel %vm6939_vm3, 0, %v3144_v3  ;;  %vm3634_vm13 = vc.u32 %v6952_v22, %v6955_v46 }
 0x390   :  { %v4240_v26 = vpop.eup %4239  ;;  %v3053_v17 = vxor.u32 2147483648, %v4238_v63  ;;  %v3635_v40 = vadd.s32 1, %v6956_v54  ;;  %v3632_v37 = vmul.u32 %v6911_v7, %v3616_v59  ;;  %vm3049_vm14 = vcmp.eq.s32.totalorder %v6904_v6, 0 }
 0x391   :  { %v3050_v39 = vxor.u32 2147483648, %v4240_v26  ;;  %v3136_v52 = vor.u32 4788187, %v3135_v18  ;;  %v3696_v42 = vsub.s32 32, %v3695_v12  ;;  %v3689_v31 = vor.u32 8388608, %v3688_v56 }
 0x392   :  { %v3054_v62 = vsel %vm3052_vm12, %v3053_v17, %v4240_v26  ;;  %v3636_v2 = vsel %vm3634_vm13, %v3635_v40, %v6956_v54  ;;  %v3139_v10 = vcvt.s32.f32 %v3132_v57  ;;  %v3150_v44 = vadd.s32 3, %v3146_v36 }
 0x393   :  { %v3051_v23 = vsel %vm3049_vm14, %v4238_v63, %v3050_v39  ;;  %v3137_v9 = vand.u32 2147483647, %v3136_v52  ;;  %v3637_v3 = vadd.s32 %v3636_v2, %v3632_v37  ;;  %v3699_v33 = vshrl.u32 %v7238_v51, %v3696_v42 }
 0x394   :  { %v3055_v1 = vsel %vm3048_vm9, %v3051_v23, %v3054_v62  ;;  %v3702_v15 = vshrl.u32 %v7239_v47, %v3696_v42  ;;  %v3705_v11 = vshrl.u32 %v7240_v19, %v3696_v42  ;;  %v3694_v4 = vshrl.u32 %v3693_v43, 5 }
 0x395   :  { %v3056_v7 = vsel %vm3045_vm10, nan, %v3055_v1  ;;  %v3140_v60 = vmul.f32 %v3139_v10, %v3137_v9  ;;  %v3638_v14 = vadd.s32 536870912, %v3637_v3  ;;  %v3698_v53 = vshll.u32 %v7237_v0, %v3695_v12 }
 0x396   :  { %3809 = vst [vmem:[#allocation2 + $0xc0] sm:$0xff] %v3056_v7  ;;  %v3701_v5 = vshll.u32 %v7238_v51, %v3695_v12  ;;  %v3708_v6 = vshrl.u32 %v7241_v55, %v3696_v42  ;;  %v3704_v58 = vshll.u32 %v7239_v47, %v3695_v12  ;;  %v3707_v48 = vshll.u32 %v7240_v19, %v3695_v12 }
 0x397   :  { %v3141_v49 = vxor.u32 2147483648, %v3140_v60  ;;  %v3639_v50 = vshrl.u32 %v3638_v14, 30  ;;  %v3700_v8 = vor.u32 %v3699_v33, %v3698_v53  ;;  %v3710_v21 = vshll.u32 %v7241_v55, %v3695_v12 }
 0x398   :  { %v3703_v34 = vor.u32 %v3702_v15, %v3701_v5  ;;  %v3711_v30 = vshrl.u32 %v7245_v45, %v3696_v42  ;;  %v3706_v35 = vor.u32 %v3705_v11, %v3704_v58  ;;  %v3709_v27 = vor.u32 %v3708_v6, %v3707_v48 }
 0x399   :  { %v3142_v32 = vsel %vm3059_vm2, %v3141_v49, %v3140_v60  ;;  %v3640_v54 = vshll.u32 %v3639_v50, 30  ;;  %v6994_v59 = vand.u32 3, %v3150_v44  ;;  %v3729_v43 = vshll.u32 %v3689_v31, 8 }
 0x39a   :  { %v3145_v41 = vsel %vm6939_vm3, %v6652_v28, %v3142_v32  ;;  %v3712_v56 = vor.u32 %v3711_v30, %v3710_v21  ;;  %v3697_v63 = vshrl.u32 %v7237_v0, %v3696_v42  ;;  %vm3713_vm15 = vcmp.lt.s32.totalorder %v3694_v4, 1 }
 0x39b   :  { %4241 = vcosq.f32 %v3145_v41  ;;  %v6996_v29 = vsub.s32 %v3637_v3, %v3640_v54  ;;  %vm3714_vm0 = vcmp.lt.s32.totalorder %v3694_v4, 2  ;;  %vm3716_vm1 = vcmp.lt.s32.totalorder %v3694_v4, 4 }
 0x39c   :  { %4243 = vsinq.f32 %v3145_v41  ;;  %v3721_v57 = vsel %vm3713_vm15, %v3700_v8, %v3703_v34  ;;  %vm3715_vm2 = vcmp.lt.s32.totalorder %v3694_v4, 3  ;;  %v3718_v12 = vsel %vm3716_vm1, %v3706_v35, 2102212464 }
 0x39d   :  { %v3643_v18 = vsub.s32 0, %v6996_v29  ;;  %v3722_v61 = vsel %vm3716_vm1, %v3709_v27, 920167782  ;;  %v3663_v26 = vsub.s32 4, %v3639_v50  ;;  %v3725_v36 = vsel %vm3713_vm15, %v3703_v34, %v3706_v35 }
 0x39e   :  { %v3723_v17 = vsel %vm3715_vm2, %v3706_v35, %v3722_v61  ;;  %v3726_v40 = vsel %vm3716_vm1, %v3712_v56, 1326507024  ;;  %v3717_v52 = vsel %vm3713_vm15, %v3697_v63, %v3700_v8  ;;  %v3719_v62 = vsel %vm3715_vm2, %v3703_v34, %v3718_v12 }
 0x39f   :  { %v3986_v39 = vmin.u32 %v3643_v18, %v6996_v29  ;;  %v3724_v37 = vsel %vm3714_vm0, %v3721_v57, %v3723_v17  ;;  %v3727_v42 = vsel %vm3715_vm2, %v3709_v27, %v3726_v40  ;;  %vm3579_vm3 = vcmp.lt.s32.totalorder %v6813_v25, 0 }
 0x3a0   :  { %v3728_v2 = vsel %vm3714_vm0, %v3725_v36, %v3727_v42  ;;  %v7003_v31 = vmul.u32.u64.low %v3729_v43, %v3724_v37  ;;  %v7004_v23 = vmul.u32.u64.high %v3729_v43, %v3724_v37, %v7003_v31  ;;  %v3664_v10 = vsel %vm3579_vm3, %v3663_v26, %v3639_v50 }
 0x3a1   :  { %v3645_v9 = vclz %v3986_v39  ;;  %v7010_v3 = vmul.u32.u64.low %v3729_v43, %v3728_v2  ;;  %v7011_v1 = vmul.u32.u64.high %v3729_v43, %v3728_v2, %v7010_v3  ;;  %v3372_v44 = vand.u32 2139095040, %v6908_v24 }
 0x3a2   :  { %vm3152_vm4 = vcmp.lt.s32.totalorder %v6994_v59, 2  ;;  %vm7017_vm5 = vcmp.le.f32.partialorder %v3577_v13, 0.7853982  ;;  %v3720_v7 = vsel %vm3714_vm0, %v3717_v52, %v3719_v62  ;;  %vm3153_vm6 = vcmp.eq.s32.totalorder %v6994_v59, 0 }
 0x3a3   :  { %v3987_v15 = vadd.s32 4294967294, %v3645_v9  ;;  %vm3156_vm7 = vcmp.eq.s32.totalorder %v6994_v59, 2  ;;  %v3739_v60 = vadd.s32 1, %v7004_v23  ;;  %v3373_v14 = vshrl.u32 %v3372_v44, 23 }
 0x3a4   :  { %v3633_v53 = vadd.s32 %v6955_v46, %v6952_v22  ;;  %v3666_v13 = vsel %vm7017_vm5, 0, %v3664_v10  ;;  %v3369_v5 = vand.u32 2147483647, %v6908_v24  ;;  %v3736_v50 = vmul.u32 %v3729_v43, %v3720_v7 }
 0x3a5   :  { %v4242_v11 = vpop.eup %4241  ;;  %vm3988_vm8 = vcmp.lt.s32.totalorder %v3987_v15, 0  ;;  %vm3738_vm9 = vc.u32 %v7011_v1, %v7003_v31  ;;  %v3476_v34 = vand.u32 2139095040, %v6964_v20  ;;  %v3977_v30 = vadd.s32 4294967169, %v3373_v14 }
 0x3a6   :  { %v4244_v6 = vpop.eup %4243  ;;  %v3157_v4 = vxor.u32 2147483648, %v4242_v11  ;;  %v3648_v49 = vsel %vm3988_vm8, 0, %v3987_v15  ;;  %v3740_v21 = vsel %vm3738_vm9, %v3739_v60, %v7004_v23  ;;  %vm3149_vm10 = vweird.f32 %v6652_v28 }
 0x3a7   :  { %v3154_v58 = vxor.u32 2147483648, %v4244_v6  ;;  %v3649_v48 = vsub.s32 32, %v3648_v49  ;;  %v3653_v8 = vsub.s32 4294967266, %v3648_v49  ;;  %v3650_v46 = vshll.u32 %v6996_v29, %v3648_v49 }
 0x3a8   :  { %v3158_v22 = vsel %vm3156_vm7, %v3157_v4, %v4244_v6  ;;  %v3741_v27 = vadd.s32 %v3740_v21, %v3736_v50  ;;  %v3379_v56 = vadd.s32 1, %v3977_v30  ;;  %v3670_v29 = vadd.s32 3, %v3666_v13 }
 0x3a9   :  { %v3155_v32 = vsel %vm3153_vm6, %v4242_v11, %v3154_v58  ;;  %v3651_v54 = vshrl.u32 %v3633_v53, %v3649_v48  ;;  %v3654_v35 = vadd.s32 127, %v3653_v8  ;;  %v3376_v12 = vand.u32 8388607, %v3369_v5 }
 0x3aa   :  { %v3159_v41 = vsel %vm3152_vm4, %v3155_v32, %v3158_v22  ;;  %v3742_v18 = vadd.s32 536870912, %v3741_v27  ;;  %vm3380_vm11 = vcmp.gt.s32.totalorder %v3379_v56, 0  ;;  %v3477_v36 = vshrl.u32 %v3476_v34, 23 }
 0x3ab   :  { %v3160_v43 = vsel %vm3149_vm10, nan, %v3159_v41  ;;  %v3652_v63 = vor.u32 %v3651_v54, %v3650_v46  ;;  %v3655_v57 = vshll.u32 %v3654_v35, 23  ;;  %v3381_v17 = vsel %vm3380_vm11, %v3379_v56, 0 }
 0x3ac   :  { %3810 = vst [vmem:[#allocation2 + $0xc8] sm:$0xff] %v3160_v43  ;;  %v7044_v26 = vshrl.u32 %v3742_v18, 30  ;;  %v3383_v28 = vand.u32 31, %v3381_v17  ;;  %v7047_v52 = vand.u32 3, %v3670_v29  ;;  %v3473_v42 = vand.u32 2147483647, %v6964_v20 }
 0x3ad   :  { %v3656_v61 = vor.u32 4788187, %v3655_v57  ;;  %v3659_v59 = vcvt.s32.f32 %v3652_v63  ;;  %v3377_v23 = vor.u32 8388608, %v3376_v12  ;;  %v3981_v9 = vadd.s32 4294967169, %v3477_v36 }
 0x3ae   :  { %v3744_v39 = vshll.u32 %v7044_v26, 30  ;;  %v3384_v37 = vsub.s32 32, %v3383_v28  ;;  %v3382_v10 = vshrl.u32 %v3381_v17, 5  ;;  %v3386_v3 = vshll.u32 %v7237_v0, %v3383_v28 }
 0x3af   :  { %v3657_v40 = vand.u32 2147483647, %v3656_v61  ;;  %v3389_v14 = vshll.u32 %v7238_v51, %v3383_v28  ;;  %v3392_v13 = vshll.u32 %v7239_v47, %v3383_v28  ;;  %v3395_v6 = vshll.u32 %v7240_v19, %v3383_v28 }
 0x3b0   :  { %v7050_v2 = vsub.s32 %v3741_v27, %v3744_v39  ;;  %v3387_v44 = vshrl.u32 %v7238_v51, %v3384_v37  ;;  %v3390_v15 = vshrl.u32 %v7239_v47, %v3384_v37  ;;  %v3393_v11 = vshrl.u32 %v7240_v19, %v3384_v37 }
 0x3b1   :  { %v3660_v62 = vmul.f32 %v3659_v59, %v3657_v40  ;;  %v3396_v4 = vshrl.u32 %v7241_v55, %v3384_v37  ;;  %v3398_v48 = vshll.u32 %v7241_v55, %v3383_v28  ;;  %v3399_v46 = vshrl.u32 %v7245_v45, %v3384_v37 }
 0x3b2   :  { %v3747_v60 = vsub.s32 0, %v7050_v2  ;;  %v3388_v53 = vor.u32 %v3387_v44, %v3386_v3  ;;  %v3391_v58 = vor.u32 %v3390_v15, %v3389_v14  ;;  %v3394_v34 = vor.u32 %v3393_v11, %v3392_v13 }
 0x3b3   :  { %v3661_v7 = vxor.u32 2147483648, %v3660_v62  ;;  %v3397_v22 = vor.u32 %v3396_v4, %v3395_v6  ;;  %v3737_v21 = vadd.s32 %v7003_v31, %v7011_v1  ;;  %v3417_v32 = vshll.u32 %v3377_v23, 8 }
 0x3b4   :  { %v3990_v50 = vmin.u32 %v3747_v60, %v7050_v2  ;;  %v3385_v54 = vshrl.u32 %v7237_v0, %v3384_v37  ;;  %v3400_v35 = vor.u32 %v3399_v46, %v3398_v48  ;;  %v3483_v27 = vadd.s32 1, %v3981_v9 }
 0x3b5   :  { %v3662_v49 = vsel %vm3579_vm3, %v3661_v7, %v3660_v62  ;;  %vm3401_vm12 = vcmp.lt.s32.totalorder %v3382_v10, 1  ;;  %vm3403_vm13 = vcmp.lt.s32.totalorder %v3382_v10, 3  ;;  %vm3404_vm14 = vcmp.lt.s32.totalorder %v3382_v10, 4 }
 0x3b6   :  { %v3665_v8 = vsel %vm7017_vm5, %v6813_v25, %v3662_v49  ;;  %v3749_v30 = vclz %v3990_v50  ;;  %v3406_v33 = vsel %vm3404_vm14, %v3394_v34, 2102212464  ;;  %v3409_v56 = vsel %vm3401_vm12, %v3388_v53, %v3391_v58 }
 0x3b7   :  { %4245 = vcosq.f32 %v3665_v8  ;;  %v3410_v43 = vsel %vm3404_vm14, %v3397_v22, 920167782  ;;  %v3413_v63 = vsel %vm3401_vm12, %v3391_v58, %v3394_v34  ;;  %vm3402_vm0 = vcmp.lt.s32.totalorder %v3382_v10, 2 }
 0x3b8   :  { %4247 = vsinq.f32 %v3665_v8  ;;  %v3991_v41 = vadd.s32 4294967294, %v3749_v30  ;;  %v3411_v57 = vsel %vm3403_vm13, %v3394_v34, %v3410_v43  ;;  %v3414_v31 = vsel %vm3404_vm14, %v3400_v35, 1326507024 }
 0x3b9   :  { %v3405_v18 = vsel %vm3401_vm12, %v3385_v54, %v3388_v53  ;;  %v3412_v29 = vsel %vm3402_vm0, %v3409_v56, %v3411_v57  ;;  %v3415_v12 = vsel %vm3403_vm13, %v3397_v22, %v3414_v31  ;;  %vm3683_vm1 = vcmp.lt.s32.totalorder %v6816_v16, 0 }
 0x3ba   :  { %vm3992_vm15 = vcmp.lt.s32.totalorder %v3991_v41, 0  ;;  %v3407_v36 = vsel %vm3403_vm13, %v3391_v58, %v3406_v33  ;;  %v3416_v28 = vsel %vm3402_vm0, %v3413_v63, %v3415_v12  ;;  %vm3669_vm2 = vweird.f32 %v6813_v25 }
 0x3bb   :  { %v3752_v1 = vsel %vm3992_vm15, 0, %v3991_v41  ;;  %v7079_v40 = vmul.u32.u64.low %v3417_v32, %v3416_v28  ;;  %v7080_v59 = vmul.u32.u64.high %v3417_v32, %v3416_v28, %v7079_v40  ;;  %vm3484_vm3 = vcmp.gt.s32.totalorder %v3483_v27, 0 }
 0x3bc   :  { %v3753_v61 = vsub.s32 32, %v3752_v1  ;;  %v3757_v17 = vsub.s32 4294967266, %v3752_v1  ;;  %v7082_v39 = vmul.u32.u64.low %v3417_v32, %v3412_v29  ;;  %v7083_v37 = vmul.u32.u64.high %v3417_v32, %v3412_v29, %v7082_v39 }
 0x3bd   :  { %v3754_v62 = vshll.u32 %v7050_v2, %v3752_v1  ;;  %vm3672_vm4 = vcmp.lt.s32.totalorder %v7047_v52, 2  ;;  %v3408_v3 = vsel %vm3402_vm0, %v3405_v18, %v3407_v36  ;;  %v3480_v44 = vand.u32 8388607, %v3473_v42 }
 0x3be   :  { %v3755_v23 = vshrl.u32 %v3737_v21, %v3753_v61  ;;  %v3758_v9 = vadd.s32 127, %v3757_v17  ;;  %v3485_v15 = vsel %vm3484_vm3, %v3483_v27, 0  ;;  %vm3676_vm5 = vcmp.eq.s32.totalorder %v7047_v52, 2 }
 0x3bf   :  { %v3487_v11 = vand.u32 31, %v3485_v15  ;;  %vm7094_vm6 = vcmp.le.f32.partialorder %v3681_v38, 0.7853982  ;;  %v3767_v10 = vsub.s32 4, %v7044_v26  ;;  %vm3426_vm7 = vc.u32 %v7080_v59, %v7082_v39 }
 0x3c0   :  { %v3756_v60 = vor.u32 %v3755_v23, %v3754_v62  ;;  %v3759_v14 = vshll.u32 %v3758_v9, 23  ;;  %v3427_v6 = vadd.s32 1, %v7083_v37  ;;  %v3424_v50 = vmul.u32 %v3417_v32, %v3408_v3 }
 0x3c1   :  { %v4246_v7 = vpop.eup %4245  ;;  %v3488_v58 = vsub.s32 32, %v3487_v11  ;;  %vm3673_vm8 = vcmp.eq.s32.totalorder %v7047_v52, 0  ;;  %v3481_v38 = vor.u32 8388608, %v3480_v44  ;;  %v3768_v54 = vsel %vm3683_vm1, %v3767_v10, %v7044_v26 }
 0x3c2   :  { %v4248_v53 = vpop.eup %4247  ;;  %v3677_v13 = vxor.u32 2147483648, %v4246_v7  ;;  %v3760_v49 = vor.u32 4788187, %v3759_v14  ;;  %v3428_v8 = vsel %vm3426_vm7, %v3427_v6, %v7083_v37  ;;  %v3763_v46 = vcvt.s32.f32 %v3756_v60 }
 0x3c3   :  { %v3674_v4 = vxor.u32 2147483648, %v4248_v53  ;;  %v3429_v21 = vadd.s32 %v3428_v8, %v3424_v50  ;;  %v3491_v32 = vshrl.u32 %v7238_v51, %v3488_v58  ;;  %v3494_v35 = vshrl.u32 %v7239_v47, %v3488_v58 }
 0x3c4   :  { %v3678_v48 = vsel %vm3676_vm5, %v3677_v13, %v4248_v53  ;;  %v3761_v22 = vand.u32 2147483647, %v3760_v49  ;;  %v3486_v56 = vshrl.u32 %v3485_v15, 5  ;;  %v3490_v43 = vshll.u32 %v7237_v0, %v3487_v11 }
 0x3c5   :  { %v3675_v34 = vsel %vm3673_vm8, %v4246_v7, %v3674_v4  ;;  %v3430_v33 = vadd.s32 536870912, %v3429_v21  ;;  %v3493_v52 = vshll.u32 %v7238_v51, %v3487_v11  ;;  %v3497_v63 = vshrl.u32 %v7240_v19, %v3488_v58 }
 0x3c6   :  { %v3679_v30 = vsel %vm3672_vm4, %v3675_v34, %v3678_v48  ;;  %v3764_v41 = vmul.f32 %v3763_v46, %v3761_v22  ;;  %v3500_v57 = vshrl.u32 %v7241_v55, %v3488_v58  ;;  %v3496_v1 = vshll.u32 %v7239_v47, %v3487_v11 }
 0x3c7   :  { %v3680_v27 = vsel %vm3669_vm2, nan, %v3679_v30  ;;  %v7117_v31 = vshrl.u32 %v3430_v33, 30  ;;  %v3499_v25 = vshll.u32 %v7240_v19, %v3487_v11  ;;  %v3492_v18 = vor.u32 %v3491_v32, %v3490_v43 }
 0x3c8   :  { %3815 = vst [vmem:[#allocation2 + $0xf0] sm:$0xff] %v3680_v27  ;;  %v3765_v26 = vxor.u32 2147483648, %v3764_v41  ;;  %v3495_v29 = vor.u32 %v3494_v35, %v3493_v52  ;;  %v3502_v12 = vshll.u32 %v7241_v55, %v3487_v11  ;;  %v3503_v61 = vshrl.u32 %v7245_v45, %v3488_v58 }
 0x3c9   :  { %v3770_v17 = vsel %vm7094_vm6, 0, %v3768_v54  ;;  %v3432_v36 = vshll.u32 %v7117_v31, 30  ;;  %v3501_v28 = vor.u32 %v3500_v57, %v3499_v25  ;;  %v3498_v19 = vor.u32 %v3497_v63, %v3496_v1 }
 0x3ca   :  { %v3766_v51 = vsel %vm3683_vm1, %v3765_v26, %v3764_v41  ;;  %v3504_v40 = vor.u32 %v3503_v61, %v3502_v12  ;;  %vm3505_vm9 = vcmp.lt.s32.totalorder %v3486_v56, 1  ;;  %v3521_v55 = vshll.u32 %v3481_v38, 8 }
 0x3cb   :  { %v3769_v47 = vsel %vm7094_vm6, %v6816_v16, %v3766_v51  ;;  %v3433_v37 = vsub.s32 %v3429_v21, %v3432_v36  ;;  %v3774_v45 = vadd.s32 3, %v3770_v17  ;;  %vm3508_vm10 = vcmp.lt.s32.totalorder %v3486_v56, 4 }
 0x3cc   :  { %4249 = vcosq.f32 %v3769_v47  ;;  %v3513_v62 = vsel %vm3505_vm9, %v3492_v18, %v3495_v29  ;;  %vm3506_vm11 = vcmp.lt.s32.totalorder %v3486_v56, 2  ;;  %vm3507_vm12 = vcmp.lt.s32.totalorder %v3486_v56, 3 }
 0x3cd   :  { %4251 = vsinq.f32 %v3769_v47  ;;  %v3435_v23 = vsub.s32 0, %v3433_v37  ;;  %v3514_v9 = vsel %vm3508_vm10, %v3501_v28, 920167782  ;;  %v3510_v3 = vsel %vm3508_vm10, %v3498_v19, 2102212464 }
 0x3ce   :  { %v3515_v44 = vsel %vm3507_vm12, %v3498_v19, %v3514_v9  ;;  %v3517_v15 = vsel %vm3505_vm9, %v3495_v29, %v3498_v19  ;;  %v3518_v7 = vsel %vm3508_vm10, %v3504_v40, 1326507024  ;;  %v3489_v14 = vshrl.u32 %v7237_v0, %v3488_v58 }
 0x3cf   :  { %v3978_v60 = vmin.u32 %v3435_v23, %v3433_v37  ;;  %v3516_v11 = vsel %vm3506_vm11, %v3513_v62, %v3515_v44  ;;  %v3519_v53 = vsel %vm3507_vm12, %v3501_v28, %v3518_v7  ;;  %v3775_v6 = vand.u32 3, %v3774_v45 }
 0x3d0   :  { %v3520_v13 = vsel %vm3506_vm11, %v3517_v15, %v3519_v53  ;;  %v7136_v2 = vmul.u32.u64.low %v3521_v55, %v3516_v11  ;;  %v7137_v10 = vmul.u32.u64.high %v3521_v55, %v3516_v11, %v7136_v2  ;;  %v3509_v49 = vsel %vm3505_vm9, %v3489_v14, %v3492_v18 }
 0x3d1   :  { %v3437_v4 = vclz %v3978_v60  ;;  %v3511_v50 = vsel %vm3507_vm12, %v3495_v29, %v3510_v3  ;;  %v7141_v48 = vmul.u32.u64.low %v3521_v55, %v3520_v13  ;;  %v7142_v8 = vmul.u32.u64.high %v3521_v55, %v3520_v13, %v7141_v48 }
 0x3d2   :  { %v3512_v0 = vsel %vm3506_vm11, %v3509_v49, %v3511_v50  ;;  %v3531_v58 = vadd.s32 1, %v7137_v10  ;;  %vm3776_vm13 = vcmp.lt.s32.totalorder %v3775_v6, 2  ;;  %vm3780_vm14 = vcmp.eq.s32.totalorder %v3775_v6, 2 }
 0x3d3   :  { %v3979_v38 = vadd.s32 4294967294, %v3437_v4  ;;  %v3425_v21 = vadd.s32 %v7082_v39, %v7080_v59  ;;  %vm3530_vm0 = vc.u32 %v7142_v8, %v7136_v2  ;;  %v3528_v27 = vmul.u32 %v3521_v55, %v3512_v0 }
 0x3d4   :  { %vm3777_vm1 = vcmp.eq.s32.totalorder %v3775_v6, 0  ;;  %v3532_v56 = vsel %vm3530_vm0, %v3531_v58, %v7137_v10  ;;  %vm3773_vm2 = vweird.f32 %v6816_v16  ;;  %v3455_v36 = vsub.s32 4, %v7117_v31 }
 0x3d5   :  { %vm3980_vm15 = vcmp.lt.s32.totalorder %v3979_v38, 0  ;;  %v3533_v57 = vadd.s32 %v3532_v56, %v3528_v27  ;;  %vm3371_vm3 = vcmp.lt.s32.totalorder %v6908_v24, 0  ;;  %vm3370_vm4 = vcmp.le.f32.partialorder %v3369_v5, 0.7853982 }
 0x3d6   :  { %v4250_v34 = vpop.eup %4249  ;;  %v3440_v30 = vsel %vm3980_vm15, 0, %v3979_v38  ;;  %v3456_v40 = vsel %vm3371_vm3, %v3455_v36, %v7117_v31  ;;  %v3529_v44 = vadd.s32 %v7136_v2, %v7142_v8  ;;  %vm3461_vm9 = vweird.f32 %v6908_v24 }
 0x3d7   :  { %v4252_v22 = vpop.eup %4251  ;;  %v3781_v46 = vxor.u32 2147483648, %v4250_v34  ;;  %v3441_v32 = vsub.s32 32, %v3440_v30  ;;  %v3445_v35 = vsub.s32 4294967266, %v3440_v30  ;;  %v3442_v33 = vshll.u32 %v3433_v37, %v3440_v30 }
 0x3d8   :  { %v3778_v54 = vxor.u32 2147483648, %v4252_v22  ;;  %v3534_v25 = vadd.s32 536870912, %v3533_v57  ;;  %v3458_v62 = vsel %vm3370_vm4, 0, %v3456_v40  ;;  %vm3475_vm10 = vcmp.lt.s32.totalorder %v6964_v20, 0 }
 0x3d9   :  { %v3782_v41 = vsel %vm3780_vm14, %v3781_v46, %v4252_v22  ;;  %v3443_v52 = vshrl.u32 %v3425_v21, %v3441_v32  ;;  %v3446_v63 = vadd.s32 127, %v3445_v35  ;;  %v3462_v9 = vadd.s32 3, %v3458_v62 }
 0x3da   :  { %v3779_v43 = vsel %vm3777_vm1, %v4250_v34, %v3778_v54  ;;  %v3535_v29 = vshrl.u32 %v3534_v25, 30  ;;  %vm3474_vm11 = vcmp.le.f32.partialorder %v3473_v42, 0.7853982  ;;  %vm3565_vm15 = vweird.f32 %v6964_v20 }
 0x3db   :  { %v3783_v59 = vsel %vm3776_vm13, %v3779_v43, %v3782_v41  ;;  %v3444_v26 = vor.u32 %v3443_v52, %v3442_v33  ;;  %v3447_v1 = vshll.u32 %v3446_v63, 23  ;;  %v3463_v5 = vand.u32 3, %v3462_v9 }
 0x3dc   :  { %v3784_v39 = vsel %vm3773_vm2, nan, %v3783_v59  ;;  %v3536_v51 = vshll.u32 %v3535_v29, 30  ;;  %v3559_v34 = vsub.s32 4, %v3535_v29 }
 0x3dd   :  { %3816 = vst [vmem:[#allocation2 + $0xf8] sm:$0xff] %v3784_v39  ;;  %v3448_v18 = vor.u32 4788187, %v3447_v1  ;;  %v3451_v61 = vcvt.s32.f32 %v3444_v26  ;;  %vm3468_vm6 = vcmp.eq.s32.totalorder %v3463_v5, 2  ;;  %vm3465_vm7 = vcmp.eq.s32.totalorder %v3463_v5, 0 }
 0x3de   :  { %v3537_v28 = vsub.s32 %v3533_v57, %v3536_v51  ;;  %vm3464_vm8 = vcmp.lt.s32.totalorder %v3463_v5, 2  ;;  %v3560_v21 = vsel %vm3475_vm10, %v3559_v34, %v3535_v29 }
 0x3df   :  { %v3449_v12 = vand.u32 2147483647, %v3448_v18  ;;  %v3562_v54 = vsel %vm3474_vm11, 0, %v3560_v21 }
 0x3e0   :  { %v3539_v19 = vsub.s32 0, %v3537_v28  ;;  %v3566_v32 = vadd.s32 3, %v3562_v54 }
 0x3e1   :  { %v3452_v17 = vmul.f32 %v3451_v61, %v3449_v12 }
 0x3e2   :  { %v3982_v37 = vmin.u32 %v3539_v19, %v3537_v28 }
 0x3e3   :  { %v3453_v47 = vxor.u32 2147483648, %v3452_v17 }
 0x3e4   :  { %v3541_v45 = vclz %v3982_v37 }
 0x3e5   :  { %v3454_v16 = vsel %vm3371_vm3, %v3453_v47, %v3452_v17 }
 0x3e6   :  { %v3457_v55 = vsel %vm3370_vm4, %v6908_v24, %v3454_v16  ;;  %v3983_v23 = vadd.s32 4294967294, %v3541_v45  ;;  %v3567_v24 = vand.u32 3, %v3566_v32 }
 0x3e7   :  { %4253 = vcosq.f32 %v3457_v55 }
 0x3e8   :  { %4255 = vsinq.f32 %v3457_v55  ;;  %vm3984_vm5 = vcmp.lt.s32.totalorder %v3983_v23, 0  ;;  %vm3572_vm12 = vcmp.eq.s32.totalorder %v3567_v24, 2  ;;  %vm3569_vm13 = vcmp.eq.s32.totalorder %v3567_v24, 0 }
 0x3e9   :  { %v3544_v3 = vsel %vm3984_vm5, 0, %v3983_v23  ;;  %vm3568_vm14 = vcmp.lt.s32.totalorder %v3567_v24, 2 }
 0x3ea   :  { %v3545_v15 = vsub.s32 32, %v3544_v3  ;;  %v3549_v7 = vsub.s32 4294967266, %v3544_v3  ;;  %v3546_v60 = vshll.u32 %v3537_v28, %v3544_v3 }
 0x3ec   :  { %v3547_v14 = vshrl.u32 %v3529_v44, %v3545_v15  ;;  %v3550_v31 = vadd.s32 127, %v3549_v7 }
 0x3ee   :  { %v3548_v53 = vor.u32 %v3547_v14, %v3546_v60  ;;  %v3551_v13 = vshll.u32 %v3550_v31, 23 }
 0x3f0   :  { %v3552_v49 = vor.u32 4788187, %v3551_v13  ;;  %v3555_v2 = vcvt.s32.f32 %v3548_v53 }
 0x3f1   :  { %v4254_v11 = vpop.eup %4253 }
 0x3f2   :  { %v4256_v10 = vpop.eup %4255  ;;  %v3469_v6 = vxor.u32 2147483648, %v4254_v11  ;;  %v3553_v38 = vand.u32 2147483647, %v3552_v49 }
 0x3f3   :  { %v3466_v4 = vxor.u32 2147483648, %v4256_v10 }
 0x3f4   :  { %v3470_v50 = vsel %vm3468_vm6, %v3469_v6, %v4256_v10  ;;  %v3556_v58 = vmul.f32 %v3555_v2, %v3553_v38 }
 0x3f5   :  { %v3467_v48 = vsel %vm3465_vm7, %v4254_v11, %v3466_v4 }
 0x3f6   :  { %v3471_v8 = vsel %vm3464_vm8, %v3467_v48, %v3470_v50  ;;  %v3557_v22 = vxor.u32 2147483648, %v3556_v58 }
 0x3f7   :  { %v3472_v0 = vsel %vm3461_vm9, nan, %v3471_v8 }
 0x3f8   :  { %3813 = vst [vmem:[#allocation2 + $0xe0] sm:$0xff] %v3472_v0  ;;  %v3558_v46 = vsel %vm3475_vm10, %v3557_v22, %v3556_v58 }
 0x3f9   :  { %v3561_v30 = vsel %vm3474_vm11, %v6964_v20, %v3558_v46 }
 0x3fa   :  { %4257 = vcosq.f32 %v3561_v30 }
 0x3fb   :  { %4259 = vsinq.f32 %v3561_v30 }
 0x404   :  { %v4258_v35 = vpop.eup %4257 }
 0x405   :  { %v4260_v27 = vpop.eup %4259  ;;  %v3573_v41 = vxor.u32 2147483648, %v4258_v35 }
 0x406   :  { %v3570_v33 = vxor.u32 2147483648, %v4260_v27 }
 0x407   :  { %v3574_v56 = vsel %vm3572_vm12, %v3573_v41, %v4260_v27 }
 0x408   :  { %v3571_v42 = vsel %vm3569_vm13, %v4258_v35, %v3570_v33 }
 0x409   :  { %v3575_v43 = vsel %vm3568_vm14, %v3571_v42, %v3574_v56 }
 0x40a   :  { %v3576_v52 = vsel %vm3565_vm15, nan, %v3575_v43 }
 0x40b   :  { %3814 = vst [vmem:[#allocation2 + $0xe8] sm:$0xff] %v3576_v52 }
 0x40c   :  { %4272 = shalt.err (!%p4269_p4)
}
 0x40d   :  { %s4273_s6 = scalar_lea.hbm %s7182_s3, 4096 }
 0x40e   :  { %p4274_p5 = scmp.ne.s32.totalorder %s7182_s3, %s4273_s6  ;;  %p4277_p6 = scmp.lt.u32.totalorder %s4273_s6, %s7182_s3 }
 0x410   :  { %p4279_p7 = pnand %p4277_p6, %p4274_p5 }
 0x412   :  { %4282 = shalt.err (!%p4279_p7)
}
 0x413   :  { %s4293_s11 = smov 256   ;;  %s4294_s12 = smov 16  }
 0x414   :  { %3828 = dma.vmem_to_hbm [thread:$0]  %s3823_s29, 4096, %s7182_s3, [#allocation3], %s4293_s11, %s4293_s11, %s4294_s12  }
 0x415   :  { %4283 = dma.done.wait [#allocation3], 4096  }
 0x416   :  { %4284 = vsyncadd [#allocation3], 4294963200 }
 0x417   :  { %3832 = vsyncpa [#allocation3], 1 }

</bundles_post_ra>
